<compile_context>
chip_gen: v6e
topology: v6e:2x2x1
jax: 0.10.0
libtpu: 0.0.40
codegen_flags: <defaults>
</compile_context>

<pallas_src>
import functools

import jax
import jax.numpy as jnp
from jax import lax
from jax.experimental import pallas as pl
from jax.experimental.pallas import tpu as pltpu


# -----------------------------------------------------------------------------
# VMEM budget / tiling helpers
# -----------------------------------------------------------------------------
def _vmem_limit_bytes():
    """Generation-aware scoped-VMEM cap (v5e/v6e: 128 MiB phys, v7x: 64 MiB)."""
    phys = 64 * 1024 * 1024  # conservative default == v7x physical
    try:
        info = pltpu.get_tpu_info()
        phys = int(getattr(info, "vmem_capacity_bytes", phys))
    except Exception:
        pass
    if phys >= 128 * 1024 * 1024:
        return 100 * 1024 * 1024          # v5e / v6e: plenty of headroom
    return 48 * 1024 * 1024               # v7x: headroom under 64 MiB physical


def _round_up(x, m):
    return ((x + m - 1) // m) * m


def _pick_tile(dim, candidates=(512, 256, 128)):
    """Return (tile, padded_dim) for one matmul dimension.

    Small dims use a single full-extent block (always layout-legal); larger
    dims use the biggest MXU-friendly divisor (256-multiples preferred for
    v6e/v7x's 256x256 MXUs); ragged dims (e.g. 197 ViT tokens) are padded up
    to a 128 multiple in the wrapper so blocks stay VMEM-sized and pipelined.
    """
    if dim <= candidates[-1]:
        return dim, dim
    for t in candidates:
        if dim % t == 0:
            return t, dim
    t = candidates[-1]
    return t, _round_up(dim, t)


def _seq_tile(n, candidates=(256, 128)):
    for t in candidates:
        if n % t == 0:
            return t
    # TODO(synk): masked tails instead of a full-length fallback for ragged N.
    return n


def _linear_vmem_bytes(tm, tn, tk, dtype, with_bias):
    """Rough per-step VMEM footprint of the tiled linear (double-buffered)."""
    ib = jnp.dtype(dtype).itemsize
    total = 2 * tm * tk * ib          # x blocks
    total += 2 * tk * tn * ib         # w blocks
    total += 2 * tm * tn * ib         # out blocks
    total += tm * tn * 4              # f32 accumulator scratch
    if with_bias:
        total += 2 * tn * ib
    return total


# -----------------------------------------------------------------------------
# Tiled linear kernels: o = x @ w (+ b)
# -----------------------------------------------------------------------------
def _linear_kernel(x_ref, w_ref, o_ref, acc_ref):
    @pl.when(pl.program_id(2) == 0)
    def _init():
        acc_ref[...] = jnp.zeros_like(acc_ref)

    acc_ref[...] += jnp.dot(x_ref[...], w_ref[...],
                            preferred_element_type=jnp.float32)

    @pl.when(pl.program_id(2) == pl.num_programs(2) - 1)
    def _finalize():
        o_ref[...] = acc_ref[...].astype(o_ref.dtype)


def _linear_bias_kernel(x_ref, w_ref, b_ref, o_ref, acc_ref):
    @pl.when(pl.program_id(2) == 0)
    def _init():
        acc_ref[...] = jnp.zeros_like(acc_ref)

    acc_ref[...] += jnp.dot(x_ref[...], w_ref[...],
                            preferred_element_type=jnp.float32)

    @pl.when(pl.program_id(2) == pl.num_programs(2) - 1)
    def _finalize():
        o_ref[...] = (acc_ref[...] +
                      b_ref[...].astype(jnp.float32)).astype(o_ref.dtype)


def pallas_linear(x, w, b=None, *, vmem_limit=None):
    """x: (M, K) @ w: (K, N) [+ b: (N,)] -> (M, N). Tiled, pipelined, f32 acc."""
    if vmem_limit is None:
        vmem_limit = _vmem_limit_bytes()
    M, K = x.shape
    N = w.shape[1]
    dtype = x.dtype

    tm, Mp = _pick_tile(M)
    tk, Kp = _pick_tile(K)

    # Prefer one full-width (lane-dense) output tile: removes x re-reads
    # across the output axis and yields large unmasked stores.  Fall back to
    # a tiled output axis if that would blow the VMEM budget.
    tn_full = N if N <= 128 else _round_up(N, 128)
    if _linear_vmem_bytes(tm, tn_full, tk, dtype, b is not None) <= vmem_limit // 2:
        tn, Np = tn_full, tn_full
    else:
        tn, Np = _pick_tile(N)

    # Ragged shapes: zero-pad to tile multiples (exact for matmul), slice out.
    if (Mp, Kp) != (M, K):
        x = jnp.pad(x, ((0, Mp - M), (0, Kp - K)))
    if (Kp, Np) != (K, N):
        w = jnp.pad(w, ((0, Kp - K), (0, Np - N)))

    grid = (Mp // tm, Np // tn, Kp // tk)
    x_spec = pl.BlockSpec((tm, tk), lambda i, j, k: (i, k))
    w_spec = pl.BlockSpec((tk, tn), lambda i, j, k: (k, j))
    o_spec = pl.BlockSpec((tm, tn), lambda i, j, k: (i, j))

    if b is None:
        kernel = _linear_kernel
        in_specs = [x_spec, w_spec]
        args = (x, w)
    else:
        if Np != N:
            b = jnp.pad(b, (0, Np - N))
        kernel = _linear_bias_kernel
        in_specs = [x_spec, w_spec, pl.BlockSpec((1, tn), lambda i, j, k: (0, j))]
        args = (x, w, b.reshape(1, Np))

    out = pl.pallas_call(
        kernel,
        out_shape=jax.ShapeDtypeStruct((Mp, Np), dtype),
        grid_spec=pltpu.PrefetchScalarGridSpec(
            num_scalar_prefetch=0,
            grid=grid,
            in_specs=in_specs,
            out_specs=o_spec,
            scratch_shapes=[pltpu.VMEM((tm, tn), jnp.float32)],
        ),
        compiler_params=pltpu.CompilerParams(
            dimension_semantics=("parallel", "parallel", "arbitrary"),
            vmem_limit_bytes=vmem_limit),
    )(*args)

    if (Mp, Np) != (M, N):
        out = out[:M, :N]
    return out


# -----------------------------------------------------------------------------
# Flash attention kernel: grid (B, q-tiles, kv-tiles), all heads per step.
# -----------------------------------------------------------------------------
def _flash_attn_kernel(q_ref, k_ref, v_ref, o_ref, m_scr, l_scr, acc_scr, *,
                       scale):
    """q_ref: (tq, H, D); k_ref/v_ref: (tk, H, D); o_ref: (tq, H*D).

    Scratch (resident across the innermost "arbitrary" kv grid axis):
      m_scr: (H, tq, 1) running row max, l_scr: (H, tq, 1) running denom,
      acc_scr: (H, tq, D) un-normalized output accumulator (all f32).
    """
    kv_i = pl.program_id(2)
    H = q_ref.shape[1]
    D = q_ref.shape[2]

    @pl.when(kv_i == 0)
    def _init():
        m_scr[...] = jnp.full(m_scr.shape, -jnp.inf, dtype=m_scr.dtype)
        l_scr[...] = jnp.zeros_like(l_scr)
        acc_scr[...] = jnp.zeros_like(acc_scr)

    # Static unroll over heads; each iteration ends with scratch stores so the
    # live set stays O(tq * tk).
    for h in range(H):
        # Per-head ref slices (no full-plane value loads).  The 1/sqrt(D)
        # scale is folded into q (tq*D mults) instead of the (tq, tk) scores.
        qh = q_ref[:, h, :] * scale                      # (tq, D)
        kh = k_ref[:, h, :]                              # (tk, D)
        vh = v_ref[:, h, :]                              # (tk, D)

        # q @ k^T contracting the last dims (no explicit transpose), f32 acc.
        s = lax.dot_general(qh, kh, (((1,), (1,)), ((), ())),
                            preferred_element_type=jnp.float32)   # (tq, tk)

        # Online-softmax update; normalization deferred to finalize.
        m_prev = m_scr[h]                                # (tq, 1)
        m_new = jnp.maximum(m_prev, jnp.max(s, axis=-1, keepdims=True))
        alpha = jnp.exp(m_prev - m_new)
        p = jnp.exp(s - m_new)                           # un-normalized probs
        l_scr[h] = alpha * l_scr[h] + jnp.sum(p, axis=-1, keepdims=True)
        acc_scr[h] = alpha * acc_scr[h] + jnp.dot(
            p.astype(vh.dtype), vh, preferred_element_type=jnp.float32)
        m_scr[h] = m_new

    @pl.when(kv_i == pl.num_programs(2) - 1)
    def _finalize():
        # Deferred softmax normalization: H*tq*D exact divides once per q
        # tile (instead of H*tq*tk multiplies per kv step).  Head h lands in
        # channel columns [h*D, (h+1)*D) of the lane-dense (tq, C) tile,
        # matching torch's (attn @ v).transpose(1, 2).reshape(B, N, C).
        for h in range(H):
            oh = acc_scr[h] / l_scr[h]                   # (tq, D)
            o_ref[:, h * D:(h + 1) * D] = oh.astype(o_ref.dtype)


def pallas_attention_core(qkv, num_heads, scale, *, vmem_limit=None):
    """qkv: (B, N, 3, H, D) packed QKV -> (B, N, H*D) attention output."""
    if vmem_limit is None:
        vmem_limit = _vmem_limit_bytes()
    B, N, _, H, D = qkv.shape
    C = H * D
    tq = _seq_tile(N)
    tk = _seq_tile(N)
    grid = (B, N // tq, N // tk)

    kern = functools.partial(_flash_attn_kernel, scale=scale)
    # q / k / v planes selected via the block index along the "3" axis;
    # squeezed (None) dims drop out -> kernel refs are (tile, H, D).
    q_spec = pl.BlockSpec((None, tq, None, H, D),
                          lambda b, qi, ki: (b, qi, 0, 0, 0))
    k_spec = pl.BlockSpec((None, tk, None, H, D),
                          lambda b, qi, ki: (b, ki, 1, 0, 0))
    v_spec = pl.BlockSpec((None, tk, None, H, D),
                          lambda b, qi, ki: (b, ki, 2, 0, 0))
    # Output block index is constant across the kv axis -> resident accumulator.
    o_spec = pl.BlockSpec((None, tq, C), lambda b, qi, ki: (b, qi, 0))

    return pl.pallas_call(
        kern,
        out_shape=jax.ShapeDtypeStruct((B, N, C), qkv.dtype),
        grid_spec=pltpu.PrefetchScalarGridSpec(
            num_scalar_prefetch=0,
            grid=grid,
            in_specs=[q_spec, k_spec, v_spec],
            out_specs=o_spec,
            scratch_shapes=[
                pltpu.VMEM((H, tq, 1), jnp.float32),   # running max m
                pltpu.VMEM((H, tq, 1), jnp.float32),   # running denom l
                pltpu.VMEM((H, tq, D), jnp.float32),   # un-normalized output
            ],
        ),
        compiler_params=pltpu.CompilerParams(
            dimension_semantics=("parallel", "parallel", "arbitrary"),
            vmem_limit_bytes=vmem_limit),
    )(qkv, qkv, qkv)


# -----------------------------------------------------------------------------
# Forward pass (reproduces Attention.forward for x of shape (B, N, C))
# -----------------------------------------------------------------------------
def attention_forward(x, params, num_heads):
    B, N, C = x.shape
    H = num_heads
    D = C // H
    scale = D ** -0.5
    vmem_limit = _vmem_limit_bytes()

    # QKV projection: no-bias fast path (qkv_bias=False in the module).
    qkv = pallas_linear(x.reshape(B * N, C), params["w_qkv"],
                        vmem_limit=vmem_limit)                     # (B*N, 3C)
    # Contiguous reshape matching torch's .reshape(B, N, 3, H, D): no transpose.
    qkv = qkv.reshape(B, N, 3, H, D)

    # Scaled dot-product attention; output already in (B, N, C) layout.
    o = pallas_attention_core(qkv, H, scale, vmem_limit=vmem_limit)

    # Output projection (with bias).  proj_drop is identity (p = 0).
    out = pallas_linear(o.reshape(B * N, C), params["w_proj"],
                        params["b_proj"], vmem_limit=vmem_limit)   # (B*N, C)
    return out.reshape(B, N, C)


# -----------------------------------------------------------------------------
# Pure-JAX reference for sanity checking
# -----------------------------------------------------------------------------
def attention_reference(x, params, num_heads):
    B, N, C = x.shape
    H = num_heads
    D = C // H
    scale = D ** -0.5
    qkv = x.reshape(B * N, C) @ params["w_qkv"]            # qkv_bias=False
    qkv = qkv.reshape(B, N, 3, H, D).transpose(2, 0, 3, 1, 4)
    q, k, v = qkv[0], qkv[1], qkv[2]
    attn = jnp.einsum("bhqd,bhkd->bhqk", q, k) * scale
    attn = jax.nn.softmax(attn, axis=-1)
    o = jnp.einsum("bhqk,bhkd->bhqd", attn, v)
    o = o.transpose(0, 2, 1, 3).reshape(B * N, C)
    out = o @ params["w_proj"] + params["b_proj"]
    return out.reshape(B, N, C)


# -----------------------------------------------------------------------------
# Main
# -----------------------------------------------------------------------------
if __name__ == "__main__":
    B, N, C = 2, 8, 32
    num_heads = 8

    key = jax.random.PRNGKey(0)
    k_x, k_qkv, k_proj_w, k_proj_b = jax.random.split(key, 4)

    x = jax.random.normal(k_x, (B, N, C), dtype=jnp.float32)

    # Weights stored as (Cin, Cout), i.e. torch Linear weight transposed.
    params = {
        "w_qkv": jax.random.normal(k_qkv, (C, 3 * C), dtype=jnp.float32) * 0.05,
        "w_proj": jax.random.normal(k_proj_w, (C, C), dtype=jnp.float32) * 0.05,
        "b_proj": jax.random.normal(k_proj_b, (C,), dtype=jnp.float32) * 0.05,
    }

    fwd = jax.jit(attention_forward, static_argnums=2)
    out = jax.block_until_ready(fwd(x, params, num_heads))

    ref = attention_reference(x, params, num_heads)
    assert out.shape == (B, N, C), out.shape
    # Normalization now uses exact division; residual error comes from the
    # MXU's default f32 matmul precision (same in kernel and reference).
    assert jnp.allclose(out, ref, atol=2e-3, rtol=2e-3), \
        float(jnp.max(jnp.abs(out - ref)))

    print("KERNEL_OK")
</pallas_src>

<mosaic_0001>
module attributes {stable_mosaic.version = 11 : i64} {
  func.func @_linear_kernel(%arg0: i32, %arg1: i32, %arg2: i32, %arg3: memref<16x32xf32, #tpu.memory_space<vmem>>, %arg4: memref<32x96xf32, #tpu.memory_space<vmem>>, %arg5: memref<16x96xf32, #tpu.memory_space<vmem>>, %arg6: memref<16x96xf32, #tpu.memory_space<vmem>>) attributes {dimension_semantics = [#tpu.dimension_semantics<parallel>, #tpu.dimension_semantics<parallel>, #tpu.dimension_semantics<arbitrary>], iteration_bounds = array<i64: 1, 1, 1>, scalar_prefetch = 0 : i64, scratch_operands = 1 : i64, tpu.core_type = #tpu.core_type<tc>, window_params = [{transform_indices = @transform_0, window_bounds = array<i64: 16, 32>}, {transform_indices = @transform_1, window_bounds = array<i64: 32, 96>}, {transform_indices = @transform_2, window_bounds = array<i64: 16, 96>}]} {
    %c0_i32 = arith.constant 0 : i32
    %0 = arith.cmpi eq, %arg2, %c0_i32 : i32
    %1 = arith.extui %0 : i1 to i32
    %c0_i32_0 = arith.constant 0 : i32
    %2 = arith.cmpi ne, %1, %c0_i32_0 : i32
    scf.if %2 {
      %cst_10 = arith.constant 0.000000e+00 : f32
      %12 = vector.broadcast %cst_10 : f32 to vector<16x96xf32>
      %c0_11 = arith.constant 0 : index
      %c0_12 = arith.constant 0 : index
      %13 = vector.load %arg6[%c0_11, %c0_12] : memref<16x96xf32, #tpu.memory_space<vmem>>, vector<16x96xf32>
      tpu.vector_store %arg6[%c0_11, %c0_12], %12 {strides = array<i32>} : memref<16x96xf32, #tpu.memory_space<vmem>>, vector<16x96xf32>,
    } else {
    }
    %c0 = arith.constant 0 : index
    %c0_1 = arith.constant 0 : index
    %3 = vector.load %arg6[%c0, %c0_1] : memref<16x96xf32, #tpu.memory_space<vmem>>, vector<16x96xf32>
    %c0_2 = arith.constant 0 : index
    %c0_3 = arith.constant 0 : index
    %4 = vector.load %arg3[%c0_2, %c0_3] : memref<16x32xf32, #tpu.memory_space<vmem>>, vector<16x32xf32>
    %c0_4 = arith.constant 0 : index
    %c0_5 = arith.constant 0 : index
    %5 = vector.load %arg4[%c0_4, %c0_5] : memref<32x96xf32, #tpu.memory_space<vmem>>, vector<32x96xf32>
    %cst = arith.constant dense<0.000000e+00> : vector<16x96xf32>
    %6 = tpu.matmul %4, %5, %cst {dimension_numbers = #tpu.dot_dimension_numbers<[1], [0], [0], [1], [0, 0, 1, 1], [], []>} : vector<16x32xf32>, vector<32x96xf32>, vector<16x96xf32> -> vector<16x96xf32>
    %7 = arith.addf %3, %6 : vector<16x96xf32>
    %c0_6 = arith.constant 0 : index
    %c0_7 = arith.constant 0 : index
    %8 = vector.load %arg6[%c0_6, %c0_7] : memref<16x96xf32, #tpu.memory_space<vmem>>, vector<16x96xf32>
    tpu.vector_store %arg6[%c0_6, %c0_7], %7 {strides = array<i32>} : memref<16x96xf32, #tpu.memory_space<vmem>>, vector<16x96xf32>,
    %c0_i32_8 = arith.constant 0 : i32
    %9 = arith.cmpi eq, %arg2, %c0_i32_8 : i32
    %10 = arith.extui %9 : i1 to i32
    %c0_i32_9 = arith.constant 0 : i32
    %11 = arith.cmpi ne, %10, %c0_i32_9 : i32
    scf.if %11 {
      %c0_10 = arith.constant 0 : index
      %c0_11 = arith.constant 0 : index
      %12 = vector.load %arg6[%c0_10, %c0_11] : memref<16x96xf32, #tpu.memory_space<vmem>>, vector<16x96xf32>
      %c0_12 = arith.constant 0 : index
      %c0_13 = arith.constant 0 : index
      %13 = vector.load %arg5[%c0_12, %c0_13] : memref<16x96xf32, #tpu.memory_space<vmem>>, vector<16x96xf32>
      tpu.vector_store %arg5[%c0_12, %c0_13], %12 {strides = array<i32>} : memref<16x96xf32, #tpu.memory_space<vmem>>, vector<16x96xf32>,
    } else {
    }
    return
  }
  func.func @transform_0(%arg0: i32, %arg1: i32, %arg2: i32) -> (i32, i32) {
    %c0_i32 = arith.constant 0 : i32
    return %arg0, %arg2 : i32, i32
  }
  func.func @transform_1(%arg0: i32, %arg1: i32, %arg2: i32) -> (i32, i32) {
    %c0_i32 = arith.constant 0 : i32
    return %arg2, %arg1 : i32, i32
  }
  func.func @transform_2(%arg0: i32, %arg1: i32, %arg2: i32) -> (i32, i32) {
    %c0_i32 = arith.constant 0 : i32
    return %arg0, %arg1 : i32, i32
  }
}

module attributes {stable_mosaic.version = 11 : i64} {
  func.func @_linear_bias_kernel(%arg0: i32, %arg1: i32, %arg2: i32, %arg3: memref<16x32xf32, #tpu.memory_space<vmem>>, %arg4: memref<32x32xf32, #tpu.memory_space<vmem>>, %arg5: memref<1x32xf32, #tpu.memory_space<vmem>>, %arg6: memref<16x32xf32, #tpu.memory_space<vmem>>, %arg7: memref<16x32xf32, #tpu.memory_space<vmem>>) attributes {dimension_semantics = [#tpu.dimension_semantics<parallel>, #tpu.dimension_semantics<parallel>, #tpu.dimension_semantics<arbitrary>], iteration_bounds = array<i64: 1, 1, 1>, scalar_prefetch = 0 : i64, scratch_operands = 1 : i64, tpu.core_type = #tpu.core_type<tc>, window_params = [{transform_indices = @transform_0, window_bounds = array<i64: 16, 32>}, {transform_indices = @transform_1, window_bounds = array<i64: 32, 32>}, {transform_indices = @transform_2, window_bounds = array<i64: 1, 32>}, {transform_indices = @transform_3, window_bounds = array<i64: 16, 32>}]} {
    %c0_i32 = arith.constant 0 : i32
    %0 = arith.cmpi eq, %arg2, %c0_i32 : i32
    %1 = arith.extui %0 : i1 to i32
    %c0_i32_0 = arith.constant 0 : i32
    %2 = arith.cmpi ne, %1, %c0_i32_0 : i32
    scf.if %2 {
      %cst_10 = arith.constant 0.000000e+00 : f32
      %12 = vector.broadcast %cst_10 : f32 to vector<16x32xf32>
      %c0_11 = arith.constant 0 : index
      %c0_12 = arith.constant 0 : index
      %13 = vector.load %arg7[%c0_11, %c0_12] : memref<16x32xf32, #tpu.memory_space<vmem>>, vector<16x32xf32>
      tpu.vector_store %arg7[%c0_11, %c0_12], %12 {strides = array<i32>} : memref<16x32xf32, #tpu.memory_space<vmem>>, vector<16x32xf32>,
    } else {
    }
    %c0 = arith.constant 0 : index
    %c0_1 = arith.constant 0 : index
    %3 = vector.load %arg7[%c0, %c0_1] : memref<16x32xf32, #tpu.memory_space<vmem>>, vector<16x32xf32>
    %c0_2 = arith.constant 0 : index
    %c0_3 = arith.constant 0 : index
    %4 = vector.load %arg3[%c0_2, %c0_3] : memref<16x32xf32, #tpu.memory_space<vmem>>, vector<16x32xf32>
    %c0_4 = arith.constant 0 : index
    %c0_5 = arith.constant 0 : index
    %5 = vector.load %arg4[%c0_4, %c0_5] : memref<32x32xf32, #tpu.memory_space<vmem>>, vector<32x32xf32>
    %cst = arith.constant dense<0.000000e+00> : vector<16x32xf32>
    %6 = tpu.matmul %4, %5, %cst {dimension_numbers = #tpu.dot_dimension_numbers<[1], [0], [0], [1], [0, 0, 1, 1], [], []>} : vector<16x32xf32>, vector<32x32xf32>, vector<16x32xf32> -> vector<16x32xf32>
    %7 = arith.addf %3, %6 : vector<16x32xf32>
    %c0_6 = arith.constant 0 : index
    %c0_7 = arith.constant 0 : index
    %8 = vector.load %arg7[%c0_6, %c0_7] : memref<16x32xf32, #tpu.memory_space<vmem>>, vector<16x32xf32>
    tpu.vector_store %arg7[%c0_6, %c0_7], %7 {strides = array<i32>} : memref<16x32xf32, #tpu.memory_space<vmem>>, vector<16x32xf32>,
    %c0_i32_8 = arith.constant 0 : i32
    %9 = arith.cmpi eq, %arg2, %c0_i32_8 : i32
    %10 = arith.extui %9 : i1 to i32
    %c0_i32_9 = arith.constant 0 : i32
    %11 = arith.cmpi ne, %10, %c0_i32_9 : i32
    scf.if %11 {
      %c0_10 = arith.constant 0 : index
      %c0_11 = arith.constant 0 : index
      %12 = vector.load %arg7[%c0_10, %c0_11] : memref<16x32xf32, #tpu.memory_space<vmem>>, vector<16x32xf32>
      %c0_12 = arith.constant 0 : index
      %c0_13 = arith.constant 0 : index
      %13 = vector.load %arg5[%c0_12, %c0_13] : memref<1x32xf32, #tpu.memory_space<vmem>>, vector<1x32xf32>
      %14 = vector.broadcast %13 : vector<1x32xf32> to vector<16x32xf32>
      %15 = arith.addf %12, %14 : vector<16x32xf32>
      %c0_14 = arith.constant 0 : index
      %c0_15 = arith.constant 0 : index
      %16 = vector.load %arg6[%c0_14, %c0_15] : memref<16x32xf32, #tpu.memory_space<vmem>>, vector<16x32xf32>
      tpu.vector_store %arg6[%c0_14, %c0_15], %15 {strides = array<i32>} : memref<16x32xf32, #tpu.memory_space<vmem>>, vector<16x32xf32>,
    } else {
    }
    return
  }
  func.func @transform_0(%arg0: i32, %arg1: i32, %arg2: i32) -> (i32, i32) {
    %c0_i32 = arith.constant 0 : i32
    return %arg0, %arg2 : i32, i32
  }
  func.func @transform_1(%arg0: i32, %arg1: i32, %arg2: i32) -> (i32, i32) {
    %c0_i32 = arith.constant 0 : i32
    return %arg2, %arg1 : i32, i32
  }
  func.func @transform_2(%arg0: i32, %arg1: i32, %arg2: i32) -> (i32, i32) {
    %c0_i32 = arith.constant 0 : i32
    %c0_i32_0 = arith.constant 0 : i32
    return %c0_i32, %arg1 : i32, i32
  }
  func.func @transform_3(%arg0: i32, %arg1: i32, %arg2: i32) -> (i32, i32) {
    %c0_i32 = arith.constant 0 : i32
    return %arg0, %arg1 : i32, i32
  }
}

module attributes {stable_mosaic.version = 11 : i64} {
  func.func @_flash_attn_kernel(%arg0: i32, %arg1: i32, %arg2: i32, %arg3: memref<1x8x1x8x4xf32, #tpu.memory_space<vmem>>, %arg4: memref<1x8x1x8x4xf32, #tpu.memory_space<vmem>>, %arg5: memref<1x8x1x8x4xf32, #tpu.memory_space<vmem>>, %arg6: memref<1x8x32xf32, #tpu.memory_space<vmem>>, %arg7: memref<8x8x1xf32, #tpu.memory_space<vmem>>, %arg8: memref<8x8x1xf32, #tpu.memory_space<vmem>>, %arg9: memref<8x8x4xf32, #tpu.memory_space<vmem>>) attributes {dimension_semantics = [#tpu.dimension_semantics<parallel>, #tpu.dimension_semantics<parallel>, #tpu.dimension_semantics<arbitrary>], iteration_bounds = array<i64: 2, 1, 1>, scalar_prefetch = 0 : i64, scratch_operands = 3 : i64, tpu.core_type = #tpu.core_type<tc>, window_params = [{transform_indices = @transform_0, window_bounds = array<i64: 1, 8, 1, 8, 4>}, {transform_indices = @transform_1, window_bounds = array<i64: 1, 8, 1, 8, 4>}, {transform_indices = @transform_2, window_bounds = array<i64: 1, 8, 1, 8, 4>}, {transform_indices = @transform_3, window_bounds = array<i64: 1, 8, 32>}]} {
    %c0_i32 = arith.constant 0 : i32
    %0 = arith.cmpi eq, %arg2, %c0_i32 : i32
    %1 = arith.extui %0 : i1 to i32
    %c0_i32_0 = arith.constant 0 : i32
    %2 = arith.cmpi ne, %1, %c0_i32_0 : i32
    scf.if %2 {
      %cst_298 = arith.constant 0xFF800000 : f32
      %326 = vector.broadcast %cst_298 : f32 to vector<8x8x1xf32>
      %c0_299 = arith.constant 0 : index
      %c0_300 = arith.constant 0 : index
      %c0_301 = arith.constant 0 : index
      %327 = vector.load %arg7[%c0_299, %c0_300, %c0_301] : memref<8x8x1xf32, #tpu.memory_space<vmem>>, vector<8x8x1xf32>
      tpu.vector_store %arg7[%c0_299, %c0_300, %c0_301], %326 {strides = array<i32>} : memref<8x8x1xf32, #tpu.memory_space<vmem>>, vector<8x8x1xf32>,
      %cst_302 = arith.constant 0.000000e+00 : f32
      %328 = vector.broadcast %cst_302 : f32 to vector<8x8x1xf32>
      %c0_303 = arith.constant 0 : index
      %c0_304 = arith.constant 0 : index
      %c0_305 = arith.constant 0 : index
      %329 = vector.load %arg8[%c0_303, %c0_304, %c0_305] : memref<8x8x1xf32, #tpu.memory_space<vmem>>, vector<8x8x1xf32>
      tpu.vector_store %arg8[%c0_303, %c0_304, %c0_305], %328 {strides = array<i32>} : memref<8x8x1xf32, #tpu.memory_space<vmem>>, vector<8x8x1xf32>,
      %cst_306 = arith.constant 0.000000e+00 : f32
      %330 = vector.broadcast %cst_306 : f32 to vector<8x8x4xf32>
      %c0_307 = arith.constant 0 : index
      %c0_308 = arith.constant 0 : index
      %c0_309 = arith.constant 0 : index
      %331 = vector.load %arg9[%c0_307, %c0_308, %c0_309] : memref<8x8x4xf32, #tpu.memory_space<vmem>>, vector<8x8x4xf32>
      tpu.vector_store %arg9[%c0_307, %c0_308, %c0_309], %330 {strides = array<i32>} : memref<8x8x4xf32, #tpu.memory_space<vmem>>, vector<8x8x4xf32>,
    } else {
    }
    %c0 = arith.constant 0 : index
    %c0_1 = arith.constant 0 : index
    %c0_2 = arith.constant 0 : index
    %c0_3 = arith.constant 0 : index
    %c0_4 = arith.constant 0 : index
    %3 = vector.load %arg3[%c0, %c0_1, %c0_2, %c0_3, %c0_4] : memref<1x8x1x8x4xf32, #tpu.memory_space<vmem>>, vector<1x8x1x1x4xf32>
    %4 = vector.shape_cast %3 : vector<1x8x1x1x4xf32> to vector<8x4xf32>
    %cst = arith.constant 5.000000e-01 : f32
    %5 = vector.broadcast %cst : f32 to vector<8x4xf32>
    %6 = arith.mulf %4, %5 : vector<8x4xf32>
    %c0_5 = arith.constant 0 : index
    %c0_6 = arith.constant 0 : index
    %c0_7 = arith.constant 0 : index
    %c0_8 = arith.constant 0 : index
    %c0_9 = arith.constant 0 : index
    %7 = vector.load %arg4[%c0_5, %c0_6, %c0_7, %c0_8, %c0_9] : memref<1x8x1x8x4xf32, #tpu.memory_space<vmem>>, vector<1x8x1x1x4xf32>
    %8 = vector.shape_cast %7 : vector<1x8x1x1x4xf32> to vector<8x4xf32>
    %c0_10 = arith.constant 0 : index
    %c0_11 = arith.constant 0 : index
    %c0_12 = arith.constant 0 : index
    %c0_13 = arith.constant 0 : index
    %c0_14 = arith.constant 0 : index
    %9 = vector.load %arg5[%c0_10, %c0_11, %c0_12, %c0_13, %c0_14] : memref<1x8x1x8x4xf32, #tpu.memory_space<vmem>>, vector<1x8x1x1x4xf32>
    %10 = vector.shape_cast %9 : vector<1x8x1x1x4xf32> to vector<8x4xf32>
    %cst_15 = arith.constant dense<0.000000e+00> : vector<8x8xf32>
    %11 = tpu.matmul %6, %8, %cst_15 {dimension_numbers = #tpu.dot_dimension_numbers<[1], [1], [0], [0], [0, 0, 1, 0], [], []>} : vector<8x4xf32>, vector<8x4xf32>, vector<8x8xf32> -> vector<8x8xf32>
    %c0_16 = arith.constant 0 : index
    %c0_17 = arith.constant 0 : index
    %c0_18 = arith.constant 0 : index
    %12 = vector.load %arg7[%c0_16, %c0_17, %c0_18] : memref<8x8x1xf32, #tpu.memory_space<vmem>>, vector<1x8x1xf32>
    %13 = vector.shape_cast %12 : vector<1x8x1xf32> to vector<8x1xf32>
    %cst_19 = arith.constant dense<0xFF800000> : vector<8xf32>
    %14 = vector.multi_reduction <maximumf>, %11, %cst_19 [1] : vector<8x8xf32> to vector<8xf32>
    %15 = vector.shape_cast %14 : vector<8xf32> to vector<8x1xf32>
    %16 = arith.maximumf %13, %15 : vector<8x1xf32>
    %17 = arith.subf %13, %16 : vector<8x1xf32>
    %18 = math.exp %17 : vector<8x1xf32>
    %19 = vector.broadcast %16 : vector<8x1xf32> to vector<8x8xf32>
    %20 = arith.subf %11, %19 : vector<8x8xf32>
    %21 = math.exp %20 : vector<8x8xf32>
    %c0_20 = arith.constant 0 : index
    %c0_21 = arith.constant 0 : index
    %c0_22 = arith.constant 0 : index
    %22 = vector.load %arg8[%c0_20, %c0_21, %c0_22] : memref<8x8x1xf32, #tpu.memory_space<vmem>>, vector<1x8x1xf32>
    %23 = vector.shape_cast %22 : vector<1x8x1xf32> to vector<8x1xf32>
    %24 = arith.mulf %18, %23 : vector<8x1xf32>
    %cst_23 = arith.constant dense<0.000000e+00> : vector<8xf32>
    %25 = vector.multi_reduction <add>, %21, %cst_23 [1] : vector<8x8xf32> to vector<8xf32>
    %26 = vector.shape_cast %25 : vector<8xf32> to vector<8x1xf32>
    %27 = arith.addf %24, %26 : vector<8x1xf32>
    %c0_24 = arith.constant 0 : index
    %c0_25 = arith.constant 0 : index
    %c0_26 = arith.constant 0 : index
    %28 = vector.load %arg8[%c0_24, %c0_25, %c0_26] : memref<8x8x1xf32, #tpu.memory_space<vmem>>, vector<1x8x1xf32>
    %29 = vector.shape_cast %28 : vector<1x8x1xf32> to vector<8x1xf32>
    %30 = vector.shape_cast %27 : vector<8x1xf32> to vector<1x8x1xf32>
    tpu.vector_store %arg8[%c0_24, %c0_25, %c0_26], %30 {strides = array<i32>} : memref<8x8x1xf32, #tpu.memory_space<vmem>>, vector<1x8x1xf32>,
    %c0_27 = arith.constant 0 : index
    %c0_28 = arith.constant 0 : index
    %c0_29 = arith.constant 0 : index
    %31 = vector.load %arg9[%c0_27, %c0_28, %c0_29] : memref<8x8x4xf32, #tpu.memory_space<vmem>>, vector<1x8x4xf32>
    %32 = vector.shape_cast %31 : vector<1x8x4xf32> to vector<8x4xf32>
    %33 = vector.broadcast %18 : vector<8x1xf32> to vector<8x4xf32>
    %34 = arith.mulf %33, %32 : vector<8x4xf32>
    %cst_30 = arith.constant dense<0.000000e+00> : vector<8x4xf32>
    %35 = tpu.matmul %21, %10, %cst_30 {dimension_numbers = #tpu.dot_dimension_numbers<[1], [0], [0], [1], [0, 0, 1, 1], [], []>} : vector<8x8xf32>, vector<8x4xf32>, vector<8x4xf32> -> vector<8x4xf32>
    %36 = arith.addf %34, %35 : vector<8x4xf32>
    %c0_31 = arith.constant 0 : index
    %c0_32 = arith.constant 0 : index
    %c0_33 = arith.constant 0 : index
    %37 = vector.load %arg9[%c0_31, %c0_32, %c0_33] : memref<8x8x4xf32, #tpu.memory_space<vmem>>, vector<1x8x4xf32>
    %38 = vector.shape_cast %37 : vector<1x8x4xf32> to vector<8x4xf32>
    %39 = vector.shape_cast %36 : vector<8x4xf32> to vector<1x8x4xf32>
    tpu.vector_store %arg9[%c0_31, %c0_32, %c0_33], %39 {strides = array<i32>} : memref<8x8x4xf32, #tpu.memory_space<vmem>>, vector<1x8x4xf32>,
    %c0_34 = arith.constant 0 : index
    %c0_35 = arith.constant 0 : index
    %c0_36 = arith.constant 0 : index
    %40 = vector.load %arg7[%c0_34, %c0_35, %c0_36] : memref<8x8x1xf32, #tpu.memory_space<vmem>>, vector<1x8x1xf32>
    %41 = vector.shape_cast %40 : vector<1x8x1xf32> to vector<8x1xf32>
    %42 = vector.shape_cast %16 : vector<8x1xf32> to vector<1x8x1xf32>
    tpu.vector_store %arg7[%c0_34, %c0_35, %c0_36], %42 {strides = array<i32>} : memref<8x8x1xf32, #tpu.memory_space<vmem>>, vector<1x8x1xf32>,
    %c0_37 = arith.constant 0 : index
    %c0_38 = arith.constant 0 : index
    %c0_39 = arith.constant 0 : index
    %c1 = arith.constant 1 : index
    %c0_40 = arith.constant 0 : index
    %43 = vector.load %arg3[%c0_37, %c0_38, %c0_39, %c1, %c0_40] : memref<1x8x1x8x4xf32, #tpu.memory_space<vmem>>, vector<1x8x1x1x4xf32>
    %44 = vector.shape_cast %43 : vector<1x8x1x1x4xf32> to vector<8x4xf32>
    %cst_41 = arith.constant 5.000000e-01 : f32
    %45 = vector.broadcast %cst_41 : f32 to vector<8x4xf32>
    %46 = arith.mulf %44, %45 : vector<8x4xf32>
    %c0_42 = arith.constant 0 : index
    %c0_43 = arith.constant 0 : index
    %c0_44 = arith.constant 0 : index
    %c1_45 = arith.constant 1 : index
    %c0_46 = arith.constant 0 : index
    %47 = vector.load %arg4[%c0_42, %c0_43, %c0_44, %c1_45, %c0_46] : memref<1x8x1x8x4xf32, #tpu.memory_space<vmem>>, vector<1x8x1x1x4xf32>
    %48 = vector.shape_cast %47 : vector<1x8x1x1x4xf32> to vector<8x4xf32>
    %c0_47 = arith.constant 0 : index
    %c0_48 = arith.constant 0 : index
    %c0_49 = arith.constant 0 : index
    %c1_50 = arith.constant 1 : index
    %c0_51 = arith.constant 0 : index
    %49 = vector.load %arg5[%c0_47, %c0_48, %c0_49, %c1_50, %c0_51] : memref<1x8x1x8x4xf32, #tpu.memory_space<vmem>>, vector<1x8x1x1x4xf32>
    %50 = vector.shape_cast %49 : vector<1x8x1x1x4xf32> to vector<8x4xf32>
    %cst_52 = arith.constant dense<0.000000e+00> : vector<8x8xf32>
    %51 = tpu.matmul %46, %48, %cst_52 {dimension_numbers = #tpu.dot_dimension_numbers<[1], [1], [0], [0], [0, 0, 1, 0], [], []>} : vector<8x4xf32>, vector<8x4xf32>, vector<8x8xf32> -> vector<8x8xf32>
    %c1_53 = arith.constant 1 : index
    %c0_54 = arith.constant 0 : index
    %c0_55 = arith.constant 0 : index
    %52 = vector.load %arg7[%c1_53, %c0_54, %c0_55] : memref<8x8x1xf32, #tpu.memory_space<vmem>>, vector<1x8x1xf32>
    %53 = vector.shape_cast %52 : vector<1x8x1xf32> to vector<8x1xf32>
    %cst_56 = arith.constant dense<0xFF800000> : vector<8xf32>
    %54 = vector.multi_reduction <maximumf>, %51, %cst_56 [1] : vector<8x8xf32> to vector<8xf32>
    %55 = vector.shape_cast %54 : vector<8xf32> to vector<8x1xf32>
    %56 = arith.maximumf %53, %55 : vector<8x1xf32>
    %57 = arith.subf %53, %56 : vector<8x1xf32>
    %58 = math.exp %57 : vector<8x1xf32>
    %59 = vector.broadcast %56 : vector<8x1xf32> to vector<8x8xf32>
    %60 = arith.subf %51, %59 : vector<8x8xf32>
    %61 = math.exp %60 : vector<8x8xf32>
    %c1_57 = arith.constant 1 : index
    %c0_58 = arith.constant 0 : index
    %c0_59 = arith.constant 0 : index
    %62 = vector.load %arg8[%c1_57, %c0_58, %c0_59] : memref<8x8x1xf32, #tpu.memory_space<vmem>>, vector<1x8x1xf32>
    %63 = vector.shape_cast %62 : vector<1x8x1xf32> to vector<8x1xf32>
    %64 = arith.mulf %58, %63 : vector<8x1xf32>
    %cst_60 = arith.constant dense<0.000000e+00> : vector<8xf32>
    %65 = vector.multi_reduction <add>, %61, %cst_60 [1] : vector<8x8xf32> to vector<8xf32>
    %66 = vector.shape_cast %65 : vector<8xf32> to vector<8x1xf32>
    %67 = arith.addf %64, %66 : vector<8x1xf32>
    %c1_61 = arith.constant 1 : index
    %c0_62 = arith.constant 0 : index
    %c0_63 = arith.constant 0 : index
    %68 = vector.load %arg8[%c1_61, %c0_62, %c0_63] : memref<8x8x1xf32, #tpu.memory_space<vmem>>, vector<1x8x1xf32>
    %69 = vector.shape_cast %68 : vector<1x8x1xf32> to vector<8x1xf32>
    %70 = vector.shape_cast %67 : vector<8x1xf32> to vector<1x8x1xf32>
    tpu.vector_store %arg8[%c1_61, %c0_62, %c0_63], %70 {strides = array<i32>} : memref<8x8x1xf32, #tpu.memory_space<vmem>>, vector<1x8x1xf32>,
    %c1_64 = arith.constant 1 : index
    %c0_65 = arith.constant 0 : index
    %c0_66 = arith.constant 0 : index
    %71 = vector.load %arg9[%c1_64, %c0_65, %c0_66] : memref<8x8x4xf32, #tpu.memory_space<vmem>>, vector<1x8x4xf32>
    %72 = vector.shape_cast %71 : vector<1x8x4xf32> to vector<8x4xf32>
    %73 = vector.broadcast %58 : vector<8x1xf32> to vector<8x4xf32>
    %74 = arith.mulf %73, %72 : vector<8x4xf32>
    %cst_67 = arith.constant dense<0.000000e+00> : vector<8x4xf32>
    %75 = tpu.matmul %61, %50, %cst_67 {dimension_numbers = #tpu.dot_dimension_numbers<[1], [0], [0], [1], [0, 0, 1, 1], [], []>} : vector<8x8xf32>, vector<8x4xf32>, vector<8x4xf32> -> vector<8x4xf32>
    %76 = arith.addf %74, %75 : vector<8x4xf32>
    %c1_68 = arith.constant 1 : index
    %c0_69 = arith.constant 0 : index
    %c0_70 = arith.constant 0 : index
    %77 = vector.load %arg9[%c1_68, %c0_69, %c0_70] : memref<8x8x4xf32, #tpu.memory_space<vmem>>, vector<1x8x4xf32>
    %78 = vector.shape_cast %77 : vector<1x8x4xf32> to vector<8x4xf32>
    %79 = vector.shape_cast %76 : vector<8x4xf32> to vector<1x8x4xf32>
    tpu.vector_store %arg9[%c1_68, %c0_69, %c0_70], %79 {strides = array<i32>} : memref<8x8x4xf32, #tpu.memory_space<vmem>>, vector<1x8x4xf32>,
    %c1_71 = arith.constant 1 : index
    %c0_72 = arith.constant 0 : index
    %c0_73 = arith.constant 0 : index
    %80 = vector.load %arg7[%c1_71, %c0_72, %c0_73] : memref<8x8x1xf32, #tpu.memory_space<vmem>>, vector<1x8x1xf32>
    %81 = vector.shape_cast %80 : vector<1x8x1xf32> to vector<8x1xf32>
    %82 = vector.shape_cast %56 : vector<8x1xf32> to vector<1x8x1xf32>
    tpu.vector_store %arg7[%c1_71, %c0_72, %c0_73], %82 {strides = array<i32>} : memref<8x8x1xf32, #tpu.memory_space<vmem>>, vector<1x8x1xf32>,
    %c0_74 = arith.constant 0 : index
    %c0_75 = arith.constant 0 : index
    %c0_76 = arith.constant 0 : index
    %c2 = arith.constant 2 : index
    %c0_77 = arith.constant 0 : index
    %83 = vector.load %arg3[%c0_74, %c0_75, %c0_76, %c2, %c0_77] : memref<1x8x1x8x4xf32, #tpu.memory_space<vmem>>, vector<1x8x1x1x4xf32>
    %84 = vector.shape_cast %83 : vector<1x8x1x1x4xf32> to vector<8x4xf32>
    %cst_78 = arith.constant 5.000000e-01 : f32
    %85 = vector.broadcast %cst_78 : f32 to vector<8x4xf32>
    %86 = arith.mulf %84, %85 : vector<8x4xf32>
    %c0_79 = arith.constant 0 : index
    %c0_80 = arith.constant 0 : index
    %c0_81 = arith.constant 0 : index
    %c2_82 = arith.constant 2 : index
    %c0_83 = arith.constant 0 : index
    %87 = vector.load %arg4[%c0_79, %c0_80, %c0_81, %c2_82, %c0_83] : memref<1x8x1x8x4xf32, #tpu.memory_space<vmem>>, vector<1x8x1x1x4xf32>
    %88 = vector.shape_cast %87 : vector<1x8x1x1x4xf32> to vector<8x4xf32>
    %c0_84 = arith.constant 0 : index
    %c0_85 = arith.constant 0 : index
    %c0_86 = arith.constant 0 : index
    %c2_87 = arith.constant 2 : index
    %c0_88 = arith.constant 0 : index
    %89 = vector.load %arg5[%c0_84, %c0_85, %c0_86, %c2_87, %c0_88] : memref<1x8x1x8x4xf32, #tpu.memory_space<vmem>>, vector<1x8x1x1x4xf32>
    %90 = vector.shape_cast %89 : vector<1x8x1x1x4xf32> to vector<8x4xf32>
    %cst_89 = arith.constant dense<0.000000e+00> : vector<8x8xf32>
    %91 = tpu.matmul %86, %88, %cst_89 {dimension_numbers = #tpu.dot_dimension_numbers<[1], [1], [0], [0], [0, 0, 1, 0], [], []>} : vector<8x4xf32>, vector<8x4xf32>, vector<8x8xf32> -> vector<8x8xf32>
    %c2_90 = arith.constant 2 : index
    %c0_91 = arith.constant 0 : index
    %c0_92 = arith.constant 0 : index
    %92 = vector.load %arg7[%c2_90, %c0_91, %c0_92] : memref<8x8x1xf32, #tpu.memory_space<vmem>>, vector<1x8x1xf32>
    %93 = vector.shape_cast %92 : vector<1x8x1xf32> to vector<8x1xf32>
    %cst_93 = arith.constant dense<0xFF800000> : vector<8xf32>
    %94 = vector.multi_reduction <maximumf>, %91, %cst_93 [1] : vector<8x8xf32> to vector<8xf32>
    %95 = vector.shape_cast %94 : vector<8xf32> to vector<8x1xf32>
    %96 = arith.maximumf %93, %95 : vector<8x1xf32>
    %97 = arith.subf %93, %96 : vector<8x1xf32>
    %98 = math.exp %97 : vector<8x1xf32>
    %99 = vector.broadcast %96 : vector<8x1xf32> to vector<8x8xf32>
    %100 = arith.subf %91, %99 : vector<8x8xf32>
    %101 = math.exp %100 : vector<8x8xf32>
    %c2_94 = arith.constant 2 : index
    %c0_95 = arith.constant 0 : index
    %c0_96 = arith.constant 0 : index
    %102 = vector.load %arg8[%c2_94, %c0_95, %c0_96] : memref<8x8x1xf32, #tpu.memory_space<vmem>>, vector<1x8x1xf32>
    %103 = vector.shape_cast %102 : vector<1x8x1xf32> to vector<8x1xf32>
    %104 = arith.mulf %98, %103 : vector<8x1xf32>
    %cst_97 = arith.constant dense<0.000000e+00> : vector<8xf32>
    %105 = vector.multi_reduction <add>, %101, %cst_97 [1] : vector<8x8xf32> to vector<8xf32>
    %106 = vector.shape_cast %105 : vector<8xf32> to vector<8x1xf32>
    %107 = arith.addf %104, %106 : vector<8x1xf32>
    %c2_98 = arith.constant 2 : index
    %c0_99 = arith.constant 0 : index
    %c0_100 = arith.constant 0 : index
    %108 = vector.load %arg8[%c2_98, %c0_99, %c0_100] : memref<8x8x1xf32, #tpu.memory_space<vmem>>, vector<1x8x1xf32>
    %109 = vector.shape_cast %108 : vector<1x8x1xf32> to vector<8x1xf32>
    %110 = vector.shape_cast %107 : vector<8x1xf32> to vector<1x8x1xf32>
    tpu.vector_store %arg8[%c2_98, %c0_99, %c0_100], %110 {strides = array<i32>} : memref<8x8x1xf32, #tpu.memory_space<vmem>>, vector<1x8x1xf32>,
    %c2_101 = arith.constant 2 : index
    %c0_102 = arith.constant 0 : index
    %c0_103 = arith.constant 0 : index
    %111 = vector.load %arg9[%c2_101, %c0_102, %c0_103] : memref<8x8x4xf32, #tpu.memory_space<vmem>>, vector<1x8x4xf32>
    %112 = vector.shape_cast %111 : vector<1x8x4xf32> to vector<8x4xf32>
    %113 = vector.broadcast %98 : vector<8x1xf32> to vector<8x4xf32>
    %114 = arith.mulf %113, %112 : vector<8x4xf32>
    %cst_104 = arith.constant dense<0.000000e+00> : vector<8x4xf32>
    %115 = tpu.matmul %101, %90, %cst_104 {dimension_numbers = #tpu.dot_dimension_numbers<[1], [0], [0], [1], [0, 0, 1, 1], [], []>} : vector<8x8xf32>, vector<8x4xf32>, vector<8x4xf32> -> vector<8x4xf32>
    %116 = arith.addf %114, %115 : vector<8x4xf32>
    %c2_105 = arith.constant 2 : index
    %c0_106 = arith.constant 0 : index
    %c0_107 = arith.constant 0 : index
    %117 = vector.load %arg9[%c2_105, %c0_106, %c0_107] : memref<8x8x4xf32, #tpu.memory_space<vmem>>, vector<1x8x4xf32>
    %118 = vector.shape_cast %117 : vector<1x8x4xf32> to vector<8x4xf32>
    %119 = vector.shape_cast %116 : vector<8x4xf32> to vector<1x8x4xf32>
    tpu.vector_store %arg9[%c2_105, %c0_106, %c0_107], %119 {strides = array<i32>} : memref<8x8x4xf32, #tpu.memory_space<vmem>>, vector<1x8x4xf32>,
    %c2_108 = arith.constant 2 : index
    %c0_109 = arith.constant 0 : index
    %c0_110 = arith.constant 0 : index
    %120 = vector.load %arg7[%c2_108, %c0_109, %c0_110] : memref<8x8x1xf32, #tpu.memory_space<vmem>>, vector<1x8x1xf32>
    %121 = vector.shape_cast %120 : vector<1x8x1xf32> to vector<8x1xf32>
    %122 = vector.shape_cast %96 : vector<8x1xf32> to vector<1x8x1xf32>
    tpu.vector_store %arg7[%c2_108, %c0_109, %c0_110], %122 {strides = array<i32>} : memref<8x8x1xf32, #tpu.memory_space<vmem>>, vector<1x8x1xf32>,
    %c0_111 = arith.constant 0 : index
    %c0_112 = arith.constant 0 : index
    %c0_113 = arith.constant 0 : index
    %c3 = arith.constant 3 : index
    %c0_114 = arith.constant 0 : index
    %123 = vector.load %arg3[%c0_111, %c0_112, %c0_113, %c3, %c0_114] : memref<1x8x1x8x4xf32, #tpu.memory_space<vmem>>, vector<1x8x1x1x4xf32>
    %124 = vector.shape_cast %123 : vector<1x8x1x1x4xf32> to vector<8x4xf32>
    %cst_115 = arith.constant 5.000000e-01 : f32
    %125 = vector.broadcast %cst_115 : f32 to vector<8x4xf32>
    %126 = arith.mulf %124, %125 : vector<8x4xf32>
    %c0_116 = arith.constant 0 : index
    %c0_117 = arith.constant 0 : index
    %c0_118 = arith.constant 0 : index
    %c3_119 = arith.constant 3 : index
    %c0_120 = arith.constant 0 : index
    %127 = vector.load %arg4[%c0_116, %c0_117, %c0_118, %c3_119, %c0_120] : memref<1x8x1x8x4xf32, #tpu.memory_space<vmem>>, vector<1x8x1x1x4xf32>
    %128 = vector.shape_cast %127 : vector<1x8x1x1x4xf32> to vector<8x4xf32>
    %c0_121 = arith.constant 0 : index
    %c0_122 = arith.constant 0 : index
    %c0_123 = arith.constant 0 : index
    %c3_124 = arith.constant 3 : index
    %c0_125 = arith.constant 0 : index
    %129 = vector.load %arg5[%c0_121, %c0_122, %c0_123, %c3_124, %c0_125] : memref<1x8x1x8x4xf32, #tpu.memory_space<vmem>>, vector<1x8x1x1x4xf32>
    %130 = vector.shape_cast %129 : vector<1x8x1x1x4xf32> to vector<8x4xf32>
    %cst_126 = arith.constant dense<0.000000e+00> : vector<8x8xf32>
    %131 = tpu.matmul %126, %128, %cst_126 {dimension_numbers = #tpu.dot_dimension_numbers<[1], [1], [0], [0], [0, 0, 1, 0], [], []>} : vector<8x4xf32>, vector<8x4xf32>, vector<8x8xf32> -> vector<8x8xf32>
    %c3_127 = arith.constant 3 : index
    %c0_128 = arith.constant 0 : index
    %c0_129 = arith.constant 0 : index
    %132 = vector.load %arg7[%c3_127, %c0_128, %c0_129] : memref<8x8x1xf32, #tpu.memory_space<vmem>>, vector<1x8x1xf32>
    %133 = vector.shape_cast %132 : vector<1x8x1xf32> to vector<8x1xf32>
    %cst_130 = arith.constant dense<0xFF800000> : vector<8xf32>
    %134 = vector.multi_reduction <maximumf>, %131, %cst_130 [1] : vector<8x8xf32> to vector<8xf32>
    %135 = vector.shape_cast %134 : vector<8xf32> to vector<8x1xf32>
    %136 = arith.maximumf %133, %135 : vector<8x1xf32>
    %137 = arith.subf %133, %136 : vector<8x1xf32>
    %138 = math.exp %137 : vector<8x1xf32>
    %139 = vector.broadcast %136 : vector<8x1xf32> to vector<8x8xf32>
    %140 = arith.subf %131, %139 : vector<8x8xf32>
    %141 = math.exp %140 : vector<8x8xf32>
    %c3_131 = arith.constant 3 : index
    %c0_132 = arith.constant 0 : index
    %c0_133 = arith.constant 0 : index
    %142 = vector.load %arg8[%c3_131, %c0_132, %c0_133] : memref<8x8x1xf32, #tpu.memory_space<vmem>>, vector<1x8x1xf32>
    %143 = vector.shape_cast %142 : vector<1x8x1xf32> to vector<8x1xf32>
    %144 = arith.mulf %138, %143 : vector<8x1xf32>
    %cst_134 = arith.constant dense<0.000000e+00> : vector<8xf32>
    %145 = vector.multi_reduction <add>, %141, %cst_134 [1] : vector<8x8xf32> to vector<8xf32>
    %146 = vector.shape_cast %145 : vector<8xf32> to vector<8x1xf32>
    %147 = arith.addf %144, %146 : vector<8x1xf32>
    %c3_135 = arith.constant 3 : index
    %c0_136 = arith.constant 0 : index
    %c0_137 = arith.constant 0 : index
    %148 = vector.load %arg8[%c3_135, %c0_136, %c0_137] : memref<8x8x1xf32, #tpu.memory_space<vmem>>, vector<1x8x1xf32>
    %149 = vector.shape_cast %148 : vector<1x8x1xf32> to vector<8x1xf32>
    %150 = vector.shape_cast %147 : vector<8x1xf32> to vector<1x8x1xf32>
    tpu.vector_store %arg8[%c3_135, %c0_136, %c0_137], %150 {strides = array<i32>} : memref<8x8x1xf32, #tpu.memory_space<vmem>>, vector<1x8x1xf32>,
    %c3_138 = arith.constant 3 : index
    %c0_139 = arith.constant 0 : index
    %c0_140 = arith.constant 0 : index
    %151 = vector.load %arg9[%c3_138, %c0_139, %c0_140] : memref<8x8x4xf32, #tpu.memory_space<vmem>>, vector<1x8x4xf32>
    %152 = vector.shape_cast %151 : vector<1x8x4xf32> to vector<8x4xf32>
    %153 = vector.broadcast %138 : vector<8x1xf32> to vector<8x4xf32>
    %154 = arith.mulf %153, %152 : vector<8x4xf32>
    %cst_141 = arith.constant dense<0.000000e+00> : vector<8x4xf32>
    %155 = tpu.matmul %141, %130, %cst_141 {dimension_numbers = #tpu.dot_dimension_numbers<[1], [0], [0], [1], [0, 0, 1, 1], [], []>} : vector<8x8xf32>, vector<8x4xf32>, vector<8x4xf32> -> vector<8x4xf32>
    %156 = arith.addf %154, %155 : vector<8x4xf32>
    %c3_142 = arith.constant 3 : index
    %c0_143 = arith.constant 0 : index
    %c0_144 = arith.constant 0 : index
    %157 = vector.load %arg9[%c3_142, %c0_143, %c0_144] : memref<8x8x4xf32, #tpu.memory_space<vmem>>, vector<1x8x4xf32>
    %158 = vector.shape_cast %157 : vector<1x8x4xf32> to vector<8x4xf32>
    %159 = vector.shape_cast %156 : vector<8x4xf32> to vector<1x8x4xf32>
    tpu.vector_store %arg9[%c3_142, %c0_143, %c0_144], %159 {strides = array<i32>} : memref<8x8x4xf32, #tpu.memory_space<vmem>>, vector<1x8x4xf32>,
    %c3_145 = arith.constant 3 : index
    %c0_146 = arith.constant 0 : index
    %c0_147 = arith.constant 0 : index
    %160 = vector.load %arg7[%c3_145, %c0_146, %c0_147] : memref<8x8x1xf32, #tpu.memory_space<vmem>>, vector<1x8x1xf32>
    %161 = vector.shape_cast %160 : vector<1x8x1xf32> to vector<8x1xf32>
    %162 = vector.shape_cast %136 : vector<8x1xf32> to vector<1x8x1xf32>
    tpu.vector_store %arg7[%c3_145, %c0_146, %c0_147], %162 {strides = array<i32>} : memref<8x8x1xf32, #tpu.memory_space<vmem>>, vector<1x8x1xf32>,
    %c0_148 = arith.constant 0 : index
    %c0_149 = arith.constant 0 : index
    %c0_150 = arith.constant 0 : index
    %c4 = arith.constant 4 : index
    %c0_151 = arith.constant 0 : index
    %163 = vector.load %arg3[%c0_148, %c0_149, %c0_150, %c4, %c0_151] : memref<1x8x1x8x4xf32, #tpu.memory_space<vmem>>, vector<1x8x1x1x4xf32>
    %164 = vector.shape_cast %163 : vector<1x8x1x1x4xf32> to vector<8x4xf32>
    %cst_152 = arith.constant 5.000000e-01 : f32
    %165 = vector.broadcast %cst_152 : f32 to vector<8x4xf32>
    %166 = arith.mulf %164, %165 : vector<8x4xf32>
    %c0_153 = arith.constant 0 : index
    %c0_154 = arith.constant 0 : index
    %c0_155 = arith.constant 0 : index
    %c4_156 = arith.constant 4 : index
    %c0_157 = arith.constant 0 : index
    %167 = vector.load %arg4[%c0_153, %c0_154, %c0_155, %c4_156, %c0_157] : memref<1x8x1x8x4xf32, #tpu.memory_space<vmem>>, vector<1x8x1x1x4xf32>
    %168 = vector.shape_cast %167 : vector<1x8x1x1x4xf32> to vector<8x4xf32>
    %c0_158 = arith.constant 0 : index
    %c0_159 = arith.constant 0 : index
    %c0_160 = arith.constant 0 : index
    %c4_161 = arith.constant 4 : index
    %c0_162 = arith.constant 0 : index
    %169 = vector.load %arg5[%c0_158, %c0_159, %c0_160, %c4_161, %c0_162] : memref<1x8x1x8x4xf32, #tpu.memory_space<vmem>>, vector<1x8x1x1x4xf32>
    %170 = vector.shape_cast %169 : vector<1x8x1x1x4xf32> to vector<8x4xf32>
    %cst_163 = arith.constant dense<0.000000e+00> : vector<8x8xf32>
    %171 = tpu.matmul %166, %168, %cst_163 {dimension_numbers = #tpu.dot_dimension_numbers<[1], [1], [0], [0], [0, 0, 1, 0], [], []>} : vector<8x4xf32>, vector<8x4xf32>, vector<8x8xf32> -> vector<8x8xf32>
    %c4_164 = arith.constant 4 : index
    %c0_165 = arith.constant 0 : index
    %c0_166 = arith.constant 0 : index
    %172 = vector.load %arg7[%c4_164, %c0_165, %c0_166] : memref<8x8x1xf32, #tpu.memory_space<vmem>>, vector<1x8x1xf32>
    %173 = vector.shape_cast %172 : vector<1x8x1xf32> to vector<8x1xf32>
    %cst_167 = arith.constant dense<0xFF800000> : vector<8xf32>
    %174 = vector.multi_reduction <maximumf>, %171, %cst_167 [1] : vector<8x8xf32> to vector<8xf32>
    %175 = vector.shape_cast %174 : vector<8xf32> to vector<8x1xf32>
    %176 = arith.maximumf %173, %175 : vector<8x1xf32>
    %177 = arith.subf %173, %176 : vector<8x1xf32>
    %178 = math.exp %177 : vector<8x1xf32>
    %179 = vector.broadcast %176 : vector<8x1xf32> to vector<8x8xf32>
    %180 = arith.subf %171, %179 : vector<8x8xf32>
    %181 = math.exp %180 : vector<8x8xf32>
    %c4_168 = arith.constant 4 : index
    %c0_169 = arith.constant 0 : index
    %c0_170 = arith.constant 0 : index
    %182 = vector.load %arg8[%c4_168, %c0_169, %c0_170] : memref<8x8x1xf32, #tpu.memory_space<vmem>>, vector<1x8x1xf32>
    %183 = vector.shape_cast %182 : vector<1x8x1xf32> to vector<8x1xf32>
    %184 = arith.mulf %178, %183 : vector<8x1xf32>
    %cst_171 = arith.constant dense<0.000000e+00> : vector<8xf32>
    %185 = vector.multi_reduction <add>, %181, %cst_171 [1] : vector<8x8xf32> to vector<8xf32>
    %186 = vector.shape_cast %185 : vector<8xf32> to vector<8x1xf32>
    %187 = arith.addf %184, %186 : vector<8x1xf32>
    %c4_172 = arith.constant 4 : index
    %c0_173 = arith.constant 0 : index
    %c0_174 = arith.constant 0 : index
    %188 = vector.load %arg8[%c4_172, %c0_173, %c0_174] : memref<8x8x1xf32, #tpu.memory_space<vmem>>, vector<1x8x1xf32>
    %189 = vector.shape_cast %188 : vector<1x8x1xf32> to vector<8x1xf32>
    %190 = vector.shape_cast %187 : vector<8x1xf32> to vector<1x8x1xf32>
    tpu.vector_store %arg8[%c4_172, %c0_173, %c0_174], %190 {strides = array<i32>} : memref<8x8x1xf32, #tpu.memory_space<vmem>>, vector<1x8x1xf32>,
    %c4_175 = arith.constant 4 : index
    %c0_176 = arith.constant 0 : index
    %c0_177 = arith.constant 0 : index
    %191 = vector.load %arg9[%c4_175, %c0_176, %c0_177] : memref<8x8x4xf32, #tpu.memory_space<vmem>>, vector<1x8x4xf32>
    %192 = vector.shape_cast %191 : vector<1x8x4xf32> to vector<8x4xf32>
    %193 = vector.broadcast %178 : vector<8x1xf32> to vector<8x4xf32>
    %194 = arith.mulf %193, %192 : vector<8x4xf32>
    %cst_178 = arith.constant dense<0.000000e+00> : vector<8x4xf32>
    %195 = tpu.matmul %181, %170, %cst_178 {dimension_numbers = #tpu.dot_dimension_numbers<[1], [0], [0], [1], [0, 0, 1, 1], [], []>} : vector<8x8xf32>, vector<8x4xf32>, vector<8x4xf32> -> vector<8x4xf32>
    %196 = arith.addf %194, %195 : vector<8x4xf32>
    %c4_179 = arith.constant 4 : index
    %c0_180 = arith.constant 0 : index
    %c0_181 = arith.constant 0 : index
    %197 = vector.load %arg9[%c4_179, %c0_180, %c0_181] : memref<8x8x4xf32, #tpu.memory_space<vmem>>, vector<1x8x4xf32>
    %198 = vector.shape_cast %197 : vector<1x8x4xf32> to vector<8x4xf32>
    %199 = vector.shape_cast %196 : vector<8x4xf32> to vector<1x8x4xf32>
    tpu.vector_store %arg9[%c4_179, %c0_180, %c0_181], %199 {strides = array<i32>} : memref<8x8x4xf32, #tpu.memory_space<vmem>>, vector<1x8x4xf32>,
    %c4_182 = arith.constant 4 : index
    %c0_183 = arith.constant 0 : index
    %c0_184 = arith.constant 0 : index
    %200 = vector.load %arg7[%c4_182, %c0_183, %c0_184] : memref<8x8x1xf32, #tpu.memory_space<vmem>>, vector<1x8x1xf32>
    %201 = vector.shape_cast %200 : vector<1x8x1xf32> to vector<8x1xf32>
    %202 = vector.shape_cast %176 : vector<8x1xf32> to vector<1x8x1xf32>
    tpu.vector_store %arg7[%c4_182, %c0_183, %c0_184], %202 {strides = array<i32>} : memref<8x8x1xf32, #tpu.memory_space<vmem>>, vector<1x8x1xf32>,
    %c0_185 = arith.constant 0 : index
    %c0_186 = arith.constant 0 : index
    %c0_187 = arith.constant 0 : index
    %c5 = arith.constant 5 : index
    %c0_188 = arith.constant 0 : index
    %203 = vector.load %arg3[%c0_185, %c0_186, %c0_187, %c5, %c0_188] : memref<1x8x1x8x4xf32, #tpu.memory_space<vmem>>, vector<1x8x1x1x4xf32>
    %204 = vector.shape_cast %203 : vector<1x8x1x1x4xf32> to vector<8x4xf32>
    %cst_189 = arith.constant 5.000000e-01 : f32
    %205 = vector.broadcast %cst_189 : f32 to vector<8x4xf32>
    %206 = arith.mulf %204, %205 : vector<8x4xf32>
    %c0_190 = arith.constant 0 : index
    %c0_191 = arith.constant 0 : index
    %c0_192 = arith.constant 0 : index
    %c5_193 = arith.constant 5 : index
    %c0_194 = arith.constant 0 : index
    %207 = vector.load %arg4[%c0_190, %c0_191, %c0_192, %c5_193, %c0_194] : memref<1x8x1x8x4xf32, #tpu.memory_space<vmem>>, vector<1x8x1x1x4xf32>
    %208 = vector.shape_cast %207 : vector<1x8x1x1x4xf32> to vector<8x4xf32>
    %c0_195 = arith.constant 0 : index
    %c0_196 = arith.constant 0 : index
    %c0_197 = arith.constant 0 : index
    %c5_198 = arith.constant 5 : index
    %c0_199 = arith.constant 0 : index
    %209 = vector.load %arg5[%c0_195, %c0_196, %c0_197, %c5_198, %c0_199] : memref<1x8x1x8x4xf32, #tpu.memory_space<vmem>>, vector<1x8x1x1x4xf32>
    %210 = vector.shape_cast %209 : vector<1x8x1x1x4xf32> to vector<8x4xf32>
    %cst_200 = arith.constant dense<0.000000e+00> : vector<8x8xf32>
    %211 = tpu.matmul %206, %208, %cst_200 {dimension_numbers = #tpu.dot_dimension_numbers<[1], [1], [0], [0], [0, 0, 1, 0], [], []>} : vector<8x4xf32>, vector<8x4xf32>, vector<8x8xf32> -> vector<8x8xf32>
    %c5_201 = arith.constant 5 : index
    %c0_202 = arith.constant 0 : index
    %c0_203 = arith.constant 0 : index
    %212 = vector.load %arg7[%c5_201, %c0_202, %c0_203] : memref<8x8x1xf32, #tpu.memory_space<vmem>>, vector<1x8x1xf32>
    %213 = vector.shape_cast %212 : vector<1x8x1xf32> to vector<8x1xf32>
    %cst_204 = arith.constant dense<0xFF800000> : vector<8xf32>
    %214 = vector.multi_reduction <maximumf>, %211, %cst_204 [1] : vector<8x8xf32> to vector<8xf32>
    %215 = vector.shape_cast %214 : vector<8xf32> to vector<8x1xf32>
    %216 = arith.maximumf %213, %215 : vector<8x1xf32>
    %217 = arith.subf %213, %216 : vector<8x1xf32>
    %218 = math.exp %217 : vector<8x1xf32>
    %219 = vector.broadcast %216 : vector<8x1xf32> to vector<8x8xf32>
    %220 = arith.subf %211, %219 : vector<8x8xf32>
    %221 = math.exp %220 : vector<8x8xf32>
    %c5_205 = arith.constant 5 : index
    %c0_206 = arith.constant 0 : index
    %c0_207 = arith.constant 0 : index
    %222 = vector.load %arg8[%c5_205, %c0_206, %c0_207] : memref<8x8x1xf32, #tpu.memory_space<vmem>>, vector<1x8x1xf32>
    %223 = vector.shape_cast %222 : vector<1x8x1xf32> to vector<8x1xf32>
    %224 = arith.mulf %218, %223 : vector<8x1xf32>
    %cst_208 = arith.constant dense<0.000000e+00> : vector<8xf32>
    %225 = vector.multi_reduction <add>, %221, %cst_208 [1] : vector<8x8xf32> to vector<8xf32>
    %226 = vector.shape_cast %225 : vector<8xf32> to vector<8x1xf32>
    %227 = arith.addf %224, %226 : vector<8x1xf32>
    %c5_209 = arith.constant 5 : index
    %c0_210 = arith.constant 0 : index
    %c0_211 = arith.constant 0 : index
    %228 = vector.load %arg8[%c5_209, %c0_210, %c0_211] : memref<8x8x1xf32, #tpu.memory_space<vmem>>, vector<1x8x1xf32>
    %229 = vector.shape_cast %228 : vector<1x8x1xf32> to vector<8x1xf32>
    %230 = vector.shape_cast %227 : vector<8x1xf32> to vector<1x8x1xf32>
    tpu.vector_store %arg8[%c5_209, %c0_210, %c0_211], %230 {strides = array<i32>} : memref<8x8x1xf32, #tpu.memory_space<vmem>>, vector<1x8x1xf32>,
    %c5_212 = arith.constant 5 : index
    %c0_213 = arith.constant 0 : index
    %c0_214 = arith.constant 0 : index
    %231 = vector.load %arg9[%c5_212, %c0_213, %c0_214] : memref<8x8x4xf32, #tpu.memory_space<vmem>>, vector<1x8x4xf32>
    %232 = vector.shape_cast %231 : vector<1x8x4xf32> to vector<8x4xf32>
    %233 = vector.broadcast %218 : vector<8x1xf32> to vector<8x4xf32>
    %234 = arith.mulf %233, %232 : vector<8x4xf32>
    %cst_215 = arith.constant dense<0.000000e+00> : vector<8x4xf32>
    %235 = tpu.matmul %221, %210, %cst_215 {dimension_numbers = #tpu.dot_dimension_numbers<[1], [0], [0], [1], [0, 0, 1, 1], [], []>} : vector<8x8xf32>, vector<8x4xf32>, vector<8x4xf32> -> vector<8x4xf32>
    %236 = arith.addf %234, %235 : vector<8x4xf32>
    %c5_216 = arith.constant 5 : index
    %c0_217 = arith.constant 0 : index
    %c0_218 = arith.constant 0 : index
    %237 = vector.load %arg9[%c5_216, %c0_217, %c0_218] : memref<8x8x4xf32, #tpu.memory_space<vmem>>, vector<1x8x4xf32>
    %238 = vector.shape_cast %237 : vector<1x8x4xf32> to vector<8x4xf32>
    %239 = vector.shape_cast %236 : vector<8x4xf32> to vector<1x8x4xf32>
    tpu.vector_store %arg9[%c5_216, %c0_217, %c0_218], %239 {strides = array<i32>} : memref<8x8x4xf32, #tpu.memory_space<vmem>>, vector<1x8x4xf32>,
    %c5_219 = arith.constant 5 : index
    %c0_220 = arith.constant 0 : index
    %c0_221 = arith.constant 0 : index
    %240 = vector.load %arg7[%c5_219, %c0_220, %c0_221] : memref<8x8x1xf32, #tpu.memory_space<vmem>>, vector<1x8x1xf32>
    %241 = vector.shape_cast %240 : vector<1x8x1xf32> to vector<8x1xf32>
    %242 = vector.shape_cast %216 : vector<8x1xf32> to vector<1x8x1xf32>
    tpu.vector_store %arg7[%c5_219, %c0_220, %c0_221], %242 {strides = array<i32>} : memref<8x8x1xf32, #tpu.memory_space<vmem>>, vector<1x8x1xf32>,
    %c0_222 = arith.constant 0 : index
    %c0_223 = arith.constant 0 : index
    %c0_224 = arith.constant 0 : index
    %c6 = arith.constant 6 : index
    %c0_225 = arith.constant 0 : index
    %243 = vector.load %arg3[%c0_222, %c0_223, %c0_224, %c6, %c0_225] : memref<1x8x1x8x4xf32, #tpu.memory_space<vmem>>, vector<1x8x1x1x4xf32>
    %244 = vector.shape_cast %243 : vector<1x8x1x1x4xf32> to vector<8x4xf32>
    %cst_226 = arith.constant 5.000000e-01 : f32
    %245 = vector.broadcast %cst_226 : f32 to vector<8x4xf32>
    %246 = arith.mulf %244, %245 : vector<8x4xf32>
    %c0_227 = arith.constant 0 : index
    %c0_228 = arith.constant 0 : index
    %c0_229 = arith.constant 0 : index
    %c6_230 = arith.constant 6 : index
    %c0_231 = arith.constant 0 : index
    %247 = vector.load %arg4[%c0_227, %c0_228, %c0_229, %c6_230, %c0_231] : memref<1x8x1x8x4xf32, #tpu.memory_space<vmem>>, vector<1x8x1x1x4xf32>
    %248 = vector.shape_cast %247 : vector<1x8x1x1x4xf32> to vector<8x4xf32>
    %c0_232 = arith.constant 0 : index
    %c0_233 = arith.constant 0 : index
    %c0_234 = arith.constant 0 : index
    %c6_235 = arith.constant 6 : index
    %c0_236 = arith.constant 0 : index
    %249 = vector.load %arg5[%c0_232, %c0_233, %c0_234, %c6_235, %c0_236] : memref<1x8x1x8x4xf32, #tpu.memory_space<vmem>>, vector<1x8x1x1x4xf32>
    %250 = vector.shape_cast %249 : vector<1x8x1x1x4xf32> to vector<8x4xf32>
    %cst_237 = arith.constant dense<0.000000e+00> : vector<8x8xf32>
    %251 = tpu.matmul %246, %248, %cst_237 {dimension_numbers = #tpu.dot_dimension_numbers<[1], [1], [0], [0], [0, 0, 1, 0], [], []>} : vector<8x4xf32>, vector<8x4xf32>, vector<8x8xf32> -> vector<8x8xf32>
    %c6_238 = arith.constant 6 : index
    %c0_239 = arith.constant 0 : index
    %c0_240 = arith.constant 0 : index
    %252 = vector.load %arg7[%c6_238, %c0_239, %c0_240] : memref<8x8x1xf32, #tpu.memory_space<vmem>>, vector<1x8x1xf32>
    %253 = vector.shape_cast %252 : vector<1x8x1xf32> to vector<8x1xf32>
    %cst_241 = arith.constant dense<0xFF800000> : vector<8xf32>
    %254 = vector.multi_reduction <maximumf>, %251, %cst_241 [1] : vector<8x8xf32> to vector<8xf32>
    %255 = vector.shape_cast %254 : vector<8xf32> to vector<8x1xf32>
    %256 = arith.maximumf %253, %255 : vector<8x1xf32>
    %257 = arith.subf %253, %256 : vector<8x1xf32>
    %258 = math.exp %257 : vector<8x1xf32>
    %259 = vector.broadcast %256 : vector<8x1xf32> to vector<8x8xf32>
    %260 = arith.subf %251, %259 : vector<8x8xf32>
    %261 = math.exp %260 : vector<8x8xf32>
    %c6_242 = arith.constant 6 : index
    %c0_243 = arith.constant 0 : index
    %c0_244 = arith.constant 0 : index
    %262 = vector.load %arg8[%c6_242, %c0_243, %c0_244] : memref<8x8x1xf32, #tpu.memory_space<vmem>>, vector<1x8x1xf32>
    %263 = vector.shape_cast %262 : vector<1x8x1xf32> to vector<8x1xf32>
    %264 = arith.mulf %258, %263 : vector<8x1xf32>
    %cst_245 = arith.constant dense<0.000000e+00> : vector<8xf32>
    %265 = vector.multi_reduction <add>, %261, %cst_245 [1] : vector<8x8xf32> to vector<8xf32>
    %266 = vector.shape_cast %265 : vector<8xf32> to vector<8x1xf32>
    %267 = arith.addf %264, %266 : vector<8x1xf32>
    %c6_246 = arith.constant 6 : index
    %c0_247 = arith.constant 0 : index
    %c0_248 = arith.constant 0 : index
    %268 = vector.load %arg8[%c6_246, %c0_247, %c0_248] : memref<8x8x1xf32, #tpu.memory_space<vmem>>, vector<1x8x1xf32>
    %269 = vector.shape_cast %268 : vector<1x8x1xf32> to vector<8x1xf32>
    %270 = vector.shape_cast %267 : vector<8x1xf32> to vector<1x8x1xf32>
    tpu.vector_store %arg8[%c6_246, %c0_247, %c0_248], %270 {strides = array<i32>} : memref<8x8x1xf32, #tpu.memory_space<vmem>>, vector<1x8x1xf32>,
    %c6_249 = arith.constant 6 : index
    %c0_250 = arith.constant 0 : index
    %c0_251 = arith.constant 0 : index
    %271 = vector.load %arg9[%c6_249, %c0_250, %c0_251] : memref<8x8x4xf32, #tpu.memory_space<vmem>>, vector<1x8x4xf32>
    %272 = vector.shape_cast %271 : vector<1x8x4xf32> to vector<8x4xf32>
    %273 = vector.broadcast %258 : vector<8x1xf32> to vector<8x4xf32>
    %274 = arith.mulf %273, %272 : vector<8x4xf32>
    %cst_252 = arith.constant dense<0.000000e+00> : vector<8x4xf32>
    %275 = tpu.matmul %261, %250, %cst_252 {dimension_numbers = #tpu.dot_dimension_numbers<[1], [0], [0], [1], [0, 0, 1, 1], [], []>} : vector<8x8xf32>, vector<8x4xf32>, vector<8x4xf32> -> vector<8x4xf32>
    %276 = arith.addf %274, %275 : vector<8x4xf32>
    %c6_253 = arith.constant 6 : index
    %c0_254 = arith.constant 0 : index
    %c0_255 = arith.constant 0 : index
    %277 = vector.load %arg9[%c6_253, %c0_254, %c0_255] : memref<8x8x4xf32, #tpu.memory_space<vmem>>, vector<1x8x4xf32>
    %278 = vector.shape_cast %277 : vector<1x8x4xf32> to vector<8x4xf32>
    %279 = vector.shape_cast %276 : vector<8x4xf32> to vector<1x8x4xf32>
    tpu.vector_store %arg9[%c6_253, %c0_254, %c0_255], %279 {strides = array<i32>} : memref<8x8x4xf32, #tpu.memory_space<vmem>>, vector<1x8x4xf32>,
    %c6_256 = arith.constant 6 : index
    %c0_257 = arith.constant 0 : index
    %c0_258 = arith.constant 0 : index
    %280 = vector.load %arg7[%c6_256, %c0_257, %c0_258] : memref<8x8x1xf32, #tpu.memory_space<vmem>>, vector<1x8x1xf32>
    %281 = vector.shape_cast %280 : vector<1x8x1xf32> to vector<8x1xf32>
    %282 = vector.shape_cast %256 : vector<8x1xf32> to vector<1x8x1xf32>
    tpu.vector_store %arg7[%c6_256, %c0_257, %c0_258], %282 {strides = array<i32>} : memref<8x8x1xf32, #tpu.memory_space<vmem>>, vector<1x8x1xf32>,
    %c0_259 = arith.constant 0 : index
    %c0_260 = arith.constant 0 : index
    %c0_261 = arith.constant 0 : index
    %c7 = arith.constant 7 : index
    %c0_262 = arith.constant 0 : index
    %283 = vector.load %arg3[%c0_259, %c0_260, %c0_261, %c7, %c0_262] : memref<1x8x1x8x4xf32, #tpu.memory_space<vmem>>, vector<1x8x1x1x4xf32>
    %284 = vector.shape_cast %283 : vector<1x8x1x1x4xf32> to vector<8x4xf32>
    %cst_263 = arith.constant 5.000000e-01 : f32
    %285 = vector.broadcast %cst_263 : f32 to vector<8x4xf32>
    %286 = arith.mulf %284, %285 : vector<8x4xf32>
    %c0_264 = arith.constant 0 : index
    %c0_265 = arith.constant 0 : index
    %c0_266 = arith.constant 0 : index
    %c7_267 = arith.constant 7 : index
    %c0_268 = arith.constant 0 : index
    %287 = vector.load %arg4[%c0_264, %c0_265, %c0_266, %c7_267, %c0_268] : memref<1x8x1x8x4xf32, #tpu.memory_space<vmem>>, vector<1x8x1x1x4xf32>
    %288 = vector.shape_cast %287 : vector<1x8x1x1x4xf32> to vector<8x4xf32>
    %c0_269 = arith.constant 0 : index
    %c0_270 = arith.constant 0 : index
    %c0_271 = arith.constant 0 : index
    %c7_272 = arith.constant 7 : index
    %c0_273 = arith.constant 0 : index
    %289 = vector.load %arg5[%c0_269, %c0_270, %c0_271, %c7_272, %c0_273] : memref<1x8x1x8x4xf32, #tpu.memory_space<vmem>>, vector<1x8x1x1x4xf32>
    %290 = vector.shape_cast %289 : vector<1x8x1x1x4xf32> to vector<8x4xf32>
    %cst_274 = arith.constant dense<0.000000e+00> : vector<8x8xf32>
    %291 = tpu.matmul %286, %288, %cst_274 {dimension_numbers = #tpu.dot_dimension_numbers<[1], [1], [0], [0], [0, 0, 1, 0], [], []>} : vector<8x4xf32>, vector<8x4xf32>, vector<8x8xf32> -> vector<8x8xf32>
    %c7_275 = arith.constant 7 : index
    %c0_276 = arith.constant 0 : index
    %c0_277 = arith.constant 0 : index
    %292 = vector.load %arg7[%c7_275, %c0_276, %c0_277] : memref<8x8x1xf32, #tpu.memory_space<vmem>>, vector<1x8x1xf32>
    %293 = vector.shape_cast %292 : vector<1x8x1xf32> to vector<8x1xf32>
    %cst_278 = arith.constant dense<0xFF800000> : vector<8xf32>
    %294 = vector.multi_reduction <maximumf>, %291, %cst_278 [1] : vector<8x8xf32> to vector<8xf32>
    %295 = vector.shape_cast %294 : vector<8xf32> to vector<8x1xf32>
    %296 = arith.maximumf %293, %295 : vector<8x1xf32>
    %297 = arith.subf %293, %296 : vector<8x1xf32>
    %298 = math.exp %297 : vector<8x1xf32>
    %299 = vector.broadcast %296 : vector<8x1xf32> to vector<8x8xf32>
    %300 = arith.subf %291, %299 : vector<8x8xf32>
    %301 = math.exp %300 : vector<8x8xf32>
    %c7_279 = arith.constant 7 : index
    %c0_280 = arith.constant 0 : index
    %c0_281 = arith.constant 0 : index
    %302 = vector.load %arg8[%c7_279, %c0_280, %c0_281] : memref<8x8x1xf32, #tpu.memory_space<vmem>>, vector<1x8x1xf32>
    %303 = vector.shape_cast %302 : vector<1x8x1xf32> to vector<8x1xf32>
    %304 = arith.mulf %298, %303 : vector<8x1xf32>
    %cst_282 = arith.constant dense<0.000000e+00> : vector<8xf32>
    %305 = vector.multi_reduction <add>, %301, %cst_282 [1] : vector<8x8xf32> to vector<8xf32>
    %306 = vector.shape_cast %305 : vector<8xf32> to vector<8x1xf32>
    %307 = arith.addf %304, %306 : vector<8x1xf32>
    %c7_283 = arith.constant 7 : index
    %c0_284 = arith.constant 0 : index
    %c0_285 = arith.constant 0 : index
    %308 = vector.load %arg8[%c7_283, %c0_284, %c0_285] : memref<8x8x1xf32, #tpu.memory_space<vmem>>, vector<1x8x1xf32>
    %309 = vector.shape_cast %308 : vector<1x8x1xf32> to vector<8x1xf32>
    %310 = vector.shape_cast %307 : vector<8x1xf32> to vector<1x8x1xf32>
    tpu.vector_store %arg8[%c7_283, %c0_284, %c0_285], %310 {strides = array<i32>} : memref<8x8x1xf32, #tpu.memory_space<vmem>>, vector<1x8x1xf32>,
    %c7_286 = arith.constant 7 : index
    %c0_287 = arith.constant 0 : index
    %c0_288 = arith.constant 0 : index
    %311 = vector.load %arg9[%c7_286, %c0_287, %c0_288] : memref<8x8x4xf32, #tpu.memory_space<vmem>>, vector<1x8x4xf32>
    %312 = vector.shape_cast %311 : vector<1x8x4xf32> to vector<8x4xf32>
    %313 = vector.broadcast %298 : vector<8x1xf32> to vector<8x4xf32>
    %314 = arith.mulf %313, %312 : vector<8x4xf32>
    %cst_289 = arith.constant dense<0.000000e+00> : vector<8x4xf32>
    %315 = tpu.matmul %301, %290, %cst_289 {dimension_numbers = #tpu.dot_dimension_numbers<[1], [0], [0], [1], [0, 0, 1, 1], [], []>} : vector<8x8xf32>, vector<8x4xf32>, vector<8x4xf32> -> vector<8x4xf32>
    %316 = arith.addf %314, %315 : vector<8x4xf32>
    %c7_290 = arith.constant 7 : index
    %c0_291 = arith.constant 0 : index
    %c0_292 = arith.constant 0 : index
    %317 = vector.load %arg9[%c7_290, %c0_291, %c0_292] : memref<8x8x4xf32, #tpu.memory_space<vmem>>, vector<1x8x4xf32>
    %318 = vector.shape_cast %317 : vector<1x8x4xf32> to vector<8x4xf32>
    %319 = vector.shape_cast %316 : vector<8x4xf32> to vector<1x8x4xf32>
    tpu.vector_store %arg9[%c7_290, %c0_291, %c0_292], %319 {strides = array<i32>} : memref<8x8x4xf32, #tpu.memory_space<vmem>>, vector<1x8x4xf32>,
    %c7_293 = arith.constant 7 : index
    %c0_294 = arith.constant 0 : index
    %c0_295 = arith.constant 0 : index
    %320 = vector.load %arg7[%c7_293, %c0_294, %c0_295] : memref<8x8x1xf32, #tpu.memory_space<vmem>>, vector<1x8x1xf32>
    %321 = vector.shape_cast %320 : vector<1x8x1xf32> to vector<8x1xf32>
    %322 = vector.shape_cast %296 : vector<8x1xf32> to vector<1x8x1xf32>
    tpu.vector_store %arg7[%c7_293, %c0_294, %c0_295], %322 {strides = array<i32>} : memref<8x8x1xf32, #tpu.memory_space<vmem>>, vector<1x8x1xf32>,
    %c0_i32_296 = arith.constant 0 : i32
    %323 = arith.cmpi eq, %arg2, %c0_i32_296 : i32
    %324 = arith.extui %323 : i1 to i32
    %c0_i32_297 = arith.constant 0 : i32
    %325 = arith.cmpi ne, %324, %c0_i32_297 : i32
    scf.if %325 {
      %c0_298 = arith.constant 0 : index
      %c0_299 = arith.constant 0 : index
      %c0_300 = arith.constant 0 : index
      %326 = vector.load %arg9[%c0_298, %c0_299, %c0_300] : memref<8x8x4xf32, #tpu.memory_space<vmem>>, vector<1x8x4xf32>
      %327 = vector.shape_cast %326 : vector<1x8x4xf32> to vector<8x4xf32>
      %c0_301 = arith.constant 0 : index
      %c0_302 = arith.constant 0 : index
      %c0_303 = arith.constant 0 : index
      %328 = vector.load %arg8[%c0_301, %c0_302, %c0_303] : memref<8x8x1xf32, #tpu.memory_space<vmem>>, vector<1x8x1xf32>
      %329 = vector.shape_cast %328 : vector<1x8x1xf32> to vector<8x1xf32>
      %330 = vector.broadcast %329 : vector<8x1xf32> to vector<8x4xf32>
      %331 = arith.divf %327, %330 : vector<8x4xf32>
      %c0_304 = arith.constant 0 : index
      %c0_305 = arith.constant 0 : index
      %c0_306 = arith.constant 0 : index
      %332 = vector.load %arg6[%c0_304, %c0_305, %c0_306] : memref<1x8x32xf32, #tpu.memory_space<vmem>>, vector<1x8x4xf32>
      %333 = vector.shape_cast %332 : vector<1x8x4xf32> to vector<8x4xf32>
      %334 = vector.shape_cast %331 : vector<8x4xf32> to vector<1x8x4xf32>
      tpu.vector_store %arg6[%c0_304, %c0_305, %c0_306], %334 {strides = array<i32>} : memref<1x8x32xf32, #tpu.memory_space<vmem>>, vector<1x8x4xf32>,
      %c1_307 = arith.constant 1 : index
      %c0_308 = arith.constant 0 : index
      %c0_309 = arith.constant 0 : index
      %335 = vector.load %arg9[%c1_307, %c0_308, %c0_309] : memref<8x8x4xf32, #tpu.memory_space<vmem>>, vector<1x8x4xf32>
      %336 = vector.shape_cast %335 : vector<1x8x4xf32> to vector<8x4xf32>
      %c1_310 = arith.constant 1 : index
      %c0_311 = arith.constant 0 : index
      %c0_312 = arith.constant 0 : index
      %337 = vector.load %arg8[%c1_310, %c0_311, %c0_312] : memref<8x8x1xf32, #tpu.memory_space<vmem>>, vector<1x8x1xf32>
      %338 = vector.shape_cast %337 : vector<1x8x1xf32> to vector<8x1xf32>
      %339 = vector.broadcast %338 : vector<8x1xf32> to vector<8x4xf32>
      %340 = arith.divf %336, %339 : vector<8x4xf32>
      %c0_313 = arith.constant 0 : index
      %c0_314 = arith.constant 0 : index
      %c4_315 = arith.constant 4 : index
      %341 = vector.load %arg6[%c0_313, %c0_314, %c4_315] : memref<1x8x32xf32, #tpu.memory_space<vmem>>, vector<1x8x4xf32>
      %342 = vector.shape_cast %341 : vector<1x8x4xf32> to vector<8x4xf32>
      %343 = vector.shape_cast %340 : vector<8x4xf32> to vector<1x8x4xf32>
      tpu.vector_store %arg6[%c0_313, %c0_314, %c4_315], %343 {strides = array<i32>} : memref<1x8x32xf32, #tpu.memory_space<vmem>>, vector<1x8x4xf32>,
      %c2_316 = arith.constant 2 : index
      %c0_317 = arith.constant 0 : index
      %c0_318 = arith.constant 0 : index
      %344 = vector.load %arg9[%c2_316, %c0_317, %c0_318] : memref<8x8x4xf32, #tpu.memory_space<vmem>>, vector<1x8x4xf32>
      %345 = vector.shape_cast %344 : vector<1x8x4xf32> to vector<8x4xf32>
      %c2_319 = arith.constant 2 : index
      %c0_320 = arith.constant 0 : index
      %c0_321 = arith.constant 0 : index
      %346 = vector.load %arg8[%c2_319, %c0_320, %c0_321] : memref<8x8x1xf32, #tpu.memory_space<vmem>>, vector<1x8x1xf32>
      %347 = vector.shape_cast %346 : vector<1x8x1xf32> to vector<8x1xf32>
      %348 = vector.broadcast %347 : vector<8x1xf32> to vector<8x4xf32>
      %349 = arith.divf %345, %348 : vector<8x4xf32>
      %c0_322 = arith.constant 0 : index
      %c0_323 = arith.constant 0 : index
      %c8 = arith.constant 8 : index
      %350 = vector.load %arg6[%c0_322, %c0_323, %c8] : memref<1x8x32xf32, #tpu.memory_space<vmem>>, vector<1x8x4xf32>
      %351 = vector.shape_cast %350 : vector<1x8x4xf32> to vector<8x4xf32>
      %352 = vector.shape_cast %349 : vector<8x4xf32> to vector<1x8x4xf32>
      tpu.vector_store %arg6[%c0_322, %c0_323, %c8], %352 {strides = array<i32>} : memref<1x8x32xf32, #tpu.memory_space<vmem>>, vector<1x8x4xf32>,
      %c3_324 = arith.constant 3 : index
      %c0_325 = arith.constant 0 : index
      %c0_326 = arith.constant 0 : index
      %353 = vector.load %arg9[%c3_324, %c0_325, %c0_326] : memref<8x8x4xf32, #tpu.memory_space<vmem>>, vector<1x8x4xf32>
      %354 = vector.shape_cast %353 : vector<1x8x4xf32> to vector<8x4xf32>
      %c3_327 = arith.constant 3 : index
      %c0_328 = arith.constant 0 : index
      %c0_329 = arith.constant 0 : index
      %355 = vector.load %arg8[%c3_327, %c0_328, %c0_329] : memref<8x8x1xf32, #tpu.memory_space<vmem>>, vector<1x8x1xf32>
      %356 = vector.shape_cast %355 : vector<1x8x1xf32> to vector<8x1xf32>
      %357 = vector.broadcast %356 : vector<8x1xf32> to vector<8x4xf32>
      %358 = arith.divf %354, %357 : vector<8x4xf32>
      %c0_330 = arith.constant 0 : index
      %c0_331 = arith.constant 0 : index
      %c12 = arith.constant 12 : index
      %359 = vector.load %arg6[%c0_330, %c0_331, %c12] : memref<1x8x32xf32, #tpu.memory_space<vmem>>, vector<1x8x4xf32>
      %360 = vector.shape_cast %359 : vector<1x8x4xf32> to vector<8x4xf32>
      %361 = vector.shape_cast %358 : vector<8x4xf32> to vector<1x8x4xf32>
      tpu.vector_store %arg6[%c0_330, %c0_331, %c12], %361 {strides = array<i32>} : memref<1x8x32xf32, #tpu.memory_space<vmem>>, vector<1x8x4xf32>,
      %c4_332 = arith.constant 4 : index
      %c0_333 = arith.constant 0 : index
      %c0_334 = arith.constant 0 : index
      %362 = vector.load %arg9[%c4_332, %c0_333, %c0_334] : memref<8x8x4xf32, #tpu.memory_space<vmem>>, vector<1x8x4xf32>
      %363 = vector.shape_cast %362 : vector<1x8x4xf32> to vector<8x4xf32>
      %c4_335 = arith.constant 4 : index
      %c0_336 = arith.constant 0 : index
      %c0_337 = arith.constant 0 : index
      %364 = vector.load %arg8[%c4_335, %c0_336, %c0_337] : memref<8x8x1xf32, #tpu.memory_space<vmem>>, vector<1x8x1xf32>
      %365 = vector.shape_cast %364 : vector<1x8x1xf32> to vector<8x1xf32>
      %366 = vector.broadcast %365 : vector<8x1xf32> to vector<8x4xf32>
      %367 = arith.divf %363, %366 : vector<8x4xf32>
      %c0_338 = arith.constant 0 : index
      %c0_339 = arith.constant 0 : index
      %c16 = arith.constant 16 : index
      %368 = vector.load %arg6[%c0_338, %c0_339, %c16] : memref<1x8x32xf32, #tpu.memory_space<vmem>>, vector<1x8x4xf32>
      %369 = vector.shape_cast %368 : vector<1x8x4xf32> to vector<8x4xf32>
      %370 = vector.shape_cast %367 : vector<8x4xf32> to vector<1x8x4xf32>
      tpu.vector_store %arg6[%c0_338, %c0_339, %c16], %370 {strides = array<i32>} : memref<1x8x32xf32, #tpu.memory_space<vmem>>, vector<1x8x4xf32>,
      %c5_340 = arith.constant 5 : index
      %c0_341 = arith.constant 0 : index
      %c0_342 = arith.constant 0 : index
      %371 = vector.load %arg9[%c5_340, %c0_341, %c0_342] : memref<8x8x4xf32, #tpu.memory_space<vmem>>, vector<1x8x4xf32>
      %372 = vector.shape_cast %371 : vector<1x8x4xf32> to vector<8x4xf32>
      %c5_343 = arith.constant 5 : index
      %c0_344 = arith.constant 0 : index
      %c0_345 = arith.constant 0 : index
      %373 = vector.load %arg8[%c5_343, %c0_344, %c0_345] : memref<8x8x1xf32, #tpu.memory_space<vmem>>, vector<1x8x1xf32>
      %374 = vector.shape_cast %373 : vector<1x8x1xf32> to vector<8x1xf32>
      %375 = vector.broadcast %374 : vector<8x1xf32> to vector<8x4xf32>
      %376 = arith.divf %372, %375 : vector<8x4xf32>
      %c0_346 = arith.constant 0 : index
      %c0_347 = arith.constant 0 : index
      %c20 = arith.constant 20 : index
      %377 = vector.load %arg6[%c0_346, %c0_347, %c20] : memref<1x8x32xf32, #tpu.memory_space<vmem>>, vector<1x8x4xf32>
      %378 = vector.shape_cast %377 : vector<1x8x4xf32> to vector<8x4xf32>
      %379 = vector.shape_cast %376 : vector<8x4xf32> to vector<1x8x4xf32>
      tpu.vector_store %arg6[%c0_346, %c0_347, %c20], %379 {strides = array<i32>} : memref<1x8x32xf32, #tpu.memory_space<vmem>>, vector<1x8x4xf32>,
      %c6_348 = arith.constant 6 : index
      %c0_349 = arith.constant 0 : index
      %c0_350 = arith.constant 0 : index
      %380 = vector.load %arg9[%c6_348, %c0_349, %c0_350] : memref<8x8x4xf32, #tpu.memory_space<vmem>>, vector<1x8x4xf32>
      %381 = vector.shape_cast %380 : vector<1x8x4xf32> to vector<8x4xf32>
      %c6_351 = arith.constant 6 : index
      %c0_352 = arith.constant 0 : index
      %c0_353 = arith.constant 0 : index
      %382 = vector.load %arg8[%c6_351, %c0_352, %c0_353] : memref<8x8x1xf32, #tpu.memory_space<vmem>>, vector<1x8x1xf32>
      %383 = vector.shape_cast %382 : vector<1x8x1xf32> to vector<8x1xf32>
      %384 = vector.broadcast %383 : vector<8x1xf32> to vector<8x4xf32>
      %385 = arith.divf %381, %384 : vector<8x4xf32>
      %c0_354 = arith.constant 0 : index
      %c0_355 = arith.constant 0 : index
      %c24 = arith.constant 24 : index
      %386 = vector.load %arg6[%c0_354, %c0_355, %c24] : memref<1x8x32xf32, #tpu.memory_space<vmem>>, vector<1x8x4xf32>
      %387 = vector.shape_cast %386 : vector<1x8x4xf32> to vector<8x4xf32>
      %388 = vector.shape_cast %385 : vector<8x4xf32> to vector<1x8x4xf32>
      tpu.vector_store %arg6[%c0_354, %c0_355, %c24], %388 {strides = array<i32>} : memref<1x8x32xf32, #tpu.memory_space<vmem>>, vector<1x8x4xf32>,
      %c7_356 = arith.constant 7 : index
      %c0_357 = arith.constant 0 : index
      %c0_358 = arith.constant 0 : index
      %389 = vector.load %arg9[%c7_356, %c0_357, %c0_358] : memref<8x8x4xf32, #tpu.memory_space<vmem>>, vector<1x8x4xf32>
      %390 = vector.shape_cast %389 : vector<1x8x4xf32> to vector<8x4xf32>
      %c7_359 = arith.constant 7 : index
      %c0_360 = arith.constant 0 : index
      %c0_361 = arith.constant 0 : index
      %391 = vector.load %arg8[%c7_359, %c0_360, %c0_361] : memref<8x8x1xf32, #tpu.memory_space<vmem>>, vector<1x8x1xf32>
      %392 = vector.shape_cast %391 : vector<1x8x1xf32> to vector<8x1xf32>
      %393 = vector.broadcast %392 : vector<8x1xf32> to vector<8x4xf32>
      %394 = arith.divf %390, %393 : vector<8x4xf32>
      %c0_362 = arith.constant 0 : index
      %c0_363 = arith.constant 0 : index
      %c28 = arith.constant 28 : index
      %395 = vector.load %arg6[%c0_362, %c0_363, %c28] : memref<1x8x32xf32, #tpu.memory_space<vmem>>, vector<1x8x4xf32>
      %396 = vector.shape_cast %395 : vector<1x8x4xf32> to vector<8x4xf32>
      %397 = vector.shape_cast %394 : vector<8x4xf32> to vector<1x8x4xf32>
      tpu.vector_store %arg6[%c0_362, %c0_363, %c28], %397 {strides = array<i32>} : memref<1x8x32xf32, #tpu.memory_space<vmem>>, vector<1x8x4xf32>,
    } else {
    }
    return
  }
  func.func @transform_0(%arg0: i32, %arg1: i32, %arg2: i32) -> (i32, i32, i32, i32, i32) {
    %c0_i32 = arith.constant 0 : i32
    %c0_i32_0 = arith.constant 0 : i32
    %c0_i32_1 = arith.constant 0 : i32
    %c0_i32_2 = arith.constant 0 : i32
    return %arg0, %arg1, %c0_i32, %c0_i32_0, %c0_i32_1 : i32, i32, i32, i32, i32
  }
  func.func @transform_1(%arg0: i32, %arg1: i32, %arg2: i32) -> (i32, i32, i32, i32, i32) {
    %c1_i32 = arith.constant 1 : i32
    %c0_i32 = arith.constant 0 : i32
    %c0_i32_0 = arith.constant 0 : i32
    %c0_i32_1 = arith.constant 0 : i32
    return %arg0, %arg2, %c1_i32, %c0_i32, %c0_i32_0 : i32, i32, i32, i32, i32
  }
  func.func @transform_2(%arg0: i32, %arg1: i32, %arg2: i32) -> (i32, i32, i32, i32, i32) {
    %c2_i32 = arith.constant 2 : i32
    %c0_i32 = arith.constant 0 : i32
    %c0_i32_0 = arith.constant 0 : i32
    %c0_i32_1 = arith.constant 0 : i32
    return %arg0, %arg2, %c2_i32, %c0_i32, %c0_i32_0 : i32, i32, i32, i32, i32
  }
  func.func @transform_3(%arg0: i32, %arg1: i32, %arg2: i32) -> (i32, i32, i32) {
    %c0_i32 = arith.constant 0 : i32
    %c0_i32_0 = arith.constant 0 : i32
    return %arg0, %arg1, %c0_i32 : i32, i32, i32
  }
}

</mosaic_0001>

<bundles_post_ra>
// kernel: attention_forward.5
= control target key start
LH: loop header
LB: loop body
LE: loop exit
PB: predicated region body
PF: predicated region fallthrough
CT: control target
= control target key end

     0   :  { %vm19_vm0 = vcmask 261120   ;;  %v194_v3 = vmov 0.0   ;;  %s250_s0 = inlined_call_operand.vmem [shape: f32[16,32], index: 0, kind: input, shape index: {}]   ;;  %s251_s1 = inlined_call_operand.vmem [shape: f32[32,32], index: 1, kind: input, shape index: {}]   ;;  %s252_s2 = inlined_call_operand.vmem [shape: f32[1,32], index: 2, kind: input, shape index: {}]   ;;  %s253_s3 = inlined_call_operand.hbm [shape: f32[16,32], index: 3, kind: output, shape index: {}]  }
   0x1   :  { %v29_v0 = vld [vmem:[%s251_s1 + $0x18] sm:$0xff]  ;;  %v28_v1 = vld [vmem:[%s251_s1 + $0x10] sm:$0xff]  ;;  %v24_v2 = vld [vmem:[%s250_s0] sm:$0xff]  ;;  %21 = vst.msk [vmem:[#allocation2 + $0x8] sm:$0xff] %vm19_vm0, %v194_v3 }
   0x2   :  { %157 = vmatprep.subr.mxu0 %v29_v0  ;;  %20 = vst.msk [vmem:[#allocation2] sm:$0xff] %vm19_vm0, %v194_v3  ;;  %v27_v4 = vld [vmem:[%s251_s1 + $0x8] sm:$0xff]  ;;  %165 = vmatprep.mubr.msk.f32.mxu0 %vm19_vm0, %v24_v2 }
   0x3   :  { %158 = vmatpush3.msra.mxu0 %v29_v0 }
   0x4   :  { %8 = vsyncpa [#allocation4], 0  ;;  %159 = vmatprep.subr.mxu0 %v28_v1  ;;  %v26_v5 = vld [vmem:[%s251_s1] sm:$0xff]  ;;  %v25_v6 = vld [vmem:[%s250_s0 + $0x8] sm:$0xff]  ;;  %s195_s25 = smov [#allocation3]  }
   0x5   :  { %160 = vmatpush3.msra.mxu0 %v28_v1  ;;  %v150_v13 = vld [vmem:[%s252_s2] ss:$0 sm:$0xff]  ;;  %s137_s0 = sshll.u32 %s195_s25, 4  ;;  %s138_s0 = int_to_ptr.vmem [resolvable:$true] %s137_s0 }
   0x6   :  { %161 = vmatprep.subr.mxu0 %v27_v4  ;;  %s172_s26 = scalar_lea.vmem %s138_s0, 256  ;;  %p177_p1 = scmp.lt.s32.totalorder %s138_s0, %s138_s0 }
   0x7   :  { %162 = vmatpush3.msra.mxu0 %v27_v4  ;;  %p173_p0 = scmp.ne.s32.totalorder %s138_s0, %s172_s26  ;;  %p178_p2 = scmp.lt.s32.totalorder %s172_s26, %s172_s26 }
   0x8   :  { %163 = vmatprep.subr.mxu0 %v26_v5  ;;  %v23_v7 = vld [vmem:[#allocation2 + $0x8] sm:$0xff] }
   0x9   :  { %164 = vmatpush3.msra.mxu0 %v26_v5  ;;  %v22_v9 = vld [vmem:[#allocation2] sm:$0xff]  ;;  %p179_p3 = por %p178_p2, %p177_p1 }
   0xa   :  { %166 = vmatmul.mubr.msk.f32.vlgmr.msra.gmra.mxu0 %vm19_vm0, %v25_v6 }
   0xb   :  { %p180_p4 = pnand %p179_p3, %p173_p0 }
  0xca   :  { %v167_v8 = vpop.f32.mrf.mxu0 }
  0xcb   :  { %v113_v10 = vadd.f32 %v167_v8, %v23_v7 }
  0xcc   :  { %v103_v11 = vpop.f32.mrf.mxu0 }
  0xcd   :  { %115 = vst.msk [vmem:[#allocation2 + $0x8] sm:$0xff] %vm19_vm0, %v113_v10  ;;  %v112_v12 = vadd.f32 %v103_v11, %v22_v9 }
  0xcf   :  { %114 = vst.msk [vmem:[#allocation2] sm:$0xff] %vm19_vm0, %v112_v12 }
  0xd4   :  { %v120_v14 = vld [vmem:[#allocation2 + $0x8] sm:$0xff] }
  0xd5   :  { %v129_v15 = vadd.f32 %v150_v13, %v120_v14 }
  0xd6   :  { %v119_v16 = vld [vmem:[#allocation2] sm:$0xff] }
  0xd7   :  { %v128_v17 = vadd.f32 %v150_v13, %v119_v16  ;;  %131 = vst.msk [vmem:[#allocation3 + $0x8] sm:$0xff] %vm19_vm0, %v129_v15 }
  0xd9   :  { %130 = vst.msk [vmem:[#allocation3] sm:$0xff] %vm19_vm0, %v128_v17 }
  0xda   :  { %183 = shalt.err (!%p180_p4)
}
  0xdb   :  { %s196_s27 = smov 128   ;;  %s197_s2 = smov 8  }
  0xdc   :  { %143 = dma.vmem_to_hbm [thread:$0]  %s138_s0, 256, %s253_s3, [#allocation4], %s196_s27, %s196_s27, %s197_s2  }
  0xdd   :  { %192 = dma.done.wait [#allocation4], 256  }
  0xde   :  { %193 = vsyncadd [#allocation4], 4294967040 }
  0xdf   :  { %147 = vsyncpa [#allocation4], 1 }

// kernel: attention_forward.3
= control target key start
LH: loop header
LB: loop body
LE: loop exit
PB: predicated region body
PF: predicated region fallthrough
CT: control target
= control target key end

     0   :  { %7 = vsyncpa [#allocation4], 0  ;;  %s262_s0 = inlined_call_operand.hbm [shape: f32[16,32], index: 0, kind: input, shape index: {}]   ;;  %s263_s1 = inlined_call_operand.hbm [shape: f32[32,96], index: 1, kind: input, shape index: {}]   ;;  %s264_s2 = inlined_call_operand.vmem [shape: f32[16,96], index: 2, kind: output, shape index: {}]  }
   0x1   :  { %8 = vsyncpa [#allocation6], 0  ;;  %s222_s9 = smov [#allocation3]  }
   0x2   :  { %s14_s10 = sshll.u32 %s222_s9, 4  ;;  %s15_s10 = int_to_ptr.vmem [resolvable:$true] %s14_s10 }
   0x3   :  { %s186_s11 = scalar_lea.vmem %s15_s10, 256  ;;  %p191_p1 = scmp.lt.s32.totalorder %s15_s10, %s15_s10 }
   0x4   :  { %p187_p0 = scmp.ne.s32.totalorder %s15_s10, %s186_s11  ;;  %p192_p2 = scmp.lt.s32.totalorder %s186_s11, %s186_s11 }
   0x6   :  { %p193_p3 = por %p192_p2, %p191_p1 }
   0x8   :  { %p194_p4 = pnand %p193_p3, %p187_p0 }
   0xa   :  { %197 = shalt.err (!%p194_p4)
}
   0xb   :  { %s223_s12 = smov 128   ;;  %s224_s13 = smov 8  }
   0xc   :  { %20 = dma.hbm_to_vmem [thread:$0]  %s262_s0, 256, %s15_s10, [#allocation4], %s223_s12, %s223_s12, %s224_s13  }
   0xd   :  { %s225_s16 = smov [#allocation5]  }
   0xe   :  { %s26_s17 = sshll.u32 %s225_s16, 4  ;;  %s27_s17 = int_to_ptr.vmem [resolvable:$true] %s26_s17 }
   0xf   :  { %s206_s18 = scalar_lea.vmem %s27_s17, 512  ;;  %p211_p6 = scmp.lt.s32.totalorder %s27_s17, %s27_s17 }
  0x10   :  { %p207_p5 = scmp.ne.s32.totalorder %s27_s17, %s206_s18  ;;  %p212_p7 = scmp.lt.s32.totalorder %s206_s18, %s206_s18 }
  0x12   :  { %p213_p8 = por %p212_p7, %p211_p6 }
  0x14   :  { %p214_p9 = pnand %p213_p8, %p207_p5 }
  0x16   :  { %217 = shalt.err (!%p214_p9)
}
  0x17   :  { %32 = dma.hbm_to_vmem [thread:$0]  %s263_s1, 512, %s27_s17, [#allocation6], %s223_s12, %s223_s12, %s224_s13  }
  0x18   :  { %218 = dma.done.wait [#allocation4], 256  }
  0x19   :  { %219 = vsyncadd [#allocation4], 4294967040 }
  0x1a   :  { %220 = dma.done.wait [#allocation6], 512  }
  0x1b   :  { %221 = vsyncadd [#allocation6], 4294966784  ;;  %vm43_vm0 = vcmask 785408   ;;  %v226_v0 = vmov 0.0   ;;  %vm54_vm1 = vcmask 261120   ;;  %v53_v1 = vld [vmem:[#allocation5 + $0x18] sm:$0xff] }
  0x1c   :  { %45 = vst.msk [vmem:[#allocation2 + $0x8] sm:$0xff] %vm43_vm0, %v226_v0  ;;  %44 = vst.msk [vmem:[#allocation2] sm:$0xff] %vm43_vm0, %v226_v0  ;;  %v52_v2 = vld [vmem:[#allocation5 + $0x10] sm:$0xff]  ;;  %162 = vmatprep.subr.mxu0 %v53_v1  ;;  %v51_v4 = vld [vmem:[#allocation5 + $0x8] sm:$0xff] }
  0x1d   :  { %v48_v3 = vld [vmem:[#allocation3] sm:$0xff]  ;;  %163 = vmatpush3.msra.mxu0 %v53_v1  ;;  %v50_v5 = vld [vmem:[#allocation5] sm:$0xff]  ;;  %v49_v6 = vld [vmem:[#allocation3 + $0x8] sm:$0xff] }
  0x1e   :  { %170 = vmatprep.mubr.msk.f32.mxu0 %vm54_vm1, %v48_v3  ;;  %164 = vmatprep.subr.mxu0 %v52_v2 }
  0x1f   :  { %165 = vmatpush3.msra.mxu0 %v52_v2 }
  0x20   :  { %166 = vmatprep.subr.mxu0 %v51_v4 }
  0x21   :  { %167 = vmatpush3.msra.mxu0 %v51_v4 }
  0x22   :  { %168 = vmatprep.subr.mxu0 %v50_v5 }
  0x23   :  { %169 = vmatpush3.msra.mxu0 %v50_v5  ;;  %v47_v7 = vld [vmem:[#allocation2 + $0x8] sm:$0xff]  ;;  %v46_v9 = vld [vmem:[#allocation2] sm:$0xff] }
  0x24   :  { %171 = vmatmul.mubr.msk.f32.vlgmr.msra.gmra.mxu0 %vm54_vm1, %v49_v6 }
  0xe4   :  { %v172_v8 = vpop.f32.mrf.mxu0 }
  0xe5   :  { %v137_v10 = vadd.f32 %v172_v8, %v47_v7 }
  0xe6   :  { %v127_v11 = vpop.f32.mrf.mxu0 }
  0xe7   :  { %140 = vst.msk [vmem:[#allocation2 + $0x8] sm:$0xff] %vm43_vm0, %v137_v10  ;;  %v136_v12 = vadd.f32 %v127_v11, %v46_v9 }
  0xe9   :  { %139 = vst.msk [vmem:[#allocation2] sm:$0xff] %vm43_vm0, %v136_v12 }
  0xee   :  { %v145_v13 = vld [vmem:[#allocation2 + $0x8] sm:$0xff] }
  0xef   :  { %147 = vst.msk [vmem:[%s264_s2 + $0x8] sm:$0xff] %vm43_vm0, %v145_v13 }
  0xf0   :  { %v144_v14 = vld [vmem:[#allocation2] sm:$0xff] }
  0xf1   :  { %146 = vst.msk [vmem:[%s264_s2] sm:$0xff] %vm43_vm0, %v144_v14 }
  0xf2   :  { %152 = vsyncpa [#allocation4], 1 }
  0xf3   :  { %153 = vsyncpa [#allocation6], 1 }

// kernel: attention_forward.4
= control target key start
LH: loop header
LB: loop body
LE: loop exit
PB: predicated region body
PF: predicated region fallthrough
CT: control target
= control target key end

     0   :  { %s3328_s12 = smov 0   ;;  %s3330_s13 = smov 0   ;;  %s4210_s0 = inlined_call_operand.vmem [shape: f32[2,8,3,8,4], index: 0, kind: input, shape index: {}, may-alias: {0,1,2}]   ;;  %s4211_s1 = inlined_call_operand.vmem [shape: f32[2,8,3,8,4], index: 1, kind: input, shape index: {}, may-alias: {0,1,2}]   ;;  %s4212_s2 = inlined_call_operand.vmem [shape: f32[2,8,3,8,4], index: 2, kind: input, shape index: {}, may-alias: {0,1,2}]   ;;  %s4213_s3 = inlined_call_operand.vmem [shape: f32[2,8,32], index: 3, kind: output, shape index: {}]  }
   0x1   :  { %s3332_s14 = smov 0   ;;  %s3334_s15 = smov 0  }
   0x2   :  { %s3336_s16 = smov 0  }
   0x3 LB: > { %s32_s17 = sadd.s32 1, %s3291_s15  ;;  %p48_p1 = scmp.ne.s32.totalorder %s3283_s13, %s3279_s12  ;;  %s3295_s16 = sphi %s3336_s16, %s13_s16   ;;  %s3291_s15 = sphi %s3334_s15, %s4218_s15   ;;  %s3287_s14 = sphi %s3332_s14, %s4217_s14   ;;  %s3283_s13 = sphi %s3330_s13, %s4216_s13   ;;  %s3279_s12 = sphi %s3328_s12, %s4215_s12  }
   0x4   : > { %p34_p0 = scmp.ge.s32.totalorder %s32_s17, 2  ;;  %p49_p2 = scmp.eq.s32.totalorder %s3295_s16, 0 }
   0x5   : > { %s41_s20 = sadd.s32 1, %s3283_s13  ;;  %p2989_p5 = scmp.ge.s32.totalorder %s3295_s16, 2 }
   0x6   : > { %s4220_s17 = smov (%p34_p0, %s32_s17), 0  ;;  %p3359_p3 = por %p49_p2, %p48_p1 }
   0x7   : > { %s36_s19 = ssub.s32 %s3291_s15, %s4220_s17  ;;  %158 = sbr.rel (%p2989_p5) target bundleno = 39 (0x27), region = 16 }
   0x8   : > { %p39_p4 = scmp.eq.s32.totalorder %s36_s19, 0 }
   0xa   : > { %s3367_s21 = scalar_select %p39_p4, %s3283_s13, %s41_s20  }
   0xc   : > { %161 = sbr.rel (!%p3359_p3) target bundleno = 21 (0x15), region = 20  ;;  %s163_s22 = sand.u32 (%p3359_p3), 1, %s3283_s13  }
   0xd   : > { %s3155_s23 = smul.u32 (%p3359_p3), 192, %s3291_s15  ;;  %s2990_s24 = sshll.u32 (%p3359_p3), %s163_s22, 6 }
   0xe   : > { %s165_s28 = scalar_lea.vmem (%p3359_p3), [#allocation5], %s2990_s24 }
   0xf   : > { %s171_s27 = scalar_lea.vmem (%p3359_p3), %s4210_s0, %s3155_s23 }
  0x10   : > { %v214_v0 = vld [vmem:[%s171_s27] sm:$0xff] (%p3359_p3)  ;;  %v216_v1 = vld [vmem:[%s171_s27 + $0x18] sm:$0xff] (%p3359_p3)  ;;  %v218_v2 = vld [vmem:[%s171_s27 + $0x30] sm:$0xff] (%p3359_p3) }
  0x11   : > { %215 = vst [vmem:[%s165_s28] sm:$0xff] %v214_v0  ;;  %217 = vst [vmem:[%s165_s28 + $0x8] sm:$0xff] %v216_v1  ;;  %v220_v3 = vld [vmem:[%s171_s27 + $0x48] sm:$0xff]  ;;  %v222_v4 = vld [vmem:[%s171_s27 + $0x60] sm:$0xff] }
  0x12   : > { %219 = vst [vmem:[%s165_s28 + $0x10] sm:$0xff] %v218_v2  ;;  %v224_v5 = vld [vmem:[%s171_s27 + $0x78] sm:$0xff]  ;;  %221 = vst [vmem:[%s165_s28 + $0x18] sm:$0xff] %v220_v3  ;;  %v226_v6 = vld [vmem:[%s171_s27 + $0x90] sm:$0xff] }
  0x13   : > { %223 = vst [vmem:[%s165_s28 + $0x20] sm:$0xff] %v222_v4  ;;  %225 = vst [vmem:[%s165_s28 + $0x28] sm:$0xff] %v224_v5  ;;  %v228_v7 = vld [vmem:[%s171_s27 + $0xa8] sm:$0xff] }
  0x14   : > { %227 = vst [vmem:[%s165_s28 + $0x30] sm:$0xff] %v226_v6  ;;  %229 = vst [vmem:[%s165_s28 + $0x38] sm:$0xff] %v228_v7 }
  0x15 PF: > { %235 = sbr.rel (!%p3359_p3) target bundleno = 30 (0x1e), region = 58  ;;  %s237_s29 = sand.u32 (%p3359_p3), 1, %s3283_s13  }
  0x16   : > { %s2993_s30 = smul.u32 (%p3359_p3), 192, %s3291_s15  ;;  %s2992_s4 = sshll.u32 (%p3359_p3), %s237_s29, 6 }
  0x17   : > { %s239_s8 = scalar_lea.vmem (%p3359_p3), [#allocation6], %s2992_s4 }
  0x18   : > { %s2897_s7 = scalar_lea.vmem (%p3359_p3), %s4211_s1, %s2993_s30 }
  0x19   : > { %v2994_v8 = vld [vmem:[%s2897_s7 + $0x8] sm:$0xff] (%p3359_p3)  ;;  %v2995_v9 = vld [vmem:[%s2897_s7 + $0x20] sm:$0xff] (%p3359_p3)  ;;  %v2996_v10 = vld [vmem:[%s2897_s7 + $0x38] sm:$0xff] (%p3359_p3) }
  0x1a   : > { %290 = vst [vmem:[%s239_s8] sm:$0xff] %v2994_v8  ;;  %292 = vst [vmem:[%s239_s8 + $0x8] sm:$0xff] %v2995_v9  ;;  %v2997_v11 = vld [vmem:[%s2897_s7 + $0x50] sm:$0xff]  ;;  %v2998_v12 = vld [vmem:[%s2897_s7 + $0x68] sm:$0xff] }
  0x1b   : > { %294 = vst [vmem:[%s239_s8 + $0x10] sm:$0xff] %v2996_v10  ;;  %v2999_v13 = vld [vmem:[%s2897_s7 + $0x80] sm:$0xff]  ;;  %296 = vst [vmem:[%s239_s8 + $0x18] sm:$0xff] %v2997_v11  ;;  %v3000_v14 = vld [vmem:[%s2897_s7 + $0x98] sm:$0xff] }
  0x1c   : > { %298 = vst [vmem:[%s239_s8 + $0x20] sm:$0xff] %v2998_v12  ;;  %300 = vst [vmem:[%s239_s8 + $0x28] sm:$0xff] %v2999_v13  ;;  %v3001_v15 = vld [vmem:[%s2897_s7 + $0xb0] sm:$0xff] }
  0x1d   : > { %302 = vst [vmem:[%s239_s8 + $0x30] sm:$0xff] %v3000_v14  ;;  %304 = vst [vmem:[%s239_s8 + $0x38] sm:$0xff] %v3001_v15 }
  0x1e PF: > { %310 = sbr.rel (!%p3359_p3) target bundleno = 39 (0x27), region = 96  ;;  %s312_s9 = sand.u32 (%p3359_p3), 1, %s3283_s13  }
  0x1f   : > { %s3003_s10 = smul.u32 (%p3359_p3), 192, %s3291_s15  ;;  %s3002_s11 = sshll.u32 (%p3359_p3), %s312_s9, 6 }
  0x20   : > { %s314_s23 = scalar_lea.vmem (%p3359_p3), [#allocation7], %s3002_s11 }
  0x21   : > { %s2905_s22 = scalar_lea.vmem (%p3359_p3), %s4212_s2, %s3003_s10 }
  0x22   : > { %v3004_v16 = vld [vmem:[%s2905_s22 + $0x10] sm:$0xff] (%p3359_p3)  ;;  %v3005_v17 = vld [vmem:[%s2905_s22 + $0x28] sm:$0xff] (%p3359_p3)  ;;  %v3006_v18 = vld [vmem:[%s2905_s22 + $0x40] sm:$0xff] (%p3359_p3) }
  0x23   : > { %365 = vst [vmem:[%s314_s23] sm:$0xff] %v3004_v16  ;;  %367 = vst [vmem:[%s314_s23 + $0x8] sm:$0xff] %v3005_v17  ;;  %v3007_v19 = vld [vmem:[%s2905_s22 + $0x58] sm:$0xff]  ;;  %v3008_v20 = vld [vmem:[%s2905_s22 + $0x70] sm:$0xff] }
  0x24   : > { %369 = vst [vmem:[%s314_s23 + $0x10] sm:$0xff] %v3006_v18  ;;  %v3009_v21 = vld [vmem:[%s2905_s22 + $0x88] sm:$0xff]  ;;  %371 = vst [vmem:[%s314_s23 + $0x18] sm:$0xff] %v3007_v19  ;;  %v3010_v22 = vld [vmem:[%s2905_s22 + $0xa0] sm:$0xff] }
  0x25   : > { %373 = vst [vmem:[%s314_s23 + $0x20] sm:$0xff] %v3008_v20  ;;  %375 = vst [vmem:[%s314_s23 + $0x28] sm:$0xff] %v3009_v21  ;;  %v3011_v23 = vld [vmem:[%s2905_s22 + $0xb8] sm:$0xff] }
  0x26   : > { %377 = vst [vmem:[%s314_s23 + $0x30] sm:$0xff] %v3010_v22  ;;  %379 = vst [vmem:[%s314_s23 + $0x38] sm:$0xff] %v3011_v23 }
  0x27 PF: > { %p3012_p6 = scmp.ge.s32.totalorder %s3295_s16, 1  ;;  %p384_p7 = scmp.lt.s32.totalorder %s3295_s16, 3 }
  0x29   : > { %p385_p8 = pnand %p3012_p6, %p384_p7 }
  0x2a   : > { %s391_s18 = sand.u32 (!%p385_p8), 1, %s3279_s12   ;;  %p441_p9 = scmp.lt.s32.totalorder (!%p385_p8), %s3287_s14, 1 }
  0x2b   : > { %388 = sbr.rel (%p385_p8) target bundleno = 1455 (0x5af), region = 134  ;;  %s3395_s24 = sshll.u32 (!%p385_p8), %s391_s18, 6 }
  0x2c   : > { %s3415_s12 = scalar_lea.vmem (!%p385_p8), [#allocation6], %s3395_s24  ;;  %s3430_s25 = scalar_lea.vmem (!%p385_p8), [#allocation5], %s3395_s24 }
  0x2d   : > { %s3498_s26 = scalar_lea.vmem (!%p385_p8), [#allocation7], %s3395_s24  ;;  %s3302_s4 = smov (!%p385_p8), 8  }
  0x2e   : > { %s3303_s5 = smov (!%p385_p8), 12   ;;  %s3304_s6 = smov (!%p385_p8), 16  }
  0x2f   : > { %s3305_s7 = smov (!%p385_p8), 20   ;;  %s3306_s8 = smov (!%p385_p8), 24  }
  0x30   : > { %vm469_vm0 = vcmask 31744   ;;  %v3297_v24 = vmov 0.0   ;;  %vm519_vm1 = vcmask 1041409   ;;  %vm522_vm2 = vcmask 1042434   ;;  %v494_v25 = vld [vmem:[%s3415_s12] sm:$0x1] }
  0x31   : > { %3075 = vmatprep.subr.mxu0 %v3297_v24  ;;  %vm525_vm3 = vcmask 1043459   ;;  %vm528_vm4 = vcmask 1044484   ;;  %470 = vst.msk [vmem:[#allocation4] sm:$0xff] %vm469_vm0, %v3297_v24  ;;  %471 = vst.msk [vmem:[#allocation4 + $0x8] sm:$0xff] %vm469_vm0, %v3297_v24  ;;  %3080 = vmatprep.subr.mxu1 %v3297_v24  ;;  %vm531_vm5 = vcmask 1045509   ;;  %vm534_vm6 = vcmask 1046534  }
  0x32   : > { %472 = vst.msk [vmem:[#allocation4 + $0x10] sm:$0xff] %vm469_vm0, %v3297_v24  ;;  %473 = vst.msk [vmem:[#allocation4 + $0x18] sm:$0xff] %vm469_vm0, %v3297_v24  ;;  %vm537_vm7 = vcmask 1047559   ;;  %v495_v26 = vld [vmem:[%s3415_s12 + $0x8] sm:$0x1]  ;;  %vm3298_vm8 = vmmov 0  }
  0x33   : > { %474 = vst.msk [vmem:[#allocation4 + $0x20] sm:$0xff] %vm469_vm0, %v3297_v24  ;;  %475 = vst.msk [vmem:[#allocation4 + $0x28] sm:$0xff] %vm469_vm0, %v3297_v24  ;;  %v496_v27 = vld [vmem:[%s3415_s12 + $0x10] sm:$0x1]  ;;  %3077 = vmatprep.mubr.msk.f32.mxu0 %vm3298_vm8, %v3297_v24  ;;  %3082 = vmatprep.mubr.msk.f32.mxu1 %vm3298_vm8, %v3297_v24  ;;  %v497_v28 = vld [vmem:[%s3415_s12 + $0x18] sm:$0x1] }
  0x34   : > { %476 = vst.msk [vmem:[#allocation4 + $0x30] sm:$0xff] %vm469_vm0, %v3297_v24  ;;  %477 = vst.msk [vmem:[#allocation4 + $0x38] sm:$0xff] %vm469_vm0, %v3297_v24  ;;  %v498_v29 = vld [vmem:[%s3415_s12 + $0x20] sm:$0x1]  ;;  %v499_v30 = vld [vmem:[%s3415_s12 + $0x28] sm:$0x1] }
  0x35   : > { %v500_v31 = vld [vmem:[%s3415_s12 + $0x30] sm:$0x1]  ;;  %v501_v32 = vld [vmem:[%s3415_s12 + $0x38] sm:$0x1]  ;;  %v547_v33 = vrot.slane %v495_v26, 7  ;;  %v549_v34 = vrot.slane %v496_v27, 6 }
  0x36   : > { %v551_v35 = vrot.slane %v497_v28, 5  ;;  %v553_v36 = vrot.slane %v498_v29, 4  ;;  %v555_v37 = vrot.slane %v499_v30, 3  ;;  %v557_v38 = vrot.slane %v500_v31, 2  ;;  %v478_v39 = vld [vmem:[%s3430_s25] sm:$0x1] }
  0x37   : > { %v548_v40 = vsel %vm519_vm1, %v547_v33, %v494_v25  ;;  %v559_v41 = vrot.slane %v501_v32, 1  ;;  %v479_v42 = vld [vmem:[%s3430_s25 + $0x8] sm:$0x1]  ;;  %v480_v43 = vld [vmem:[%s3430_s25 + $0x10] sm:$0x1]  ;;  %v486_v44 = vmul.f32 0.5, %v478_v39 }
  0x38   : > { %v550_v45 = vsel %vm522_vm2, %v549_v34, %v548_v40  ;;  %v481_v46 = vld [vmem:[%s3430_s25 + $0x18] sm:$0x1]  ;;  %v482_v47 = vld [vmem:[%s3430_s25 + $0x20] sm:$0x1]  ;;  %v483_v48 = vld [vmem:[%s3430_s25 + $0x28] sm:$0x1] }
  0x39   : > { %v552_v49 = vsel %vm525_vm3, %v551_v35, %v550_v45  ;;  %v484_v50 = vld [vmem:[%s3430_s25 + $0x30] sm:$0x1]  ;;  %v485_v51 = vld [vmem:[%s3430_s25 + $0x38] sm:$0x1]  ;;  %v487_v52 = vmul.f32 0.5, %v479_v42  ;;  %v488_v53 = vmul.f32 0.5, %v480_v43 }
  0x3a   : > { %v554_v54 = vsel %vm528_vm4, %v553_v36, %v552_v49  ;;  %v489_v55 = vmul.f32 0.5, %v481_v46  ;;  %v490_v56 = vmul.f32 0.5, %v482_v47  ;;  %v491_v57 = vmul.f32 0.5, %v483_v48  ;;  %v503_v22 = vld [vmem:[%s3498_s26 + $0x8] sm:$0x1]  ;;  %s4222_s14 = smov (!%p441_p9, %s3287_s14), 1 }
  0x3b   : > { %v556_v58 = vsel %vm531_vm5, %v555_v37, %v554_v54  ;;  %v492_v59 = vmul.f32 0.5, %v484_v50  ;;  %v493_v60 = vmul.f32 0.5, %v485_v51  ;;  %v518_v61 = vrot.slane %v487_v52, 7  ;;  %v504_v23 = vld [vmem:[%s3498_s26 + $0x10] sm:$0x1]  ;;  %s3016_s27 = sshll.u32 %s4222_s14, 3 }
  0x3c   : > { %v558_v62 = vsel %vm534_vm6, %v557_v38, %v556_v58  ;;  %v521_v63 = vrot.slane %v488_v53, 6  ;;  %v524_v0 = vrot.slane %v489_v55, 5  ;;  %v527_v1 = vrot.slane %v490_v56, 4  ;;  %v505_v25 = vld [vmem:[%s3498_s26 + $0x18] sm:$0x1]  ;;  %s4174_s30 = scalar_lea.vmem %s4213_s3, %s3016_s27  ;;  %s3301_s14 = smov 4  }
  0x3d   : > { %v560_v2 = vsel %vm537_vm7, %v559_v41, %v558_v62  ;;  %v520_v3 = vsel %vm519_vm1, %v518_v61, %v486_v44  ;;  %v530_v4 = vrot.slane %v491_v57, 3  ;;  %v533_v6 = vrot.slane %v492_v59, 2  ;;  %v506_v26 = vld [vmem:[%s3498_s26 + $0x20] sm:$0x1]  ;;  %v507_v28 = vld [vmem:[%s3498_s26 + $0x28] sm:$0x1] }
  0x3e   : > { %3076 = vmatpush3.xpose.msk.msra.mxu0 %vm469_vm0, %v560_v2  ;;  %v523_v5 = vsel %vm522_vm2, %v521_v63, %v520_v3  ;;  %v536_v8 = vrot.slane %v493_v60, 1  ;;  %vm452_vm9 = vcmask 7168   ;;  %v3299_v13 = vmov -inf   ;;  %v502_v27 = vld [vmem:[%s3498_s26] sm:$0x1]  ;;  %s3307_s9 = smov 28  }
  0x3f   : > { %v526_v7 = vsel %vm525_vm3, %v524_v0, %v523_v5  ;;  %3090 = vmatprep.subr.mxu0 %v3297_v24  ;;  %453 = vst.msk [vmem:[#allocation2] sm:$0xff] %vm452_vm9, %v3299_v13  ;;  %454 = vst.msk [vmem:[#allocation2 + $0x8] sm:$0xff] %vm452_vm9, %v3299_v13  ;;  %vm637_vm10 = vcmask 64512   ;;  %v3300_v17 = vmov 0   ;;  %v508_v29 = vld [vmem:[%s3498_s26 + $0x30] sm:$0x1] }
  0x40   : > { %v529_v9 = vsel %vm528_vm4, %v527_v1, %v526_v7  ;;  %455 = vst.msk [vmem:[#allocation2 + $0x10] sm:$0xff] %vm452_vm9, %v3299_v13  ;;  %456 = vst.msk [vmem:[#allocation2 + $0x18] sm:$0xff] %vm452_vm9, %v3299_v13  ;;  %3207 = vset.pattern.permute.xlu0 %v3300_v17  ;;  %3208 = vset.pattern.permute.xlu1 %v3300_v17  ;;  %v676_v30 = vrot.slane %v503_v22, 7  ;;  %v678_v31 = vrot.slane %v504_v23, 6  ;;  %v680_v32 = vrot.slane %v505_v25, 5 }
  0x41   : > { %v532_v10 = vsel %vm531_vm5, %v530_v4, %v529_v9  ;;  %457 = vst.msk [vmem:[#allocation2 + $0x20] sm:$0xff] %vm452_vm9, %v3299_v13  ;;  %458 = vst.msk [vmem:[#allocation2 + $0x28] sm:$0xff] %vm452_vm9, %v3299_v13  ;;  %v509_v33 = vld [vmem:[%s3498_s26 + $0x38] sm:$0x1]  ;;  %v682_v34 = vrot.slane %v506_v26, 4  ;;  %v684_v36 = vrot.slane %v507_v28, 3 }
  0x42   : > { %v535_v11 = vsel %vm534_vm6, %v533_v6, %v532_v10  ;;  %459 = vst.msk [vmem:[#allocation2 + $0x30] sm:$0xff] %vm452_vm9, %v3299_v13  ;;  %460 = vst.msk [vmem:[#allocation2 + $0x38] sm:$0xff] %vm452_vm9, %v3299_v13  ;;  %v677_v35 = vsel %vm519_vm1, %v676_v30, %v502_v27  ;;  %v686_v38 = vrot.slane %v508_v29, 2  ;;  %v688_v40 = vrot.slane %v509_v33, 1  ;;  %v784_v45 = vld [vmem:[%s3415_s12 + $0x9] sm:$0x1] }
  0x43   : > { %v538_v12 = vsel %vm537_vm7, %v536_v8, %v535_v11  ;;  %461 = vst.msk [vmem:[#allocation3] sm:$0xff] %vm452_vm9, %v3297_v24  ;;  %462 = vst.msk [vmem:[#allocation3 + $0x8] sm:$0xff] %vm452_vm9, %v3297_v24  ;;  %v679_v37 = vsel %vm522_vm2, %v678_v31, %v677_v35  ;;  %v768_v46 = vld [vmem:[%s3430_s25 + $0x9] sm:$0x1]  ;;  %v785_v47 = vld [vmem:[%s3415_s12 + $0x11] sm:$0x1] }
  0x44   : > { %3078 = vmatmul.mubr.msk.f32.vlgmr.msra.gmra.mxu0 %vm469_vm0, %v538_v12  ;;  %463 = vst.msk [vmem:[#allocation3 + $0x10] sm:$0xff] %vm452_vm9, %v3297_v24  ;;  %464 = vst.msk [vmem:[#allocation3 + $0x18] sm:$0xff] %vm452_vm9, %v3297_v24  ;;  %v681_v39 = vsel %vm525_vm3, %v680_v32, %v679_v37  ;;  %v829_v48 = vrot.slane %v784_v45, 7  ;;  %v783_v49 = vld [vmem:[%s3415_s12 + $0x1] sm:$0x1]  ;;  %v776_v52 = vmul.f32 0.5, %v768_v46 }
  0x45   : > { %3092 = vmatprep.mubr.msk.f32.mxu0 %vm3298_vm8, %v3297_v24  ;;  %465 = vst.msk [vmem:[#allocation3 + $0x20] sm:$0xff] %vm452_vm9, %v3297_v24  ;;  %466 = vst.msk [vmem:[#allocation3 + $0x28] sm:$0xff] %vm452_vm9, %v3297_v24  ;;  %v683_v41 = vsel %vm528_vm4, %v682_v34, %v681_v39  ;;  %v786_v50 = vld [vmem:[%s3415_s12 + $0x19] sm:$0x1]  ;;  %v769_v51 = vld [vmem:[%s3430_s25 + $0x11] sm:$0x1] }
  0x46   : > { %467 = vst.msk [vmem:[#allocation3 + $0x30] sm:$0xff] %vm452_vm9, %v3297_v24  ;;  %468 = vst.msk [vmem:[#allocation3 + $0x38] sm:$0xff] %vm452_vm9, %v3297_v24  ;;  %v3487_v18 = vld [vmem:[#allocation2] sm:$0xff]  ;;  %v685_v42 = vsel %vm531_vm5, %v684_v36, %v683_v41  ;;  %v831_v53 = vrot.slane %v785_v47, 6  ;;  %v830_v56 = vsel %vm519_vm1, %v829_v48, %v783_v49  ;;  %v833_v57 = vrot.slane %v786_v50, 5 }
  0x47   : > { %v687_v43 = vsel %vm534_vm6, %v686_v38, %v685_v42  ;;  %v767_v54 = vld [vmem:[%s3430_s25 + $0x1] sm:$0x1]  ;;  %v770_v58 = vld [vmem:[%s3430_s25 + $0x19] sm:$0x1]  ;;  %v777_v59 = vmul.f32 0.5, %v769_v51  ;;  %v807_v2 = vrot.slane %v776_v52, 7 }
  0x48   : > { %v689_v44 = vsel %vm537_vm7, %v688_v40, %v687_v43  ;;  %v787_v55 = vld [vmem:[%s3415_s12 + $0x21] sm:$0x1]  ;;  %v772_v61 = vld [vmem:[%s3430_s25 + $0x29] sm:$0x1]  ;;  %v773_v62 = vld [vmem:[%s3430_s25 + $0x31] sm:$0x1]  ;;  %v832_v4 = vsel %vm522_vm2, %v831_v53, %v830_v56 }
  0x49   : > { %3081 = vmatpush3.msra.mxu1 %v689_v44  ;;  %v771_v60 = vld [vmem:[%s3430_s25 + $0x21] sm:$0x1]  ;;  %v788_v63 = vld [vmem:[%s3415_s12 + $0x29] sm:$0x1]  ;;  %v3531_v0 = vld [vmem:[%s3415_s12 + $0x31] sm:$0x1]  ;;  %v834_v17 = vsel %vm525_vm3, %v833_v57, %v832_v4 }
  0x4a   : > { %3085 = vmatprep.subr.mxu1 %v3297_v24  ;;  %v775_v1 = vmul.f32 0.5, %v767_v54  ;;  %v3534_v3 = vld [vmem:[%s3415_s12 + $0x39] sm:$0x1]  ;;  %v1066_v5 = vld [vmem:[%s3415_s12 + $0xa] sm:$0x1]  ;;  %v778_v8 = vmul.f32 0.5, %v770_v58 }
  0x4b   : > { %v1050_v6 = vld [vmem:[%s3430_s25 + $0xa] sm:$0x1]  ;;  %v774_v7 = vld [vmem:[%s3430_s25 + $0x39] sm:$0x1]  ;;  %v779_v9 = vmul.f32 0.5, %v771_v60  ;;  %v3540_v10 = vmul.f32 0.5, %v772_v61 }
  0x4c   : > { %v3542_v11 = vmul.f32 0.5, %v773_v62  ;;  %v835_v12 = vrot.slane %v787_v55, 4  ;;  %v837_v13 = vrot.slane %v788_v63, 3  ;;  %v1067_v22 = vld [vmem:[%s3415_s12 + $0x12] sm:$0x1]  ;;  %v1111_v23 = vrot.slane %v1066_v5, 7 }
  0x4d   : > { %v1051_v25 = vld [vmem:[%s3430_s25 + $0x12] sm:$0x1]  ;;  %v1058_v26 = vmul.f32 0.5, %v1050_v6  ;;  %v841_v27 = vrot.slane %v3534_v3, 1  ;;  %v3550_v28 = vmul.f32 0.5, %v774_v7  ;;  %v811_v31 = vrot.slane %v778_v8, 5 }
  0x4e   : > { %v1065_v29 = vld [vmem:[%s3415_s12 + $0x2] sm:$0x1]  ;;  %v813_v32 = vrot.slane %v779_v9, 4  ;;  %v815_v33 = vrot.slane %v3540_v10, 3  ;;  %v817_v34 = vrot.slane %v3542_v11, 2  ;;  %v836_v36 = vsel %vm528_vm4, %v835_v12, %v834_v17 }
  0x4f   : > { %v1049_v30 = vld [vmem:[%s3430_s25 + $0x2] sm:$0x1]  ;;  %v1068_v35 = vld [vmem:[%s3415_s12 + $0x1a] sm:$0x1]  ;;  %v1113_v39 = vrot.slane %v1067_v22, 6  ;;  %v1059_v41 = vmul.f32 0.5, %v1051_v25  ;;  %v1112_v42 = vsel %vm519_vm1, %v1111_v23, %v1065_v29  ;;  %v838_v50 = vsel %vm531_vm5, %v837_v13, %v836_v36 }
  0x50   : > { %v1069_v38 = vld [vmem:[%s3415_s12 + $0x22] sm:$0x1]  ;;  %v1052_v40 = vld [vmem:[%s3430_s25 + $0x1a] sm:$0x1]  ;;  %v1054_v44 = vld [vmem:[%s3430_s25 + $0x2a] sm:$0x1] }
  0x51   : > { %v1053_v43 = vld [vmem:[%s3430_s25 + $0x22] sm:$0x1]  ;;  %v1057_v45 = vmul.f32 0.5, %v1049_v30  ;;  %v1089_v46 = vrot.slane %v1058_v26, 7  ;;  %v1070_v47 = vld [vmem:[%s3415_s12 + $0x2a] sm:$0x1]  ;;  %v1114_v56 = vsel %vm522_vm2, %v1113_v39, %v1112_v42 }
  0x52   : > { %v3566_v48 = vld [vmem:[%s3415_s12 + $0x32] sm:$0x1]  ;;  %v3572_v52 = vld [vmem:[%s3415_s12 + $0x3a] sm:$0x1]  ;;  %v1115_v53 = vrot.slane %v1068_v35, 5  ;;  %v1060_v54 = vmul.f32 0.5, %v1052_v40 }
  0x53   : > { %v1055_v49 = vld [vmem:[%s3430_s25 + $0x32] sm:$0x1]  ;;  %v1332_v55 = vld [vmem:[%s3430_s25 + $0xb] sm:$0x1]  ;;  %v1056_v57 = vld [vmem:[%s3430_s25 + $0x3a] sm:$0x1] }
  0x54   : > { %v1061_v58 = vmul.f32 0.5, %v1053_v43  ;;  %v1091_v60 = vrot.slane %v1059_v41, 6  ;;  %v819_v61 = vrot.slane %v3550_v28, 1  ;;  %v1117_v62 = vrot.slane %v1069_v38, 4  ;;  %v1333_v7 = vld [vmem:[%s3430_s25 + $0x13] sm:$0x1] }
  0x55   : > { %v3580_v63 = vmul.f32 0.5, %v1055_v49  ;;  %v1119_v4 = vrot.slane %v1070_v47, 3  ;;  %v1121_v5 = vrot.slane %v3566_v48, 2  ;;  %v1123_v6 = vrot.slane %v3572_v52, 1  ;;  %v1331_v17 = vld [vmem:[%s3430_s25 + $0x3] sm:$0x1] }
  0x56   : > { %v1340_v8 = vmul.f32 0.5, %v1332_v55  ;;  %v1116_v10 = vsel %vm525_vm3, %v1115_v53, %v1114_v56  ;;  %v3589_v12 = vmul.f32 0.5, %v1056_v57  ;;  %v1093_v13 = vrot.slane %v1060_v54, 5  ;;  %v1349_v25 = vld [vmem:[%s3415_s12 + $0x13] sm:$0x1] }
  0x57   : > { %v1095_v22 = vrot.slane %v1061_v58, 4  ;;  %v1099_v30 = vrot.slane %v3580_v63, 2  ;;  %v1614_v35 = vld [vmem:[%s3430_s25 + $0xc] sm:$0x1]  ;;  %v1350_v38 = vld [vmem:[%s3415_s12 + $0x1b] sm:$0x1] }
  0x58   : > { %v3606_v39 = vld [vmem:[%s3415_s12 + $0x23] sm:$0x1]  ;;  %v1371_v40 = vrot.slane %v1340_v8, 7  ;;  %v1101_v41 = vrot.slane %v3589_v12, 1  ;;  %v3611_v42 = vld [vmem:[%s3415_s12 + $0x2b] sm:$0x1] }
  0x59   : > { %v1395_v43 = vrot.slane %v1349_v25, 6  ;;  %v1336_v49 = vld [vmem:[%s3430_s25 + $0x2b] sm:$0x1]  ;;  %v1622_v53 = vmul.f32 0.5, %v1614_v35  ;;  %v1397_v54 = vrot.slane %v1350_v38, 5  ;;  %vm2767_vm11 = vcmask 64544  }
  0x5a   : > { %v1630_v56 = vld [vmem:[%s3415_s12 + $0xc] sm:$0x1]  ;;  %v1613_v57 = vld [vmem:[%s3430_s25 + $0x4] sm:$0x1]  ;;  %v1616_v8 = vld [vmem:[%s3430_s25 + $0x1c] sm:$0x1] }
  0x5b   : > { %v1624_v38 = vmul.f32 0.5, %v1616_v8  ;;  %v1900_v52 = vld [vmem:[%s3430_s25 + $0x2d] sm:$0x1]  ;;  %vm2782_vm12 = vcmask 97344   ;;  %vm2797_vm13 = vcmask 130144   ;;  %vm2812_vm14 = vcmask 162944  }
  0x5c   : > { %vm2827_vm15 = vcmask 195744  }
 0x104   : > { %v3483_v14 = vpop.f32.mrf.mxu0 }
 0x105   : > { %v638_v15 = vsel %vm637_vm10, %v3483_v14, -inf }
 0x106   : > { %639 = vmax.xlane.f32.xlu0 %v638_v15  ;;  %v3079_v16 = vpop.f32.mrf.mxu0  ;;  %v839_v15 = vrot.slane %v3531_v0, 2  ;;  %v1339_v0 = vmul.f32 0.5, %v1331_v17  ;;  %v1621_v17 = vmul.f32 0.5, %v1613_v57 }
 0x107   : > { %v809_v16 = vrot.slane %v777_v59, 6  ;;  %v3577_v59 = vmul.f32 0.5, %v1054_v44  ;;  %v1335_v44 = vld [vmem:[%s3430_s25 + $0x23] sm:$0x1] }
 0x108   : > { %v840_v29 = vsel %vm534_vm6, %v839_v15, %v838_v50  ;;  %v1372_v11 = vsel %vm519_vm1, %v1371_v40, %v1339_v0 }
 0x109   : > { %v1097_v23 = vrot.slane %v3577_v59, 3  ;;  %v1620_v59 = vld [vmem:[%s3430_s25 + $0x3c] sm:$0x1] }
 0x18f   : > { %v640_v19 = vpop.xlane.xlu0 %639 }
 0x190   : > { %v3490_v20 = vmax.f32 %v3487_v18, %v640_v19  ;;  %v808_v19 = vsel %vm519_vm1, %v807_v2, %v775_v1  ;;  %v1090_v1 = vsel %vm519_vm1, %v1089_v46, %v1057_v45  ;;  %v1348_v2 = vld [vmem:[%s3415_s12 + $0xb] sm:$0x1]  ;;  %v3620_v45 = vld [vmem:[%s3415_s12 + $0x33] sm:$0x1]  ;;  %v3623_v46 = vld [vmem:[%s3415_s12 + $0x3b] sm:$0x1] }
 0x191   : > { %v810_v37 = vsel %vm522_vm2, %v809_v16, %v808_v19  ;;  %v1347_v16 = vld [vmem:[%s3415_s12 + $0x3] sm:$0x1]  ;;  %v1092_v19 = vsel %vm522_vm2, %v1091_v60, %v1090_v1  ;;  %v1393_v26 = vrot.slane %v1348_v2, 7  ;;  %v1399_v60 = vrot.slane %v3606_v39, 4  ;;  %v1337_v1 = vld [vmem:[%s3430_s25 + $0x33] sm:$0x1] }
 0x192   : > { %v642_v21 = vsub.f32 %v3487_v18, %v3490_v20  ;;  %766 = vst.msk [vmem:[#allocation2] sm:$0xff] %vm452_vm9, %v3490_v20  ;;  %647 = vperm.xlu0 %3207, %v3490_v20   ;;  %v812_v51 = vsel %vm525_vm3, %v811_v31, %v810_v37  ;;  %v1334_v31 = vld [vmem:[%s3430_s25 + $0x1b] sm:$0x1]  ;;  %v1118_v37 = vsel %vm528_vm4, %v1117_v62, %v1116_v10  ;;  %v1401_v62 = vrot.slane %v3611_v42, 3  ;;  %v1912_v39 = vld [vmem:[%s3415_s12 + $0xd] sm:$0x1] }
 0x193   : > { %v814_v9 = vsel %vm528_vm4, %v813_v32, %v812_v51  ;;  %v1341_v32 = vmul.f32 0.5, %v1333_v7  ;;  %v1094_v15 = vsel %vm525_vm3, %v1093_v13, %v1092_v19  ;;  %v1394_v47 = vsel %vm519_vm1, %v1393_v26, %v1347_v16  ;;  %v1615_v51 = vld [vmem:[%s3430_s25 + $0x14] sm:$0x1]  ;;  %v1338_v2 = vld [vmem:[%s3430_s25 + $0x3b] sm:$0x1] }
 0x194   : > { %v816_v36 = vsel %vm531_vm5, %v815_v33, %v814_v9  ;;  %v3617_v33 = vsel %vm537_vm7, %v841_v27, %v840_v29  ;;  %v1342_v50 = vmul.f32 0.5, %v1334_v31  ;;  %v1120_v27 = vsel %vm531_vm5, %v1119_v4, %v1118_v37  ;;  %v1631_v13 = vld [vmem:[%s3415_s12 + $0x14] sm:$0x1]  ;;  %v1629_v31 = vld [vmem:[%s3415_s12 + $0x4] sm:$0x1] }
 0x195   : > { %v3631_v3 = vsel %vm534_vm6, %v817_v34, %v816_v36  ;;  %v1373_v55 = vrot.slane %v1341_v32, 6  ;;  %v1096_v58 = vsel %vm528_vm4, %v1095_v22, %v1094_v15  ;;  %v1396_v34 = vsel %vm522_vm2, %v1395_v43, %v1394_v47  ;;  %v1617_v37 = vld [vmem:[%s3430_s25 + $0x24] sm:$0x1]  ;;  %v1632_v15 = vld [vmem:[%s3415_s12 + $0x1c] sm:$0x1] }
 0x196   : > { %v1343_v7 = vmul.f32 0.5, %v1335_v44  ;;  %v3643_v4 = vmul.f32 0.5, %v1336_v49  ;;  %v1623_v9 = vmul.f32 0.5, %v1615_v51  ;;  %v1375_v10 = vrot.slane %v1342_v50, 5  ;;  %v1633_v49 = vld [vmem:[%s3415_s12 + $0x24] sm:$0x1] }
 0x197   : > { %v1675_v16 = vrot.slane %v1630_v56, 7  ;;  %v1653_v19 = vrot.slane %v1622_v53, 7  ;;  %v1403_v22 = vrot.slane %v3620_v45, 2  ;;  %v1405_v25 = vrot.slane %v3623_v46, 1  ;;  %v1618_v51 = vld [vmem:[%s3430_s25 + $0x2c] sm:$0x1] }
 0x198   : > { %v3649_v26 = vmul.f32 0.5, %v1337_v1  ;;  %v1374_v29 = vsel %vm522_vm2, %v1373_v55, %v1372_v11  ;;  %v3656_v32 = vsel %vm534_vm6, %v1121_v5, %v1120_v27  ;;  %v1398_v35 = vsel %vm525_vm3, %v1397_v54, %v1396_v34  ;;  %v1619_v53 = vld [vmem:[%s3430_s25 + $0x34] sm:$0x1]  ;;  %v1634_v56 = vld [vmem:[%s3415_s12 + $0x2c] sm:$0x1] }
 0x199   : > { %v3659_v36 = vmul.f32 0.5, %v1338_v2  ;;  %v1377_v0 = vrot.slane %v1343_v7, 4  ;;  %v1379_v40 = vrot.slane %v3643_v4, 3  ;;  %v1677_v48 = vrot.slane %v1631_v13, 6  ;;  %v1911_v7 = vld [vmem:[%s3415_s12 + $0x5] sm:$0x1] }
 0x19a   : > { %v1655_v43 = vrot.slane %v1623_v9, 6  ;;  %v1098_v44 = vsel %vm531_vm5, %v1097_v23, %v1096_v58  ;;  %v1376_v47 = vsel %vm525_vm3, %v1375_v10, %v1374_v29  ;;  %v1676_v50 = vsel %vm519_vm1, %v1675_v16, %v1629_v31  ;;  %v1913_v23 = vld [vmem:[%s3415_s12 + $0x15] sm:$0x1]  ;;  %v3684_v9 = vld [vmem:[%s3415_s12 + $0x34] sm:$0x1] }
 0x19b   : > { %v1654_v27 = vsel %vm519_vm1, %v1653_v19, %v1621_v17  ;;  %v1400_v55 = vsel %vm528_vm4, %v1399_v60, %v1398_v35  ;;  %v1625_v57 = vmul.f32 0.5, %v1617_v37  ;;  %v1957_v58 = vrot.slane %v1912_v39, 7  ;;  %v1914_v19 = vld [vmem:[%s3415_s12 + $0x1d] sm:$0x1]  ;;  %v2179_v46 = vld [vmem:[%s3430_s25 + $0x16] sm:$0x1] }
 0x19c   : > { %v1381_v1 = vrot.slane %v3649_v26, 2  ;;  %v1383_v2 = vrot.slane %v3659_v36, 1  ;;  %v1679_v11 = vrot.slane %v1632_v15, 5  ;;  %v1657_v34 = vrot.slane %v1624_v38, 5  ;;  %v1915_v15 = vld [vmem:[%s3415_s12 + $0x25] sm:$0x1] }
 0x19d   : > { %v1378_v8 = vsel %vm528_vm4, %v1377_v0, %v1376_v47  ;;  %v1678_v60 = vsel %vm522_vm2, %v1677_v48, %v1676_v50  ;;  %v1656_v10 = vsel %vm522_vm2, %v1655_v43, %v1654_v27  ;;  %v1626_v13 = vmul.f32 0.5, %v1618_v51  ;;  %v1896_v48 = vld [vmem:[%s3430_s25 + $0xd] sm:$0x1]  ;;  %v3709_v50 = vld [vmem:[%s3415_s12 + $0x35] sm:$0x1] }
 0x19e   : > { %v3691_v16 = vmul.f32 0.5, %v1619_v53  ;;  %v3693_v17 = vmul.f32 0.5, %v1620_v59  ;;  %v1959_v26 = vrot.slane %v1913_v23, 6  ;;  %v1681_v29 = vrot.slane %v1633_v49, 4  ;;  %v1916_v49 = vld [vmem:[%s3415_s12 + $0x2d] sm:$0x1] }
 0x19f   : > { %v1659_v31 = vrot.slane %v1625_v57, 4  ;;  %v1958_v35 = vsel %vm519_vm1, %v1957_v58, %v1911_v7  ;;  %v1680_v37 = vsel %vm525_vm3, %v1679_v11, %v1678_v60  ;;  %v1683_v38 = vrot.slane %v1634_v56, 3  ;;  %v1897_v59 = vld [vmem:[%s3430_s25 + $0x15] sm:$0x1]  ;;  %v1895_v7 = vld [vmem:[%s3430_s25 + $0x5] sm:$0x1] }
 0x1a0   : > { %v1685_v39 = vrot.slane %v3684_v9, 2  ;;  %v1658_v0 = vsel %vm525_vm3, %v1657_v34, %v1656_v10  ;;  %v1402_v43 = vsel %vm531_vm5, %v1401_v62, %v1400_v55  ;;  %v1961_v51 = vrot.slane %v1914_v19, 5  ;;  %v2178_v9 = vld [vmem:[%s3430_s25 + $0xe] sm:$0x1]  ;;  %v1901_v60 = vld [vmem:[%s3430_s25 + $0x35] sm:$0x1] }
 0x1a1   : > { %v1661_v53 = vrot.slane %v1626_v13, 3  ;;  %v1663_v27 = vrot.slane %v3691_v16, 2  ;;  %v1960_v56 = vsel %vm522_vm2, %v1959_v26, %v1958_v35  ;;  %v1682_v42 = vsel %vm528_vm4, %v1681_v29, %v1680_v37  ;;  %v1902_v10 = vld [vmem:[%s3430_s25 + $0x3d] sm:$0x1]  ;;  %v2193_v19 = vld [vmem:[%s3415_s12 + $0x6] sm:$0x1] }
 0x1a2   : > { %v1660_v62 = vsel %vm528_vm4, %v1659_v31, %v1658_v0  ;;  %v1963_v55 = vrot.slane %v1915_v15, 4  ;;  %v1904_v57 = vmul.f32 0.5, %v1896_v48  ;;  %v1100_v23 = vsel %vm534_vm6, %v1099_v30, %v1098_v44  ;;  %v2194_v44 = vld [vmem:[%s3415_s12 + $0xe] sm:$0x1]  ;;  %v2177_v36 = vld [vmem:[%s3430_s25 + $0x6] sm:$0x1] }
 0x1a3   : > { %v1404_v58 = vsel %vm534_vm6, %v1403_v22, %v1402_v43  ;;  %v1965_v11 = vrot.slane %v1916_v49, 3  ;;  %v1967_v34 = vrot.slane %v3709_v50, 2  ;;  %v3739_v63 = vsel %vm537_vm7, %v1123_v6, %v3656_v32  ;;  %v1899_v22 = vld [vmem:[%s3430_s25 + $0x25] sm:$0x1]  ;;  %v2460_v0 = vld [vmem:[%s3430_s25 + $0xf] sm:$0x1] }
 0x1a4   : > { %v1962_v45 = vsel %vm525_vm3, %v1961_v51, %v1960_v56  ;;  %v1684_v28 = vsel %vm531_vm5, %v1683_v38, %v1682_v42  ;;  %v1905_v6 = vmul.f32 0.5, %v1897_v59  ;;  %v3754_v32 = vsel %vm537_vm7, %v1101_v41, %v1100_v23  ;;  %v2195_v41 = vld [vmem:[%s3415_s12 + $0x16] sm:$0x1]  ;;  %v2196_v50 = vld [vmem:[%s3415_s12 + $0x1e] sm:$0x1] }
 0x1a5   : > { %v1903_v13 = vmul.f32 0.5, %v1895_v7  ;;  %v1935_v16 = vrot.slane %v1904_v57, 7  ;;  %v1964_v12 = vsel %vm528_vm4, %v1963_v55, %v1962_v45  ;;  %v2239_v29 = vrot.slane %v2194_v44, 7  ;;  %v2461_v59 = vld [vmem:[%s3430_s25 + $0x17] sm:$0x1] }
 0x1a6   : > { %v2186_v31 = vmul.f32 0.5, %v2178_v9  ;;  %v3773_v38 = vmul.f32 0.5, %v1899_v22  ;;  %v3779_v15 = vmul.f32 0.5, %v1901_v60  ;;  %v3781_v48 = vmul.f32 0.5, %v1902_v10  ;;  %v2197_v7 = vld [vmem:[%s3415_s12 + $0x26] sm:$0x1] }
 0x1a7   : > { %v1937_v43 = vrot.slane %v1905_v6, 6  ;;  %v1966_v49 = vsel %vm531_vm5, %v1965_v11, %v1964_v12  ;;  %v2241_v51 = vrot.slane %v2195_v41, 6  ;;  %v2240_v42 = vsel %vm519_vm1, %v2239_v29, %v2193_v19  ;;  %v2459_v45 = vld [vmem:[%s3430_s25 + $0x7] sm:$0x1]  ;;  %v2181_v44 = vld [vmem:[%s3430_s25 + $0x26] sm:$0x1] }
 0x1a8   : > { %v2217_v55 = vrot.slane %v2186_v31, 7  ;;  %v2468_v57 = vmul.f32 0.5, %v2460_v0  ;;  %v2475_v9 = vld [vmem:[%s3415_s12 + $0x7] sm:$0x1]  ;;  %v2478_v60 = vld [vmem:[%s3415_s12 + $0x1f] sm:$0x1] }
 0x1a9   : > { %v2467_v10 = vmul.f32 0.5, %v2459_v45  ;;  %v1941_v19 = vrot.slane %v3773_v38, 4  ;;  %v2198_v12 = vld [vmem:[%s3415_s12 + $0x2e] sm:$0x1]  ;;  %v2189_v29 = vmul.f32 0.5, %v2181_v44 }
 0x1aa   : > { %v2182_v41 = vld [vmem:[%s3430_s25 + $0x2e] sm:$0x1]  ;;  %v2463_v31 = vld [vmem:[%s3430_s25 + $0x27] sm:$0x1] }
 0x1ab   : > { %v2479_v38 = vld [vmem:[%s3415_s12 + $0x27] sm:$0x1] }
 0x20d   : > { %v648_v5 = vpop.permute.xlu0 %647 }
 0x20e   : > { %v650_v54 = vsub.f32 %v3483_v14, %v648_v5  ;;  %v3687_v14 = vld [vmem:[%s3415_s12 + $0x3c] sm:$0x1]  ;;  %v1380_v5 = vsel %vm531_vm5, %v1379_v40, %v1378_v8  ;;  %v3717_v40 = vld [vmem:[%s3415_s12 + $0x3d] sm:$0x1]  ;;  %v3733_v8 = vsel %vm537_vm7, %v819_v61, %v3631_v3  ;;  %v1662_v61 = vsel %vm531_vm5, %v1661_v53, %v1660_v62  ;;  %v2180_v53 = vld [vmem:[%s3430_s25 + $0x1e] sm:$0x1] }
 0x20f   : > { %v1687_v47 = vrot.slane %v3687_v14, 1  ;;  %v1382_v30 = vsel %vm534_vm6, %v1381_v1, %v1380_v5  ;;  %v1969_v3 = vrot.slane %v3717_v40, 1  ;;  %v3759_v1 = vsel %vm537_vm7, %v1405_v25, %v1404_v58  ;;  %v2476_v5 = vld [vmem:[%s3415_s12 + $0xf] sm:$0x1] }
 0x210   : > { %v651_v4 = vmul.f32 1.442695, %v650_v54  ;;  %v1665_v54 = vrot.slane %v3693_v17, 1  ;;  %v3766_v26 = vsel %vm537_vm7, %v1383_v2, %v1382_v30  ;;  %v1686_v25 = vsel %vm534_vm6, %v1685_v39, %v1684_v28 }
 0x211   : > { %v1664_v35 = vsel %vm534_vm6, %v1663_v27, %v1662_v61  ;;  %v3777_v2 = vmul.f32 0.5, %v1900_v52  ;;  %v1936_v39 = vsel %vm519_vm1, %v1935_v16, %v1903_v13  ;;  %v2187_v27 = vmul.f32 0.5, %v2179_v46  ;;  %v2462_v61 = vld [vmem:[%s3430_s25 + $0x1f] sm:$0x1] }
 0x212   : > { %3209 = vpow2.f32 %v651_v4  ;;  %v1898_v4 = vld [vmem:[%s3430_s25 + $0x1d] sm:$0x1]  ;;  %v2185_v62 = vmul.f32 0.5, %v2177_v36  ;;  %v3795_v58 = vsel %vm537_vm7, %v1687_v47, %v1686_v25  ;;  %v3800_v11 = vsel %vm537_vm7, %v1665_v54, %v1664_v35 }
 0x213   : > { %v1906_v37 = vmul.f32 0.5, %v1898_v4  ;;  %v2477_v4 = vld [vmem:[%s3415_s12 + $0x17] sm:$0x1]  ;;  %v2521_v30 = vrot.slane %v2476_v5, 7  ;;  %v1968_v14 = vsel %vm534_vm6, %v1967_v34, %v1966_v49  ;;  %v1938_v47 = vsel %vm522_vm2, %v1937_v43, %v1936_v39  ;;  %v2199_v43 = vld [vmem:[%s3415_s12 + $0x36] sm:$0x1] }
 0x214   : > { %v2188_v17 = vmul.f32 0.5, %v2180_v53  ;;  %v2242_v54 = vsel %vm522_vm2, %v2241_v51, %v2240_v42  ;;  %v2219_v28 = vrot.slane %v2187_v27, 6  ;;  %v2469_v52 = vmul.f32 0.5, %v2461_v59  ;;  %v2183_v5 = vld [vmem:[%s3430_s25 + $0x36] sm:$0x1] }
 0x215   : > { %v1939_v22 = vrot.slane %v1906_v37, 5  ;;  %v2218_v34 = vsel %vm519_vm1, %v2217_v55, %v2185_v62  ;;  %v2523_v6 = vrot.slane %v2477_v4, 6  ;;  %v2499_v13 = vrot.slane %v2468_v57, 7  ;;  %v2480_v55 = vld [vmem:[%s3415_s12 + $0x2f] sm:$0x1] }
 0x216   : > { %v3823_v16 = vsel %vm537_vm7, %v1969_v3, %v1968_v14  ;;  %v2522_v46 = vsel %vm519_vm1, %v2521_v30, %v2475_v9  ;;  %v2221_v3 = vrot.slane %v2188_v17, 5  ;;  %v2470_v25 = vmul.f32 0.5, %v2462_v61  ;;  %v2481_v9 = vld [vmem:[%s3415_s12 + $0x37] sm:$0x1] }
 0x217   : > { %v1940_v40 = vsel %vm525_vm3, %v1939_v22, %v1938_v47  ;;  %v2220_v37 = vsel %vm522_vm2, %v2219_v28, %v2218_v34  ;;  %v2525_v36 = vrot.slane %v2478_v60, 5  ;;  %v2501_v0 = vrot.slane %v2469_v52, 6  ;;  %v2465_v22 = vld [vmem:[%s3430_s25 + $0x37] sm:$0x1] }
 0x218   : > { %v2190_v49 = vmul.f32 0.5, %v2182_v41  ;;  %v2524_v39 = vsel %vm522_vm2, %v2523_v6, %v2522_v46  ;;  %v1942_v51 = vsel %vm528_vm4, %v1941_v19, %v1940_v40  ;;  %v2247_v53 = vrot.slane %v2198_v12, 3  ;;  %v2482_v12 = vld [vmem:[%s3415_s12 + $0x3f] sm:$0x1] }
 0x219   : > { %v2223_v27 = vrot.slane %v2189_v29, 4  ;;  %v2471_v42 = vmul.f32 0.5, %v2463_v31  ;;  %v2222_v62 = vsel %vm525_vm3, %v2221_v3, %v2220_v37  ;;  %v2503_v59 = vrot.slane %v2470_v25, 5 }
 0x21a   : > { %v1945_v57 = vrot.slane %v3779_v15, 2  ;;  %v2191_v4 = vmul.f32 0.5, %v2183_v5  ;;  %v2249_v14 = vrot.slane %v2199_v43, 2  ;;  %v2225_v47 = vrot.slane %v2190_v49, 3 }
 0x21b   : > { %v2224_v15 = vsel %vm528_vm4, %v2223_v27, %v2222_v62  ;;  %v1947_v28 = vrot.slane %v3781_v48, 1  ;;  %v2531_v41 = vrot.slane %v2481_v9, 2  ;;  %v2533_v25 = vrot.slane %v2482_v12, 1  ;;  %v661_v12 = vld [vmem:[#allocation4] sm:$0xff] }
 0x21c   : > { %v2227_v6 = vrot.slane %v2191_v4, 2  ;;  %v2226_v19 = vsel %vm531_vm5, %v2225_v47, %v2224_v15  ;;  %v643_v5 = vmul.f32 1.442695, %v642_v21  ;;  %v918_v15 = vld [vmem:[#allocation2 + $0x8] sm:$0xff] }
 0x21e   : > { %3211 = vpow2.f32 %v643_v5 }
 0x21f   : > { %v3210_v56 = vpop.eup %3209 }
 0x220   : > { %3083 = vmatmul.mubr.msk.f32.vlgmr.msra.gmra.mxu1 %vm637_vm10, %v3210_v56  ;;  %v655_v23 = vsel %vm637_vm10, %v3210_v56, 0.0  ;;  %v2464_v56 = vld [vmem:[%s3430_s25 + $0x2f] sm:$0x1] }
 0x221   : > { %3086 = vmatpush3.xpose.msk.msra.mxu1 %vm469_vm0, %v3617_v33  ;;  %656 = vadd.xlane.f32.xlu1 %v655_v23  ;;  %v2243_v33 = vrot.slane %v2196_v50, 5  ;;  %v2500_v50 = vsel %vm519_vm1, %v2499_v13, %v2467_v10  ;;  %v2200_v23 = vld [vmem:[%s3415_s12 + $0x3e] sm:$0x1]  ;;  %v2472_v44 = vmul.f32 0.5, %v2464_v56  ;;  %v2466_v10 = vld [vmem:[%s3430_s25 + $0x3f] sm:$0x1] }
 0x222   : > { %3087 = vmatprep.mubr.msk.f32.mxu1 %vm3298_vm8, %v3297_v24  ;;  %3095 = vmatprep.subr.mxu1 %v3297_v24  ;;  %v2502_v30 = vsel %vm522_vm2, %v2501_v0, %v2500_v50  ;;  %v2251_v60 = vrot.slane %v2200_v23, 1  ;;  %v2473_v13 = vmul.f32 0.5, %v2465_v22  ;;  %v2474_v3 = vmul.f32 0.5, %v2466_v10 }
 0x223   : > { %v2244_v35 = vsel %vm525_vm3, %v2243_v33, %v2242_v54  ;;  %v2529_v54 = vrot.slane %v2480_v55, 3  ;;  %v2505_v33 = vrot.slane %v2471_v42, 4  ;;  %v2504_v52 = vsel %vm525_vm3, %v2503_v59, %v2502_v30 }
 0x224   : > { %3088 = vmatmul.mubr.msk.f32.vlgmr.msra.gmra.mxu1 %vm469_vm0, %v3733_v8  ;;  %v2245_v8 = vrot.slane %v2197_v7, 4  ;;  %v2184_v7 = vld [vmem:[%s3430_s25 + $0x3e] sm:$0x1]  ;;  %v2507_v48 = vrot.slane %v2472_v44, 3 }
 0x225   : > { %3096 = vmatpush3.xpose.msk.msra.mxu1 %vm469_vm0, %v3739_v63  ;;  %3097 = vmatprep.mubr.msk.f32.mxu1 %vm3298_vm8, %v3297_v24  ;;  %v1943_v63 = vrot.slane %v3777_v2, 3  ;;  %v2192_v61 = vmul.f32 0.5, %v2184_v7  ;;  %v2506_v46 = vsel %vm528_vm4, %v2505_v33, %v2504_v52  ;;  %v1200_v33 = vld [vmem:[#allocation2 + $0x10] sm:$0xff] }
 0x226   : > { %3105 = vmatprep.subr.mxu1 %v3297_v24  ;;  %v2246_v2 = vsel %vm528_vm4, %v2245_v8, %v2244_v35  ;;  %v2509_v35 = vrot.slane %v2473_v13, 2 }
 0x227   : > { %v1944_v45 = vsel %vm531_vm5, %v1943_v63, %v1942_v51  ;;  %v2248_v17 = vsel %vm531_vm5, %v2247_v53, %v2246_v2  ;;  %v2229_v8 = vrot.slane %v2192_v61, 1 }
 0x228   : > { %3098 = vmatmul.mubr.msk.f32.vlgmr.msra.gmra.mxu1 %vm469_vm0, %v3754_v32  ;;  %v2527_v32 = vrot.slane %v2479_v38, 4  ;;  %v1946_v34 = vsel %vm534_vm6, %v1945_v57, %v1944_v45  ;;  %v2508_v38 = vsel %vm531_vm5, %v2507_v48, %v2506_v46  ;;  %v791_v46 = vld [vmem:[%s3498_s26 + $0x1] sm:$0x1] }
 0x229   : > { %3106 = vmatpush3.xpose.msk.msra.mxu1 %vm469_vm0, %v3759_v1  ;;  %3107 = vmatprep.mubr.msk.f32.mxu1 %vm3298_vm8, %v3297_v24  ;;  %v2526_v1 = vsel %vm525_vm3, %v2525_v36, %v2524_v39  ;;  %v1948_v40 = vsel %vm537_vm7, %v1947_v28, %v1946_v34  ;;  %v2511_v36 = vrot.slane %v2474_v3, 1  ;;  %v2510_v63 = vsel %vm534_vm6, %v2509_v35, %v2508_v38  ;;  %v653_v39 = vld [vmem:[#allocation3] sm:$0xff]  ;;  %v1482_v34 = vld [vmem:[#allocation2 + $0x18] sm:$0xff] }
 0x22a   : > { %3115 = vmatprep.subr.mxu1 %v3297_v24 }
 0x22b   : > { %v2512_v43 = vsel %vm537_vm7, %v2511_v36, %v2510_v63  ;;  %v3212_v49 = vpop.eup %3211  ;;  %v797_v63 = vld [vmem:[%s3498_s26 + $0x31] sm:$0x1] }
 0x22c   : > { %3108 = vmatmul.mubr.msk.f32.vlgmr.msra.gmra.mxu1 %vm469_vm0, %v3766_v26  ;;  %v2528_v26 = vsel %vm528_vm4, %v2527_v32, %v2526_v1  ;;  %v654_v50 = vmul.f32 %v3212_v49, %v653_v39 }
 0x22d   : > { %3116 = vmatpush3.xpose.msk.msra.mxu1 %vm469_vm0, %v3795_v58  ;;  %3117 = vmatprep.mubr.msk.f32.mxu1 %vm3298_vm8, %v3297_v24  ;;  %v2250_v58 = vsel %vm534_vm6, %v2249_v14, %v2248_v17  ;;  %v2530_v29 = vsel %vm531_vm5, %v2529_v54, %v2528_v26 }
 0x22e   : > { %3125 = vmatprep.subr.mxu1 %v3297_v24  ;;  %v2252_v31 = vsel %vm537_vm7, %v2251_v60, %v2250_v58  ;;  %v2532_v37 = vsel %vm534_vm6, %v2531_v41, %v2530_v29  ;;  %v792_v58 = vld [vmem:[%s3498_s26 + $0x9] sm:$0x1]  ;;  %v793_v41 = vld [vmem:[%s3498_s26 + $0x11] sm:$0x1] }
 0x22f   : > { %v2534_v0 = vsel %vm537_vm7, %v2533_v25, %v2532_v37  ;;  %v958_v48 = vrot.slane %v792_v58, 7 }
 0x230   : > { %3118 = vmatmul.mubr.msk.f32.vlgmr.msra.gmra.mxu1 %vm469_vm0, %v3800_v11  ;;  %v2228_v11 = vsel %vm534_vm6, %v2227_v6, %v2226_v19  ;;  %v3946_v19 = vld [vmem:[#allocation2 + $0x20] sm:$0xff] }
 0x231   : > { %3126 = vmatpush3.xpose.msk.msra.mxu1 %vm469_vm0, %v3823_v16  ;;  %3127 = vmatprep.mubr.msk.f32.mxu1 %vm3298_vm8, %v3297_v24  ;;  %v2230_v16 = vsel %vm537_vm7, %v2229_v8, %v2228_v11  ;;  %v960_v8 = vrot.slane %v793_v41, 6  ;;  %v795_v11 = vld [vmem:[%s3498_s26 + $0x21] sm:$0x1]  ;;  %v959_v25 = vsel %vm519_vm1, %v958_v48, %v791_v46  ;;  %v1355_v48 = vld [vmem:[%s3498_s26 + $0x3] sm:$0x1] }
 0x232   : > { %3135 = vmatprep.subr.mxu1 %v3297_v24  ;;  %v964_v5 = vrot.slane %v795_v11, 4  ;;  %v1638_v46 = vld [vmem:[%s3498_s26 + $0xc] sm:$0x1]  ;;  %v1078_v11 = vld [vmem:[%s3498_s26 + $0x2a] sm:$0x1] }
 0x233   : > { %v961_v36 = vsel %vm522_vm2, %v960_v8, %v959_v25  ;;  %v1358_v8 = vld [vmem:[%s3498_s26 + $0x1b] sm:$0x1] }
 0x234   : > { %3128 = vmatmul.mubr.msk.f32.vlgmr.msra.gmra.mxu1 %vm469_vm0, %v1948_v40  ;;  %v794_v40 = vld [vmem:[%s3498_s26 + $0x19] sm:$0x1] }
 0x235   : > { %3136 = vmatpush3.xpose.msk.msra.mxu1 %vm469_vm0, %v2252_v31  ;;  %3137 = vmatprep.mubr.msk.f32.mxu1 %vm3298_vm8, %v3297_v24  ;;  %v962_v35 = vrot.slane %v794_v40, 5 }
 0x236   : > { %3145 = vmatprep.subr.mxu1 %v3297_v24 }
 0x238   : > { %3138 = vmatmul.mubr.msk.f32.vlgmr.msra.gmra.mxu1 %vm469_vm0, %v2230_v16  ;;  %v796_v16 = vld [vmem:[%s3498_s26 + $0x29] sm:$0x1] }
 0x239   : > { %3146 = vmatpush3.xpose.msk.msra.mxu1 %vm469_vm0, %v2534_v0  ;;  %3147 = vmatprep.mubr.msk.f32.mxu1 %vm3298_vm8, %v3297_v24  ;;  %v3959_v0 = vld [vmem:[#allocation2 + $0x28] sm:$0xff] }
 0x23c   : > { %3148 = vmatmul.mubr.msk.f32.vlgmr.msra.gmra.mxu1 %vm469_vm0, %v2512_v43  ;;  %v963_v43 = vsel %vm525_vm3, %v962_v35, %v961_v36  ;;  %v1639_v36 = vld [vmem:[%s3498_s26 + $0x14] sm:$0x1] }
 0x2aa   : > { %v657_v51 = vpop.xlane.xlu1 %656 }
 0x2ab   : > { %v658_v53 = vadd.f32 %v657_v51, %v654_v50 }
 0x2ad   : > { %660 = vst.msk [vmem:[#allocation3] sm:$0xff] %vm452_vm9, %v658_v53  ;;  %v798_v53 = vld [vmem:[%s3498_s26 + $0x39] sm:$0x1] }
 0x2e0   : > { %v3913_v27 = vpop.f32.mrf.mxu1 }
 0x2e2   : > { %v3084_v56 = vpop.f32.mrf.mxu1 }
 0x2e3   : > { %v968_v56 = vrot.slane %v797_v63, 2  ;;  %v1804_v63 = vrot.slane %v1638_v46, 7 }
 0x2e4   : > { %v3915_v42 = vpop.f32.mrf.mxu1 }
 0x2e5   : > { %v919_v2 = vsel %vm637_vm10, %v3915_v42, -inf }
 0x2e6   : > { %v3089_v62 = vpop.f32.mrf.mxu1  ;;  %920 = vmax.xlane.f32.xlu1 %v919_v2 }
 0x2e7   : > { %v965_v62 = vsel %vm528_vm4, %v964_v5, %v963_v43  ;;  %v1526_v5 = vrot.slane %v1358_v8, 5  ;;  %v1922_v8 = vld [vmem:[%s3498_s26 + $0x1d] sm:$0x1] }
 0x2e8   : > { %v3919_v18 = vpop.f32.mrf.mxu1 }
 0x2e9   : > { %v1201_v20 = vsel %vm637_vm10, %v3919_v18, -inf }
 0x2ea   : > { %v3099_v21 = vpop.f32.mrf.mxu1  ;;  %1202 = vmax.xlane.f32.xlu1 %v1201_v20  ;;  %v970_v20 = vrot.slane %v798_v53, 1  ;;  %v1920_v53 = vld [vmem:[%s3498_s26 + $0xd] sm:$0x1] }
 0x2ec   : > { %v3923_v55 = vpop.f32.mrf.mxu1 }
 0x2ed   : > { %v1483_v32 = vsel %vm637_vm10, %v3923_v55, -inf }
 0x2ee   : > { %v3109_v59 = vpop.f32.mrf.mxu1  ;;  %1484 = vmax.xlane.f32.xlu1 %v1483_v32 }
 0x2ef   : > { %v3976_v59 = vld [vmem:[#allocation2 + $0x30] sm:$0xff] }
 0x2f0   : > { %v3927_v57 = vpop.f32.mrf.mxu1 }
 0x2f1   : > { %v1765_v23 = vsel %vm637_vm10, %v3927_v57, -inf }
 0x2f2   : > { %1766 = vmax.xlane.f32.xlu0 %v1765_v23  ;;  %v3119_v7 = vpop.f32.mrf.mxu1 }
 0x2f4   : > { %v3931_v4 = vpop.f32.mrf.mxu1 }
 0x2f5   : > { %v2047_v1 = vsel %vm637_vm10, %v3931_v4, -inf }
 0x2f6   : > { %2048 = vmax.xlane.f32.xlu0 %v2047_v1  ;;  %v3129_v30 = vpop.f32.mrf.mxu1 }
 0x2f8   : > { %v3935_v45 = vpop.f32.mrf.mxu1 }
 0x2f9   : > { %v2329_v14 = vsel %vm637_vm10, %v3935_v45, -inf }
 0x2fa   : > { %2330 = vmax.xlane.f32.xlu0 %v2329_v14  ;;  %v3139_v47 = vpop.f32.mrf.mxu1 }
 0x2fb   : > { %v3992_v47 = vld [vmem:[#allocation2 + $0x38] sm:$0xff] }
 0x2fc   : > { %v3939_v22 = vpop.f32.mrf.mxu1 }
 0x2fd   : > { %v2611_v44 = vsel %vm637_vm10, %v3939_v22, -inf }
 0x2fe   : > { %v3149_v17 = vpop.f32.mrf.mxu1  ;;  %2612 = vmax.xlane.f32.xlu0 %v2611_v44 }
 0x2ff   : > { %664 = vperm.xlu1 %3208, %v3212_v49   ;;  %v966_v49 = vrot.slane %v796_v16, 3  ;;  %v1359_v16 = vld [vmem:[%s3498_s26 + $0x23] sm:$0x1] }
 0x301   : > { %v967_v32 = vsel %vm531_vm5, %v966_v49, %v965_v62  ;;  %v1637_v49 = vld [vmem:[%s3498_s26 + $0x4] sm:$0x1] }
 0x302   : > { %v969_v23 = vsel %vm534_vm6, %v968_v56, %v967_v32  ;;  %v1806_v32 = vrot.slane %v1639_v36, 6 }
 0x303   : > { %v971_v7 = vsel %vm537_vm7, %v970_v20, %v969_v23  ;;  %v1640_v20 = vld [vmem:[%s3498_s26 + $0x1c] sm:$0x1]  ;;  %v1360_v23 = vld [vmem:[%s3498_s26 + $0x2b] sm:$0x1] }
 0x304   : > { %3091 = vmatpush3.msra.mxu0 %v971_v7  ;;  %v1528_v7 = vrot.slane %v1359_v16, 4 }
 0x305   : > { %3100 = vmatprep.subr.mxu0 %v3297_v24 }
 0x36f   : > { %v921_v9 = vpop.xlane.xlu1 %920 }
 0x370   : > { %v922_v54 = vmax.f32 %v918_v15, %v921_v9 }
 0x372   : > { %v923_v28 = vsub.f32 %v918_v15, %v922_v54  ;;  %1048 = vst.msk [vmem:[#allocation2 + $0x8] sm:$0xff] %vm452_vm9, %v922_v54  ;;  %928 = vperm.xlu0 %3207, %v922_v54  }
 0x373   : > { %v1203_v61 = vpop.xlane.xlu1 %1202 }
 0x374   : > { %v924_v26 = vmul.f32 1.442695, %v923_v28  ;;  %v1204_v52 = vmax.f32 %v1200_v33, %v1203_v61  ;;  %v1074_v28 = vld [vmem:[%s3498_s26 + $0xa] sm:$0x1]  ;;  %v1075_v61 = vld [vmem:[%s3498_s26 + $0x12] sm:$0x1] }
 0x376   : > { %3213 = vpow2.f32 %v924_v26  ;;  %v1205_v60 = vsub.f32 %v1200_v33, %v1204_v52  ;;  %1330 = vst.msk [vmem:[#allocation2 + $0x10] sm:$0xff] %vm452_vm9, %v1204_v52  ;;  %1210 = vperm.xlu0 %3207, %v1204_v52   ;;  %v1240_v26 = vrot.slane %v1074_v28, 7  ;;  %v1073_v52 = vld [vmem:[%s3498_s26 + $0x2] sm:$0x1] }
 0x377   : > { %v1485_v6 = vpop.xlane.xlu1 %1484 }
 0x378   : > { %v1206_v10 = vmul.f32 1.442695, %v1205_v60  ;;  %v1486_v13 = vmax.f32 %v1482_v34, %v1485_v6  ;;  %v1076_v60 = vld [vmem:[%s3498_s26 + $0x1a] sm:$0x1]  ;;  %v1242_v6 = vrot.slane %v1075_v61, 6 }
 0x379   : > { %v1244_v41 = vrot.slane %v1076_v60, 5 }
 0x37a   : > { %3215 = vpow2.f32 %v1206_v10  ;;  %v1487_v29 = vsub.f32 %v1482_v34, %v1486_v13  ;;  %1612 = vst.msk [vmem:[#allocation2 + $0x18] sm:$0xff] %vm452_vm9, %v1486_v13  ;;  %1492 = vperm.xlu0 %3207, %v1486_v13   ;;  %v1356_v34 = vld [vmem:[%s3498_s26 + $0xb] sm:$0x1]  ;;  %v1241_v10 = vsel %vm519_vm1, %v1240_v26, %v1073_v52  ;;  %v1357_v13 = vld [vmem:[%s3498_s26 + $0x13] sm:$0x1] }
 0x37b   : > { %v1767_v3 = vpop.xlane.xlu0 %1766  ;;  %v665_v31 = vpop.permute.xlu1 %664  ;;  %v1522_v58 = vrot.slane %v1356_v34, 7  ;;  %v1921_v26 = vld [vmem:[%s3498_s26 + $0x15] sm:$0x1] }
 0x37c   : > { %v3955_v37 = vmax.f32 %v3946_v19, %v1767_v3  ;;  %v667_v38 = vmul.f32 %v665_v31, %v661_v12  ;;  %v1488_v39 = vmul.f32 1.442695, %v1487_v29  ;;  %v1077_v12 = vld [vmem:[%s3498_s26 + $0x22] sm:$0x1]  ;;  %v1243_v29 = vsel %vm522_vm2, %v1242_v6, %v1241_v10  ;;  %v1919_v10 = vld [vmem:[%s3498_s26 + $0x5] sm:$0x1] }
 0x37d   : > { %v1524_v3 = vrot.slane %v1357_v13, 6  ;;  %v1246_v25 = vrot.slane %v1077_v12, 4  ;;  %v1523_v35 = vsel %vm519_vm1, %v1522_v58, %v1355_v48  ;;  %v1808_v6 = vrot.slane %v1640_v20, 5  ;;  %v2202_v13 = vld [vmem:[%s3498_s26 + $0xe] sm:$0x1] }
 0x37e   : > { %v1769_v50 = vsub.f32 %v3946_v19, %v3955_v37  ;;  %1894 = vst.msk [vmem:[#allocation2 + $0x20] sm:$0xff] %vm452_vm9, %v3955_v37  ;;  %v764_v51 = vadd.f32 %v3913_v27, %v667_v38  ;;  %1774 = vperm.xlu0 %3207, %v3955_v37   ;;  %3217 = vpow2.f32 %v1488_v39  ;;  %v1245_v38 = vsel %vm525_vm3, %v1244_v41, %v1243_v29  ;;  %v1080_v12 = vld [vmem:[%s3498_s26 + $0x3a] sm:$0x1]  ;;  %v1361_v41 = vld [vmem:[%s3498_s26 + $0x33] sm:$0x1] }
 0x37f   : > { %v2049_v2 = vpop.xlane.xlu0 %2048  ;;  %v1247_v62 = vsel %vm528_vm4, %v1246_v25, %v1245_v38  ;;  %v1530_v48 = vrot.slane %v1360_v23, 3  ;;  %v1252_v36 = vrot.slane %v1080_v12, 1  ;;  %v2205_v12 = vld [vmem:[%s3498_s26 + $0x26] sm:$0x1] }
 0x380   : > { %765 = vst.msk [vmem:[#allocation4] sm:$0xff] %vm469_vm0, %v764_v51  ;;  %v3973_v21 = vmax.f32 %v3959_v0, %v2049_v2  ;;  %v1248_v51 = vrot.slane %v1078_v11, 3  ;;  %v1079_v2 = vld [vmem:[%s3498_s26 + $0x32] sm:$0x1] }
 0x381   : > { %v1250_v60 = vrot.slane %v1079_v2, 2  ;;  %v1643_v2 = vld [vmem:[%s3498_s26 + $0x34] sm:$0x1] }
 0x382   : > { %v2051_v27 = vsub.f32 %v3959_v0, %v3973_v21  ;;  %2176 = vst.msk [vmem:[#allocation2 + $0x28] sm:$0xff] %vm452_vm9, %v3973_v21  ;;  %2056 = vperm.xlu0 %3207, %v3973_v21   ;;  %v1249_v34 = vsel %vm531_vm5, %v1248_v51, %v1247_v62  ;;  %v1362_v51 = vld [vmem:[%s3498_s26 + $0x3b] sm:$0x1] }
 0x383   : > { %v3985_v1 = vpop.eup %3213  ;;  %v2331_v30 = vpop.xlane.xlu0 %2330  ;;  %v1251_v16 = vsel %vm534_vm6, %v1250_v60, %v1249_v34  ;;  %v1924_v34 = vld [vmem:[%s3498_s26 + $0x2d] sm:$0x1] }
 0x384   : > { %v3988_v14 = vmax.f32 %v3976_v59, %v2331_v30  ;;  %946 = vperm.xlu1 %3208, %v3985_v1   ;;  %v1641_v30 = vld [vmem:[%s3498_s26 + $0x24] sm:$0x1] }
 0x385   : > { %v1810_v11 = vrot.slane %v1641_v30, 4 }
 0x386   : > { %v2333_v44 = vsub.f32 %v3976_v59, %v3988_v14  ;;  %2458 = vst.msk [vmem:[#allocation2 + $0x30] sm:$0xff] %vm452_vm9, %v3988_v14  ;;  %2338 = vperm.xlu0 %3207, %v3988_v14  }
 0x387   : > { %v3999_v17 = vpop.eup %3215  ;;  %v2613_v15 = vpop.xlane.xlu0 %2612 }
 0x388   : > { %1228 = vperm.xlu1 %3208, %v3999_v17   ;;  %v4003_v9 = vmax.f32 %v3992_v47, %v2613_v15  ;;  %v1805_v15 = vsel %vm519_vm1, %v1804_v63, %v1637_v49  ;;  %v1532_v63 = vrot.slane %v1361_v41, 2  ;;  %v2484_v49 = vld [vmem:[%s3498_s26 + $0xf] sm:$0x1] }
 0x389   : > { %v1807_v29 = vsel %vm522_vm2, %v1806_v32, %v1805_v15  ;;  %v2204_v32 = vld [vmem:[%s3498_s26 + $0x1e] sm:$0x1]  ;;  %v2485_v15 = vld [vmem:[%s3498_s26 + $0x17] sm:$0x1] }
 0x38a   : > { %v2615_v54 = vsub.f32 %v3992_v47, %v4003_v9  ;;  %2740 = vst.msk [vmem:[#allocation2 + $0x38] sm:$0xff] %vm452_vm9, %v4003_v9  ;;  %v2372_v41 = vrot.slane %v2204_v32, 5 }
 0x38b   : > { %v4010_v33 = vpop.eup %3217 }
 0x38c   : > { %2620 = vperm.xlu1 %3208, %v4003_v9   ;;  %v2616_v37 = vmul.f32 1.442695, %v2615_v54  ;;  %v1217_v54 = vld [vmem:[#allocation3 + $0x10] sm:$0xff] }
 0x38d   : > { %v1218_v0 = vmul.f32 %v3999_v17, %v1217_v54 }
 0x390   : > { %1510 = vperm.xlu1 %3208, %v4010_v33  }
 0x3ed   : > { %v929_v40 = vpop.permute.xlu0 %928 }
 0x3ee   : > { %v931_v31 = vsub.f32 %v3915_v42, %v929_v40  ;;  %v1525_v42 = vsel %vm522_vm2, %v1524_v3, %v1523_v35  ;;  %v1642_v40 = vld [vmem:[%s3498_s26 + $0x2c] sm:$0x1]  ;;  %v2088_v3 = vrot.slane %v1921_v26, 6  ;;  %v2368_v35 = vrot.slane %v2202_v13, 7  ;;  %v1644_v13 = vld [vmem:[%s3498_s26 + $0x3c] sm:$0x1] }
 0x3ef   : > { %v1527_v61 = vsel %vm525_vm3, %v1526_v5, %v1525_v42  ;;  %v2201_v5 = vld [vmem:[%s3498_s26 + $0x6] sm:$0x1]  ;;  %v1812_v62 = vrot.slane %v1642_v40, 3  ;;  %v1253_v26 = vsel %vm537_vm7, %v1252_v36, %v1251_v16  ;;  %v1814_v40 = vrot.slane %v1643_v2, 2 }
 0x3f0   : > { %v932_v43 = vmul.f32 1.442695, %v931_v31  ;;  %v1529_v46 = vsel %vm528_vm4, %v1528_v7, %v1527_v61  ;;  %v1816_v36 = vrot.slane %v1644_v13, 1 }
 0x3f1   : > { %v1211_v39 = vpop.permute.xlu0 %1210  ;;  %v1531_v42 = vsel %vm531_vm5, %v1530_v48, %v1529_v46 }
 0x3f2   : > { %3219 = vpow2.f32 %v932_v43  ;;  %v1213_v56 = vsub.f32 %v3919_v18, %v1211_v39  ;;  %v2086_v18 = vrot.slane %v1920_v53, 7  ;;  %v1809_v43 = vsel %vm525_vm3, %v1808_v6, %v1807_v29  ;;  %v1923_v53 = vld [vmem:[%s3498_s26 + $0x25] sm:$0x1]  ;;  %v2483_v6 = vld [vmem:[%s3498_s26 + $0x7] sm:$0x1] }
 0x3f3   : > { %v1811_v30 = vsel %vm528_vm4, %v1810_v11, %v1809_v43  ;;  %v2092_v60 = vrot.slane %v1923_v53, 4  ;;  %v2206_v43 = vld [vmem:[%s3498_s26 + $0x2e] sm:$0x1] }
 0x3f4   : > { %v1214_v28 = vmul.f32 1.442695, %v1213_v56  ;;  %v2087_v25 = vsel %vm519_vm1, %v2086_v18, %v1919_v10  ;;  %v2090_v56 = vrot.slane %v1922_v8, 5  ;;  %v1533_v18 = vsel %vm534_vm6, %v1532_v63, %v1531_v42 }
 0x3f5   : > { %v1493_v52 = vpop.permute.xlu0 %1492  ;;  %v2089_v20 = vsel %vm522_vm2, %v2088_v3, %v2087_v25  ;;  %v1813_v46 = vsel %vm531_vm5, %v1812_v62, %v1811_v30  ;;  %v2486_v3 = vld [vmem:[%s3498_s26 + $0x1f] sm:$0x1]  ;;  %v1925_v25 = vld [vmem:[%s3498_s26 + $0x35] sm:$0x1]  ;;  %v1926_v62 = vld [vmem:[%s3498_s26 + $0x3d] sm:$0x1] }
 0x3f6   : > { %3221 = vpow2.f32 %v1214_v28  ;;  %v1495_v58 = vsub.f32 %v3923_v55, %v1493_v52  ;;  %v2203_v55 = vld [vmem:[%s3498_s26 + $0x16] sm:$0x1]  ;;  %v2650_v28 = vrot.slane %v2484_v49, 7  ;;  %v1534_v52 = vrot.slane %v1362_v51, 1  ;;  %v2487_v51 = vld [vmem:[%s3498_s26 + $0x27] sm:$0x1] }
 0x3f7   : > { %v2370_v23 = vrot.slane %v2203_v55, 6  ;;  %v2094_v55 = vrot.slane %v1924_v34, 3  ;;  %v2654_v42 = vrot.slane %v2486_v3, 5  ;;  %v1815_v2 = vsel %vm534_vm6, %v1814_v40, %v1813_v46  ;;  %v2207_v30 = vld [vmem:[%s3498_s26 + $0x36] sm:$0x1] }
 0x3f8   : > { %v1496_v31 = vmul.f32 1.442695, %v1495_v58  ;;  %v2091_v58 = vsel %vm525_vm3, %v2090_v56, %v2089_v20  ;;  %v1535_v16 = vsel %vm537_vm7, %v1534_v52, %v1533_v18  ;;  %v2096_v20 = vrot.slane %v1925_v25, 2 }
 0x3f9   : > { %v1775_v38 = vpop.permute.xlu0 %1774  ;;  %v2093_v63 = vsel %vm528_vm4, %v2092_v60, %v2091_v58  ;;  %v2098_v18 = vrot.slane %v1926_v62, 1  ;;  %v2378_v13 = vrot.slane %v2207_v30, 2  ;;  %v935_v62 = vld [vmem:[#allocation3 + $0x8] sm:$0xff]  ;;  %v1781_v30 = vld [vmem:[#allocation3 + $0x20] sm:$0xff] }
 0x3fa   : > { %3223 = vpow2.f32 %v1496_v31  ;;  %v1777_v39 = vsub.f32 %v3927_v57, %v1775_v38  ;;  %v2369_v57 = vsel %vm519_vm1, %v2368_v35, %v2201_v5  ;;  %v2652_v31 = vrot.slane %v2485_v15, 6 }
 0x3fb   : > { %v2371_v8 = vsel %vm522_vm2, %v2370_v23, %v2369_v57  ;;  %v2651_v35 = vsel %vm519_vm1, %v2650_v28, %v2483_v6  ;;  %v2374_v5 = vrot.slane %v2205_v12, 4  ;;  %v2376_v57 = vrot.slane %v2206_v43, 3  ;;  %v2488_v28 = vld [vmem:[%s3498_s26 + $0x2f] sm:$0x1] }
 0x3fc   : > { %v1778_v7 = vmul.f32 1.442695, %v1777_v39  ;;  %v2373_v39 = vsel %vm525_vm3, %v2372_v41, %v2371_v8  ;;  %v2658_v46 = vrot.slane %v2488_v28, 3  ;;  %v936_v47 = vmul.f32 %v3985_v1, %v935_v62 }
 0x3fd   : > { %v2057_v61 = vpop.permute.xlu0 %2056  ;;  %v2375_v15 = vsel %vm528_vm4, %v2374_v5, %v2373_v39  ;;  %v1770_v39 = vmul.f32 1.442695, %v1769_v50  ;;  %vm2857_vm1 = vcmask 261344  }
 0x3fe   : > { %3225 = vpow2.f32 %v1778_v7  ;;  %v2059_v10 = vsub.f32 %v3931_v4, %v2057_v61  ;;  %v2095_v7 = vsel %vm531_vm5, %v2094_v55, %v2093_v63  ;;  %v2656_v61 = vrot.slane %v2487_v51, 4 }
 0x3ff   : > { %v3220_v48 = vpop.eup %3219  ;;  %v4077_v29 = vpop.permute.xlu1 %946  ;;  %v2097_v6 = vsel %vm534_vm6, %v2096_v20, %v2095_v7  ;;  %v2377_v41 = vsel %vm531_vm5, %v2376_v57, %v2375_v15 }
 0x400   : > { %v2060_v11 = vmul.f32 1.442695, %v2059_v10  ;;  %3093 = vmatmul.mubr.msk.f32.vlgmr.msra.gmra.mxu0 %vm637_vm10, %v3220_v48  ;;  %v937_v4 = vsel %vm637_vm10, %v3220_v48, 0.0  ;;  %v2208_v10 = vld [vmem:[%s3498_s26 + $0x3e] sm:$0x1] }
 0x401   : > { %938 = vadd.xlane.f32.xlu0 %v937_v4  ;;  %v2339_v38 = vpop.permute.xlu0 %2338  ;;  %3101 = vmatpush3.msra.mxu0 %v1253_v26  ;;  %v1817_v26 = vsel %vm537_vm7, %v1816_v36, %v1815_v2  ;;  %v2489_v48 = vld [vmem:[%s3498_s26 + $0x37] sm:$0x1]  ;;  %v2380_v3 = vrot.slane %v2208_v10, 1  ;;  %v2490_v4 = vld [vmem:[%s3498_s26 + $0x3f] sm:$0x1]  ;;  %v2745_v2 = vld [vmem:[#allocation3] sm:$0xff] }
 0x402   : > { %3227 = vpow2.f32 %v2060_v11  ;;  %v2341_v49 = vsub.f32 %v3935_v45, %v2339_v38  ;;  %3102 = vmatprep.mubr.msk.f32.mxu0 %vm3298_vm8, %v3297_v24  ;;  %3110 = vmatprep.subr.mxu0 %v3297_v24  ;;  %v2653_v45 = vsel %vm522_vm2, %v2652_v31, %v2651_v35  ;;  %v2379_v11 = vsel %vm534_vm6, %v2378_v13, %v2377_v41 }
 0x403   : > { %v3222_v53 = vpop.eup %3221  ;;  %v4095_v56 = vpop.permute.xlu1 %1228  ;;  %v2655_v52 = vsel %vm525_vm3, %v2654_v42, %v2653_v45  ;;  %v2660_v25 = vrot.slane %v2489_v48, 2  ;;  %v2381_v38 = vsel %vm537_vm7, %v2380_v3, %v2379_v11  ;;  %v2334_v42 = vmul.f32 1.442695, %v2333_v44  ;;  %v1499_v45 = vld [vmem:[#allocation3 + $0x18] sm:$0xff] }
 0x404   : > { %v2342_v32 = vmul.f32 1.442695, %v2341_v49  ;;  %3103 = vmatmul.mubr.msk.f32.vlgmr.msra.gmra.mxu0 %vm637_vm10, %v3222_v53  ;;  %v1219_v23 = vsel %vm637_vm10, %v3222_v53, 0.0  ;;  %v2657_v40 = vsel %vm528_vm4, %v2656_v61, %v2655_v52  ;;  %v2063_v61 = vld [vmem:[#allocation3 + $0x28] sm:$0xff] }
 0x405   : > { %1220 = vadd.xlane.f32.xlu0 %v1219_v23  ;;  %3111 = vmatpush3.msra.mxu0 %v1535_v16  ;;  %v2659_v35 = vsel %vm531_vm5, %v2658_v46, %v2657_v40  ;;  %v2662_v16 = vrot.slane %v2490_v4, 1  ;;  %v1500_v23 = vmul.f32 %v4010_v33, %v1499_v45 }
 0x406   : > { %3229 = vpow2.f32 %v2342_v32  ;;  %3112 = vmatprep.mubr.msk.f32.mxu0 %vm3298_vm8, %v3297_v24  ;;  %3120 = vmatprep.subr.mxu0 %v3297_v24  ;;  %v2661_v63 = vsel %vm534_vm6, %v2660_v25, %v2659_v35  ;;  %v2744_v35 = vld [vmem:[#allocation4] sm:$0xff] }
 0x407   : > { %v3224_v34 = vpop.eup %3223  ;;  %v2621_v60 = vpop.permute.xlu1 %2620  ;;  %v2663_v5 = vsel %vm537_vm7, %v2662_v16, %v2661_v63 }
 0x408   : > { %v2623_v58 = vsub.f32 %v3939_v22, %v2621_v60  ;;  %3113 = vmatmul.mubr.msk.f32.vlgmr.msra.gmra.mxu0 %vm637_vm10, %v3224_v34  ;;  %v1501_v12 = vsel %vm637_vm10, %v3224_v34, 0.0  ;;  %v2099_v22 = vsel %vm537_vm7, %v2098_v18, %v2097_v6  ;;  %v2345_v34 = vld [vmem:[#allocation3 + $0x30] sm:$0xff] }
 0x409   : > { %1502 = vadd.xlane.f32.xlu1 %v1501_v12  ;;  %3121 = vmatpush3.msra.mxu0 %v1817_v26  ;;  %v2627_v12 = vld [vmem:[#allocation3 + $0x38] sm:$0xff] }
 0x40a   : > { %v2624_v8 = vmul.f32 1.442695, %v2623_v58  ;;  %3122 = vmatprep.mubr.msk.f32.mxu0 %vm3298_vm8, %v3297_v24  ;;  %3130 = vmatprep.subr.mxu0 %v3297_v24 }
 0x40b   : > { %v3226_v31 = vpop.eup %3225  ;;  %v4160_v21 = vpop.permute.xlu1 %1510 }
 0x40c   : > { %3231 = vpow2.f32 %v2624_v8  ;;  %3123 = vmatmul.mubr.msk.f32.vlgmr.msra.gmra.mxu0 %vm637_vm10, %v3226_v31  ;;  %v1783_v55 = vsel %vm637_vm10, %v3226_v31, 0.0 }
 0x40d   : > { %1784 = vadd.xlane.f32.xlu0 %v1783_v55  ;;  %3131 = vmatpush3.msra.mxu0 %v2099_v22  ;;  %3233 = vpow2.f32 %v1770_v39  ;;  %v943_v55 = vld [vmem:[#allocation4 + $0x8] sm:$0xff]  ;;  %v1507_v39 = vld [vmem:[#allocation4 + $0x18] sm:$0xff] }
 0x40e   : > { %3132 = vmatprep.mubr.msk.f32.mxu0 %vm3298_vm8, %v3297_v24  ;;  %3140 = vmatprep.subr.mxu0 %v3297_v24  ;;  %3235 = vpow2.f32 %v2334_v42  ;;  %v949_v16 = vmul.f32 %v4077_v29, %v943_v55 }
 0x40f   : > { %v3228_v36 = vpop.eup %3227  ;;  %3237 = vpow2.f32 %v2616_v37  ;;  %v1789_v37 = vld [vmem:[#allocation4 + $0x20] sm:$0xff] }
 0x410   : > { %3133 = vmatmul.mubr.msk.f32.vlgmr.msra.gmra.mxu0 %vm637_vm10, %v3228_v36  ;;  %v2065_v43 = vsel %vm637_vm10, %v3228_v36, 0.0  ;;  %v1225_v36 = vld [vmem:[#allocation4 + $0x10] sm:$0xff] }
 0x411   : > { %2066 = vadd.xlane.f32.xlu1 %v2065_v43  ;;  %3141 = vmatpush3.msra.mxu0 %v2381_v38 }
 0x412   : > { %3142 = vmatprep.mubr.msk.f32.mxu0 %vm3298_vm8, %v3297_v24  ;;  %3150 = vmatprep.subr.mxu0 %v3297_v24 }
 0x413   : > { %v3230_v49 = vpop.eup %3229 }
 0x414   : > { %3143 = vmatmul.mubr.msk.f32.vlgmr.msra.gmra.mxu0 %vm637_vm10, %v3230_v49  ;;  %v2347_v51 = vsel %vm637_vm10, %v3230_v49, 0.0  ;;  %v1231_v49 = vmul.f32 %v4095_v56, %v1225_v36 }
 0x415   : > { %2348 = vadd.xlane.f32.xlu1 %v2347_v51  ;;  %3151 = vmatpush3.msra.mxu0 %v2663_v5 }
 0x416   : > { %3152 = vmatprep.mubr.msk.f32.mxu0 %vm3298_vm8, %v3297_v24  ;;  %v2052_v24 = vmul.f32 1.442695, %v2051_v27 }
 0x418   : > { %3239 = vpow2.f32 %v2052_v24 }
 0x419   : > { %v3232_v53 = vpop.eup %3231 }
 0x41a   : > { %3153 = vmatmul.mubr.msk.f32.vlgmr.msra.gmra.mxu0 %vm637_vm10, %v3232_v53  ;;  %v2629_v19 = vsel %vm637_vm10, %v3232_v53, 0.0  ;;  %v3234_v50 = vpop.eup %3233 }
 0x41b   : > { %2630 = vadd.xlane.f32.xlu0 %v2629_v19  ;;  %v3236_v59 = vpop.eup %3235  ;;  %v1782_v15 = vmul.f32 %v3234_v50, %v1781_v30  ;;  %v1513_v19 = vmul.f32 %v4160_v21, %v1507_v39 }
 0x41c   : > { %v3238_v14 = vpop.eup %3237  ;;  %v2346_v6 = vmul.f32 %v3236_v59, %v2345_v34 }
 0x41d   : > { %v2628_v48 = vmul.f32 %v3238_v14, %v2627_v12 }
 0x425   : > { %v3240_v44 = vpop.eup %3239 }
 0x426   : > { %1792 = vperm.xlu1 %3208, %v3234_v50   ;;  %v2064_v18 = vmul.f32 %v3240_v44, %v2063_v61 }
 0x42a   : > { %2356 = vperm.xlu1 %3208, %v3236_v59  }
 0x42e   : > { %2638 = vperm.xlu1 %3208, %v3238_v14   ;;  %v2071_v14 = vld [vmem:[#allocation4 + $0x28] sm:$0xff] }
 0x431   : > { %2074 = vperm.xlu0 %3207, %v3240_v44  }
 0x432   : > { %2748 = vperm.xlu1 %3208, %v2745_v2  }
 0x48a   : > { %v939_v9 = vpop.xlane.xlu0 %938 }
 0x48b   : > { %v940_v20 = vadd.f32 %v939_v9, %v936_v47  ;;  %v2353_v9 = vld [vmem:[#allocation4 + $0x30] sm:$0xff] }
 0x48d   : > { %941 = vst.msk [vmem:[#allocation3 + $0x8] sm:$0xff] %vm452_vm9, %v940_v20 }
 0x48e   : > { %v1221_v27 = vpop.xlane.xlu0 %1220 }
 0x48f   : > { %v1222_v32 = vadd.f32 %v1221_v27, %v1218_v0 }
 0x491   : > { %1223 = vst.msk [vmem:[#allocation3 + $0x10] sm:$0xff] %vm452_vm9, %v1222_v32  ;;  %v2635_v32 = vld [vmem:[#allocation4 + $0x38] sm:$0xff] }
 0x492   : > { %v1503_v7 = vpop.xlane.xlu1 %1502 }
 0x493   : > { %v1504_v57 = vadd.f32 %v1503_v7, %v1500_v23 }
 0x494   : > { %v2755_v1 = vld [vmem:[#allocation3 + $0x8] sm:$0xff] }
 0x495   : > { %1505 = vst.msk [vmem:[#allocation3 + $0x18] sm:$0xff] %vm452_vm9, %v1504_v57  ;;  %2758 = vperm.xlu1 %3208, %v2755_v1  }
 0x496   : > { %v1785_v28 = vpop.xlane.xlu0 %1784 }
 0x497   : > { %v1786_v17 = vadd.f32 %v1785_v28, %v1782_v15 }
 0x498   : > { %v2770_v26 = vld [vmem:[#allocation3 + $0x10] sm:$0xff] }
 0x499   : > { %1787 = vst.msk [vmem:[#allocation3 + $0x20] sm:$0xff] %vm452_vm9, %v1786_v17  ;;  %2773 = vperm.xlu1 %3208, %v2770_v26  }
 0x49a   : > { %v2067_v52 = vpop.xlane.xlu1 %2066 }
 0x49b   : > { %v2068_v60 = vadd.f32 %v2067_v52, %v2064_v18 }
 0x49c   : > { %v2785_v33 = vld [vmem:[#allocation3 + $0x18] sm:$0xff] }
 0x49d   : > { %2069 = vst.msk [vmem:[#allocation3 + $0x28] sm:$0xff] %vm452_vm9, %v2068_v60  ;;  %2788 = vperm.xlu0 %3207, %v2785_v33  }
 0x49e   : > { %v2349_v10 = vpop.xlane.xlu1 %2348 }
 0x49f   : > { %v2350_v13 = vadd.f32 %v2349_v10, %v2346_v6 }
 0x4a0   : > { %v2800_v58 = vld [vmem:[#allocation3 + $0x20] sm:$0xff] }
 0x4a1   : > { %2351 = vst.msk [vmem:[#allocation3 + $0x30] sm:$0xff] %vm452_vm9, %v2350_v13  ;;  %2803 = vperm.xlu1 %3208, %v2800_v58  }
 0x4a2   : > { %v1793_v41 = vpop.permute.xlu1 %1792 }
 0x4a3   : > { %v1795_v59 = vmul.f32 %v1793_v41, %v1789_v37 }
 0x4a4   : > { %v2631_v46 = vpop.xlane.xlu0 %2630  ;;  %v2815_v40 = vld [vmem:[#allocation3 + $0x28] sm:$0xff] }
 0x4a5   : > { %v2632_v8 = vadd.f32 %v2631_v46, %v2628_v48  ;;  %2818 = vperm.xlu1 %3208, %v2815_v40  }
 0x4a6   : > { %v2357_v22 = vpop.permute.xlu1 %2356 }
 0x4a7   : > { %2633 = vst.msk [vmem:[#allocation3 + $0x38] sm:$0xff] %vm452_vm9, %v2632_v8  ;;  %v2359_v21 = vmul.f32 %v2357_v22, %v2353_v9 }
 0x4a8   : > { %v2830_v3 = vld [vmem:[#allocation3 + $0x30] sm:$0xff] }
 0x4a9   : > { %2833 = vperm.xlu0 %3207, %v2830_v3  }
 0x4aa   : > { %v2639_v31 = vpop.permute.xlu1 %2638 }
 0x4ab   : > { %v2641_v7 = vmul.f32 %v2639_v31, %v2635_v32 }
 0x4ac   : > { %v2075_v44 = vpop.permute.xlu0 %2074 }
 0x4ad   : > { %v2077_v47 = vmul.f32 %v2075_v44, %v2071_v14 }
 0x4ae   : > { %v2749_v11 = vpop.permute.xlu1 %2748  ;;  %v2845_v4 = vld [vmem:[#allocation3 + $0x38] sm:$0xff] }
 0x4af   : > { %3241 = vrcp.f32 %v2749_v11  ;;  %2848 = vperm.xlu1 %3208, %v2845_v4  }
 0x4bc   : > { %v3242_v25 = vpop.eup %3241 }
 0x4bd   : > { %v2752_v38 = vmul.f32 %v3242_v25, %v2744_v35 }
 0x4bf   : > { %2753 = vst.msk [vmem:[%s4174_s30] sm:$0xff] %vm469_vm0, %v2752_v38 }
 0x4c0   : > { %v1042_v63 = vpop.f32.mrf.mxu0 }
 0x4c1   : > { %v1046_v43 = vadd.f32 %v1042_v63, %v949_v16 }
 0x4c2   : > { %v3094_v5 = vpop.f32.mrf.mxu0 }
 0x4c3   : > { %1047 = vst.msk [vmem:[#allocation4 + $0x8] sm:$0xff] %vm469_vm0, %v1046_v43 }
 0x4c4   : > { %v1324_v51 = vpop.f32.mrf.mxu0 }
 0x4c5   : > { %v1328_v42 = vadd.f32 %v1324_v51, %v1231_v49 }
 0x4c6   : > { %v3104_v53 = vpop.f32.mrf.mxu0 }
 0x4c7   : > { %1329 = vst.msk [vmem:[#allocation4 + $0x10] sm:$0xff] %vm469_vm0, %v1328_v42 }
 0x4c8   : > { %v1606_v29 = vpop.f32.mrf.mxu0 }
 0x4c9   : > { %v1610_v24 = vadd.f32 %v1606_v29, %v1513_v19 }
 0x4ca   : > { %v3114_v50 = vpop.f32.mrf.mxu0  ;;  %v2754_v18 = vld [vmem:[#allocation4 + $0x8] sm:$0xff] }
 0x4cb   : > { %1611 = vst.msk [vmem:[#allocation4 + $0x18] sm:$0xff] %vm469_vm0, %v1610_v24 }
 0x4cc   : > { %v1888_v56 = vpop.f32.mrf.mxu0 }
 0x4cd   : > { %v1892_v2 = vadd.f32 %v1888_v56, %v1795_v59 }
 0x4ce   : > { %v3124_v62 = vpop.f32.mrf.mxu0  ;;  %v2769_v33 = vld [vmem:[#allocation4 + $0x10] sm:$0xff] }
 0x4cf   : > { %1893 = vst.msk [vmem:[#allocation4 + $0x20] sm:$0xff] %vm469_vm0, %v1892_v2 }
 0x4d0   : > { %v2170_v54 = vpop.f32.mrf.mxu0 }
 0x4d1   : > { %v2174_v20 = vadd.f32 %v2170_v54, %v2077_v47 }
 0x4d2   : > { %v3134_v0 = vpop.f32.mrf.mxu0  ;;  %v2784_v58 = vld [vmem:[#allocation4 + $0x18] sm:$0xff] }
 0x4d3   : > { %2175 = vst.msk [vmem:[#allocation4 + $0x28] sm:$0xff] %vm469_vm0, %v2174_v20 }
 0x4d4   : > { %v2452_v27 = vpop.f32.mrf.mxu0 }
 0x4d5   : > { %v2456_v45 = vadd.f32 %v2452_v27, %v2359_v21 }
 0x4d6   : > { %v3144_v23 = vpop.f32.mrf.mxu0  ;;  %v2799_v46 = vld [vmem:[#allocation4 + $0x20] sm:$0xff] }
 0x4d7   : > { %2457 = vst.msk [vmem:[#allocation4 + $0x30] sm:$0xff] %vm469_vm0, %v2456_v45 }
 0x4da   : > { %v2734_v30 = vpop.f32.mrf.mxu0  ;;  %v2814_v22 = vld [vmem:[#allocation4 + $0x28] sm:$0xff] }
 0x4db   : > { %v2738_v57 = vadd.f32 %v2734_v30, %v2641_v7 }
 0x4dc   : > { %v3154_v1 = vpop.f32.mrf.mxu0 }
 0x4dd   : > { %2739 = vst.msk [vmem:[#allocation4 + $0x38] sm:$0xff] %vm469_vm0, %v2738_v57  ;;  %vm2842_vm0 = vcmask 228544  }
 0x4de   : > { %v2829_v11 = vld [vmem:[#allocation4 + $0x30] sm:$0xff] }
 0x4e4   : > { %v2844_v55 = vld [vmem:[#allocation4 + $0x38] sm:$0xff] }
 0x510   : > { %v2759_v15 = vpop.permute.xlu1 %2758 }
 0x511   : > { %3243 = vrcp.f32 %v2759_v15 }
 0x514   : > { %v2774_v28 = vpop.permute.xlu1 %2773 }
 0x515   : > { %3245 = vrcp.f32 %v2774_v28 }
 0x518   : > { %v2789_v61 = vpop.permute.xlu0 %2788 }
 0x519   : > { %3247 = vrcp.f32 %v2789_v61 }
 0x51c   : > { %v2804_v17 = vpop.permute.xlu1 %2803 }
 0x51d   : > { %3249 = vrcp.f32 %v2804_v17 }
 0x51e   : > { %v3244_v26 = vpop.eup %3243 }
 0x51f   : > { %v2762_v52 = vmul.f32 %v3244_v26, %v2754_v18 }
 0x520   : > { %v2819_v34 = vpop.permute.xlu1 %2818 }
 0x521   : > { %3251 = vrcp.f32 %v2819_v34  ;;  %2764 = vrot.lane.b32.xlu1 %v2762_v52, %s3301_s14 }
 0x522   : > { %v3246_v60 = vpop.eup %3245 }
 0x523   : > { %v2777_v6 = vmul.f32 %v3246_v60, %v2769_v33 }
 0x524   : > { %v2834_v10 = vpop.permute.xlu0 %2833 }
 0x525   : > { %3253 = vrcp.f32 %v2834_v10  ;;  %2779 = vrot.lane.b32.xlu1 %v2777_v6, %s3302_s4 }
 0x526   : > { %v3248_v13 = vpop.eup %3247 }
 0x527   : > { %v2792_v12 = vmul.f32 %v3248_v13, %v2784_v58 }
 0x529   : > { %2794 = vrot.lane.b32.xlu1 %v2792_v12, %s3303_s5 }
 0x52a   : > { %v3250_v41 = vpop.eup %3249  ;;  %v2849_v48 = vpop.permute.xlu1 %2848 }
 0x52b   : > { %3255 = vrcp.f32 %v2849_v48  ;;  %v2807_v40 = vmul.f32 %v3250_v41, %v2799_v46 }
 0x52d   : > { %2809 = vrot.lane.b32.xlu1 %v2807_v40, %s3304_s6 }
 0x52e   : > { %v3252_v8 = vpop.eup %3251 }
 0x52f   : > { %v2822_v3 = vmul.f32 %v3252_v8, %v2814_v22 }
 0x531   : > { %2824 = vrot.lane.b32.xlu1 %v2822_v3, %s3305_s7 }
 0x532   : > { %v3254_v31 = vpop.eup %3253 }
 0x533   : > { %v2837_v4 = vmul.f32 %v3254_v31, %v2829_v11 }
 0x535   : > { %2839 = vrot.lane.b32.xlu0 %v2837_v4, %s3306_s8 }
 0x538   : > { %v3256_v25 = vpop.eup %3255 }
 0x539   : > { %v2852_v35 = vmul.f32 %v3256_v25, %v2844_v55 }
 0x53b   : > { %2854 = vrot.lane.b32.xlu1 %v2852_v35, %s3307_s9 }
 0x593   : > { %v2765_v38 = vpop.permute.xlu1 %2764 }
 0x594   : > { %2768 = vst.msk [vmem:[%s4174_s30] sm:$0xff] %vm2767_vm11, %v2765_v38 }
 0x597   : > { %v2780_v16 = vpop.permute.xlu1 %2779 }
 0x598   : > { %2783 = vst.msk [vmem:[%s4174_s30] sm:$0xff] %vm2782_vm12, %v2780_v16 }
 0x59b   : > { %v2795_v36 = vpop.permute.xlu1 %2794 }
 0x59c   : > { %2798 = vst.msk [vmem:[%s4174_s30] sm:$0xff] %vm2797_vm13, %v2795_v36 }
 0x59f   : > { %v2810_v63 = vpop.permute.xlu1 %2809 }
 0x5a0   : > { %2813 = vst.msk [vmem:[%s4174_s30] sm:$0xff] %vm2812_vm14, %v2810_v63 }
 0x5a3   : > { %v2825_v43 = vpop.permute.xlu1 %2824 }
 0x5a4   : > { %2828 = vst.msk [vmem:[%s4174_s30] sm:$0xff] %vm2827_vm15, %v2825_v43 }
 0x5a7   : > { %v2840_v5 = vpop.permute.xlu0 %2839 }
 0x5a8   : > { %2843 = vst.msk [vmem:[%s4174_s30] sm:$0xff] %vm2842_vm0, %v2840_v5 }
 0x5ad   : > { %v2855_v49 = vpop.permute.xlu1 %2854 }
 0x5ae   : > { %2858 = vst.msk [vmem:[%s4174_s30] sm:$0xff] %vm2857_vm1, %v2855_v49 }
 0x5af PF: > { %s13_s16 = sadd.s32 1, %s3295_s16   ;;  %s4215_s12 = smov %s3283_s13 }
 0x5b0   : > { %p10_p10 = scmp.ge.s32.totalorder %s13_s16, 4   ;;  %s4216_s13 = smov %s3367_s21 }
 0x5b1   : > { %s4217_s14 = smov %s3291_s15  ;;  %s4218_s15 = smov %s4220_s17 }
 0x5b2   :  { %12 = sbr.rel (!%p10_p10) target bundleno = 3 (0x3), region = 226 }

</bundles_post_ra>
